<compile_context>
chip_gen: v7x
topology: tpu7x:2x2x1
jax: 0.10.0
libtpu: 0.0.40
codegen_flags: <defaults>
</compile_context>

<pallas_src>
import jax
import jax.numpy as jnp
import numpy as np
from jax.experimental import pallas as pl
from jax.experimental.pallas import tpu as pltpu


# ----------------------------------------------------------------------------
# Fused DARNN kernel
# ----------------------------------------------------------------------------
def _darnn_kernel(xp_ref, y_ref,
                  # encoder weights (packed, gate order [i, f, o, g])
                  wenc_ref, be_ref, ue_ref, ve_ref, wih_e_ref, bl_e_ref, ud_ref,
                  # decoder weights (packed, gate order [i, f, o, g])
                  wdec_ref, bd_ref, vd_ref, wtc_ref, wih_d_ref, wyih_ref,
                  bl_d_ref, wy_ref, by_ref, vy_ref, bvy_ref,
                  # output
                  out_ref):
    f32 = jnp.float32
    xp = xp_ref[...]                       # (B, N, T) == inputs.permute(0,2,1)
    y2d = y_ref[...]                       # (B, T)
    B, N, T = xp.shape
    M = ud_ref.shape[0]
    P = by_ref.shape[1]

    # ------------------------------ encoder ------------------------------
    # Time-invariant U_e(X^T): hoisted out of the recurrence.
    ye = jnp.dot(xp.reshape(B * N, T), ue_ref[...],
                 preferred_element_type=f32).reshape(B, N, T)

    wenc = wenc_ref[...]                   # (2M, 4M+T): [[Whh^T | We_h],[0 | We_s]]
    be, ve = be_ref[...], ve_ref[...]      # (1, T), (1, T)
    wih_e, bl_e = wih_e_ref[...], bl_e_ref[...]   # (N, 4M), (1, 4M)
    ud = ud_ref[...]                       # (M, M)

    h = jnp.zeros((B, M), f32)
    s = jnp.zeros((B, M), f32)
    enc_list, y1_list = [], []
    for t in range(T):                     # fully unrolled, T static & small
        hs = jnp.concatenate([h, s], axis=1)                        # (B, 2M)
        fh = jnp.dot(hs, wenc, preferred_element_type=f32)          # (B, 4M+T)
        xg = fh[:, 4 * M:] + be                                     # (B, T)
        z = jnp.tanh(xg[:, None, :] + ye)                           # (B, N, T)
        e = jnp.sum(z * ve, axis=-1)                                # (B, N)
        ee = jnp.exp(e - jnp.max(e, axis=1, keepdims=True))
        alpha = ee / jnp.sum(ee, axis=1, keepdims=True)             # softmax_N
        w_in = alpha * xp[:, :, t]                                  # (B, N)
        gates = (jnp.dot(w_in, wih_e, preferred_element_type=f32)
                 + fh[:, :4 * M] + bl_e)                            # (B, 4M)
        sig = jax.nn.sigmoid(gates[:, :3 * M])                      # [i | f | o]
        g_g = jnp.tanh(gates[:, 3 * M:])                            # [g]
        i_g, f_g, o_g = sig[:, :M], sig[:, M:2 * M], sig[:, 2 * M:]
        s = f_g * s + i_g * g_g
        h = o_g * jnp.tanh(s)
        enc_list.append(h[:, None, :])
        # decoder's time-invariant U_d(h_t), interleaved to hide MXU latency
        y1_list.append(jnp.dot(h, ud, preferred_element_type=f32)[:, None, :])

    enc = jnp.concatenate(enc_list, axis=1)                         # (B, T, M)
    y1 = jnp.concatenate(y1_list, axis=1)                           # (B, T, M)

    # ------------------------------ decoder ------------------------------
    wdec = wdec_ref[...]                   # (2P, 4P+M): [[Whh^T | Wd_d],[0 | Wd_s]]
    bd, vd, wtc = bd_ref[...], vd_ref[...], wtc_ref[...]
    wih_d, wyih, bl_d = wih_d_ref[...], wyih_ref[...], bl_d_ref[...]

    d = jnp.zeros((B, P), f32)
    sp = jnp.zeros((B, P), f32)
    c_t = jnp.zeros((B, M), f32)
    for t in range(T):                     # fully unrolled
        dsp = jnp.concatenate([d, sp], axis=1)                      # (B, 2P)
        fd = jnp.dot(dsp, wdec, preferred_element_type=f32)         # (B, 4P+M)
        x1 = fd[:, 4 * P:] + bd                                     # (B, M)
        z1 = jnp.tanh(x1[:, None, :] + y1)                          # (B, T, M)
        l = jnp.sum(z1 * vd, axis=-1)                               # (B, T)
        el = jnp.exp(l - jnp.max(l, axis=1, keepdims=True))
        beta = el / jnp.sum(el, axis=1, keepdims=True)              # softmax_T
        c_t = jnp.sum(beta[:, :, None] * enc, axis=1)               # (B, M)
        proj_c = jnp.sum(c_t * wtc, axis=-1, keepdims=True)         # (B, 1)
        y_t = y2d[:, t:t + 1]                                       # (B, 1)
        gates = proj_c * wih_d + y_t * wyih + fd[:, :4 * P] + bl_d  # (B, 4P)
        sig = jax.nn.sigmoid(gates[:, :3 * P])
        g_g = jnp.tanh(gates[:, 3 * P:])
        i_g, f_g, o_g = sig[:, :P], sig[:, P:2 * P], sig[:, 2 * P:]
        sp = f_g * sp + i_g * g_g
        d = o_g * jnp.tanh(sp)

    # y_Tp1 = v_y(W_y([d ; c_t])) — single fused tail matmul
    dc = jnp.concatenate([d, c_t], axis=1)                          # (B, P+M)
    h1 = jnp.dot(dc, wy_ref[...], preferred_element_type=f32) + by_ref[...]
    out_ref[...] = (jnp.sum(h1 * vy_ref[...], axis=-1, keepdims=True)
                    + bvy_ref[...])                                 # (B, 1)


# ----------------------------------------------------------------------------
# Parameters (PyTorch-native shapes) + packed/fused kernel arguments
# ----------------------------------------------------------------------------
def init_params(key, N, M, P, T):
    ks = jax.random.split(key, 22)
    u = lambda k, shape, fan: jax.random.uniform(
        k, shape, jnp.float32, -1.0 / np.sqrt(fan), 1.0 / np.sqrt(fan))
    return {
        # InputAttentionEncoder (Linear weights are (out, in))
        "W_e_w": u(ks[0], (T, 2 * M), 2 * M), "W_e_b": u(ks[1], (T,), 2 * M),
        "U_e_w": u(ks[2], (T, T), T),
        "v_e_w": u(ks[3], (1, T), T),
        "enc_w_ih": u(ks[4], (4 * M, N), M), "enc_w_hh": u(ks[5], (4 * M, M), M),
        "enc_b_ih": u(ks[6], (4 * M,), M), "enc_b_hh": u(ks[7], (4 * M,), M),
        # TemporalAttentionDecoder
        "W_d_w": u(ks[8], (M, 2 * P), 2 * P), "W_d_b": u(ks[9], (M,), 2 * P),
        "U_d_w": u(ks[10], (M, M), M),
        "v_d_w": u(ks[11], (1, M), M),
        "w_tilda_w": u(ks[12], (1, M + 1), M + 1), "w_tilda_b": u(ks[13], (1,), M + 1),
        "dec_w_ih": u(ks[14], (4 * P, 1), P), "dec_w_hh": u(ks[15], (4 * P, P), P),
        "dec_b_ih": u(ks[16], (4 * P,), P), "dec_b_hh": u(ks[17], (4 * P,), P),
        "W_y_w": u(ks[18], (P, P + M), P + M), "W_y_b": u(ks[19], (P,), P + M),
        "v_y_w": u(ks[20], (1, P), P), "v_y_b": u(ks[21], (1,), P),
    }


def _reorder_gates(w, H):
    """PyTorch LSTMCell gate row order [i, f, g, o] -> [i, f, o, g]."""
    return jnp.concatenate([w[:H], w[H:2 * H], w[3 * H:], w[2 * H:3 * H]], axis=0)


def pack_kernel_args(p, N, M, P, T):
    """Transpose to (in, out), fuse the per-step hidden/cell matmuls into one
    packed matrix each, reorder gates to [i, f, o, g] and fold constant
    biases (pure host-side algebra, done once)."""
    f32 = jnp.float32
    # ---- encoder ----
    We_t = p["W_e_w"].T                                        # (2M, T)
    whh_e = _reorder_gates(p["enc_w_hh"], M).T                 # (M, 4M)
    wenc = jnp.concatenate([
        jnp.concatenate([whh_e, We_t[:M]], axis=1),            # h rows
        jnp.concatenate([jnp.zeros((M, 4 * M), f32), We_t[M:]], axis=1),  # s rows
    ], axis=0)                                                 # (2M, 4M+T)
    be = p["W_e_b"].reshape(1, T)
    ue = p["U_e_w"].T                                          # (T, T)
    ve = p["v_e_w"].reshape(1, T)
    wih_e = _reorder_gates(p["enc_w_ih"], M).T                 # (N, 4M)
    bl_e = _reorder_gates(p["enc_b_ih"] + p["enc_b_hh"], M).reshape(1, 4 * M)
    ud = p["U_d_w"].T                                          # (M, M)
    # ---- decoder ----
    Wd_t = p["W_d_w"].T                                        # (2P, M)
    whh_d = _reorder_gates(p["dec_w_hh"], P).T                 # (P, 4P)
    wdec = jnp.concatenate([
        jnp.concatenate([whh_d, Wd_t[:P]], axis=1),            # d rows
        jnp.concatenate([jnp.zeros((P, 4 * P), f32), Wd_t[P:]], axis=1),  # s' rows
    ], axis=0)                                                 # (2P, 4P+M)
    bd = p["W_d_b"].reshape(1, M)
    vd = p["v_d_w"].reshape(1, M)
    wt = p["w_tilda_w"].reshape(-1)                            # (M+1,)
    wtc = wt[:M].reshape(1, M)
    wty = wt[M]
    wih_d = _reorder_gates(p["dec_w_ih"], P).T                 # (1, 4P)
    wyih = wty * wih_d                                         # (1, 4P)
    bl_d = (_reorder_gates(p["dec_b_ih"] + p["dec_b_hh"], P).reshape(1, 4 * P)
            + p["w_tilda_b"][0] * wih_d)                       # (1, 4P)
    wy = p["W_y_w"].T                                          # (P+M, P)
    by = p["W_y_b"].reshape(1, P)
    vy = p["v_y_w"].reshape(1, P)
    bvy = p["v_y_b"].reshape(1, 1)
    return (wenc, be, ue, ve, wih_e, bl_e, ud,
            wdec, bd, vd, wtc, wih_d, wyih, bl_d,
            wy, by, vy, bvy)


# ----------------------------------------------------------------------------
# Wrapper
# ----------------------------------------------------------------------------
def darnn_forward(X, y, params, *, N, M, P, T, batch_tile=None):
    B = X.shape[0]
    if batch_tile is None:
        batch_tile = B        # production: use a multiple of 8 (<= B) per tile
    assert B % batch_tile == 0

    Xp = jnp.swapaxes(X.astype(jnp.float32), 1, 2)      # (B, N, T), layout only
    y2d = y.reshape(B, T).astype(jnp.float32)
    weights = pack_kernel_args(params, N, M, P, T)

    def batch_spec(a):
        blk = (batch_tile,) + a.shape[1:]
        zeros = (0,) * (a.ndim - 1)
        return pl.BlockSpec(blk, lambda i, z=zeros: (i,) + z)

    def full_spec(a):
        zeros = (0,) * a.ndim
        return pl.BlockSpec(a.shape, lambda i, z=zeros: z)

    in_specs = [batch_spec(Xp), batch_spec(y2d)] + [full_spec(a) for a in weights]
    out_spec = pl.BlockSpec((batch_tile, 1), lambda i: (i, 0))

    return pl.pallas_call(
        _darnn_kernel,
        out_shape=jax.ShapeDtypeStruct((B, 1), jnp.float32),
        grid=(B // batch_tile,),
        in_specs=in_specs,
        out_specs=out_spec,
        compiler_params=pltpu.CompilerParams(
            dimension_semantics=("parallel",)),
    )(Xp, y2d, *weights)


# ----------------------------------------------------------------------------
# Pure-JAX reference (mirrors the PyTorch forward literally)
# ----------------------------------------------------------------------------
def reference_darnn(X, y, p, N, M, P, T):
    B = X.shape[0]
    lin = lambda a, w, b=None: a @ w.T + (b if b is not None else 0.0)
    # encoder
    h = jnp.zeros((B, M)); s = jnp.zeros((B, M))
    encoded = []
    for t in range(T):
        hc = jnp.concatenate([h, s], axis=1)
        xe = lin(hc, p["W_e_w"], p["W_e_b"])[:, None, :]
        ye = lin(jnp.transpose(X, (0, 2, 1)), p["U_e_w"])
        z = jnp.tanh(xe + ye)
        e = lin(z, p["v_e_w"])[:, :, 0]
        alpha = jax.nn.softmax(e, axis=1)
        w_in = alpha * X[:, t, :]
        gates = (w_in @ p["enc_w_ih"].T + p["enc_b_ih"]
                 + h @ p["enc_w_hh"].T + p["enc_b_hh"])
        i_g = jax.nn.sigmoid(gates[:, 0 * M:1 * M])
        f_g = jax.nn.sigmoid(gates[:, 1 * M:2 * M])
        g_g = jnp.tanh(gates[:, 2 * M:3 * M])
        o_g = jax.nn.sigmoid(gates[:, 3 * M:4 * M])
        s = f_g * s + i_g * g_g
        h = o_g * jnp.tanh(s)
        encoded.append(h)
    enc = jnp.stack(encoded, axis=1)
    # decoder
    d = jnp.zeros((B, P)); sp = jnp.zeros((B, P)); c_t = jnp.zeros((B, M))
    for t in range(T):
        ds = jnp.concatenate([d, sp], axis=1)
        x1 = lin(ds, p["W_d_w"], p["W_d_b"])[:, None, :]
        y1 = lin(enc, p["U_d_w"])
        z1 = jnp.tanh(x1 + y1)
        l = lin(z1, p["v_d_w"])
        beta = jax.nn.softmax(l, axis=1)
        c_t = jnp.sum(beta * enc, axis=1)
        y_c = jnp.concatenate([c_t, y[:, t, :]], axis=1)
        y_tilda = lin(y_c, p["w_tilda_w"], p["w_tilda_b"])
        gates = (y_tilda @ p["dec_w_ih"].T + p["dec_b_ih"]
                 + d @ p["dec_w_hh"].T + p["dec_b_hh"])
        i_g = jax.nn.sigmoid(gates[:, 0 * P:1 * P])
        f_g = jax.nn.sigmoid(gates[:, 1 * P:2 * P])
        g_g = jnp.tanh(gates[:, 2 * P:3 * P])
        o_g = jax.nn.sigmoid(gates[:, 3 * P:4 * P])
        sp = f_g * sp + i_g * g_g
        d = o_g * jnp.tanh(sp)
    dc = jnp.concatenate([d, c_t], axis=1)
    return lin(lin(dc, p["W_y_w"], p["W_y_b"]), p["v_y_w"], p["v_y_b"])


# ----------------------------------------------------------------------------
if __name__ == "__main__":
    B, T, N, M, P = 2, 8, 4, 32, 32

    key = jax.random.PRNGKey(0)
    k_x, k_y, k_p = jax.random.split(key, 3)
    X_history = jax.random.normal(k_x, (B, T, N), jnp.float32)
    y_history = jax.random.normal(k_y, (B, T, 1), jnp.float32)
    params = init_params(k_p, N, M, P, T)

    out = darnn_forward(X_history, y_history, params, N=N, M=M, P=P, T=T)
    out = jax.block_until_ready(out)

    with jax.default_matmul_precision("highest"):
        ref = jax.block_until_ready(
            reference_darnn(X_history, y_history, params, N, M, P, T))

    assert out.shape == (B, 1)
    assert np.all(np.isfinite(np.asarray(out)))
    assert np.allclose(np.asarray(out), np.asarray(ref), rtol=1e-2, atol=1e-3), (
        f"mismatch: kernel={np.asarray(out)} ref={np.asarray(ref)}")
    print("KERNEL_OK")
</pallas_src>

<mosaic_0001>
module attributes {stable_mosaic.version = 11 : i64} {
  func.func @_darnn_kernel(%arg0: i32, %arg1: memref<2x4x8xf32, #tpu.memory_space<vmem>>, %arg2: memref<2x8xf32, #tpu.memory_space<vmem>>, %arg3: memref<64x136xf32, #tpu.memory_space<vmem>>, %arg4: memref<1x8xf32, #tpu.memory_space<vmem>>, %arg5: memref<8x8xf32, #tpu.memory_space<vmem>>, %arg6: memref<1x8xf32, #tpu.memory_space<vmem>>, %arg7: memref<4x128xf32, #tpu.memory_space<vmem>>, %arg8: memref<1x128xf32, #tpu.memory_space<vmem>>, %arg9: memref<32x32xf32, #tpu.memory_space<vmem>>, %arg10: memref<64x160xf32, #tpu.memory_space<vmem>>, %arg11: memref<1x32xf32, #tpu.memory_space<vmem>>, %arg12: memref<1x32xf32, #tpu.memory_space<vmem>>, %arg13: memref<1x32xf32, #tpu.memory_space<vmem>>, %arg14: memref<1x128xf32, #tpu.memory_space<vmem>>, %arg15: memref<1x128xf32, #tpu.memory_space<vmem>>, %arg16: memref<1x128xf32, #tpu.memory_space<vmem>>, %arg17: memref<64x32xf32, #tpu.memory_space<vmem>>, %arg18: memref<1x32xf32, #tpu.memory_space<vmem>>, %arg19: memref<1x32xf32, #tpu.memory_space<vmem>>, %arg20: memref<1x1xf32, #tpu.memory_space<vmem>>, %arg21: memref<2x1xf32, #tpu.memory_space<vmem>>) attributes {dimension_semantics = [#tpu.dimension_semantics<parallel>], iteration_bounds = array<i64: 1>, scalar_prefetch = 0 : i64, scratch_operands = 0 : i64, tpu.core_type = #tpu.core_type<tc>, window_params = [{transform_indices = @transform_0, window_bounds = array<i64: 2, 4, 8>}, {transform_indices = @transform_1, window_bounds = array<i64: 2, 8>}, {pipeline_mode = #tpu.pipeline_mode<synchronous>, transform_indices = @transform_2, window_bounds = array<i64: 64, 136>}, {pipeline_mode = #tpu.pipeline_mode<synchronous>, transform_indices = @transform_3, window_bounds = array<i64: 1, 8>}, {pipeline_mode = #tpu.pipeline_mode<synchronous>, transform_indices = @transform_4, window_bounds = array<i64: 8, 8>}, {pipeline_mode = #tpu.pipeline_mode<synchronous>, transform_indices = @transform_5, window_bounds = array<i64: 1, 8>}, {pipeline_mode = #tpu.pipeline_mode<synchronous>, transform_indices = @transform_6, window_bounds = array<i64: 4, 128>}, {pipeline_mode = #tpu.pipeline_mode<synchronous>, transform_indices = @transform_7, window_bounds = array<i64: 1, 128>}, {pipeline_mode = #tpu.pipeline_mode<synchronous>, transform_indices = @transform_8, window_bounds = array<i64: 32, 32>}, {pipeline_mode = #tpu.pipeline_mode<synchronous>, transform_indices = @transform_9, window_bounds = array<i64: 64, 160>}, {pipeline_mode = #tpu.pipeline_mode<synchronous>, transform_indices = @transform_10, window_bounds = array<i64: 1, 32>}, {pipeline_mode = #tpu.pipeline_mode<synchronous>, transform_indices = @transform_11, window_bounds = array<i64: 1, 32>}, {pipeline_mode = #tpu.pipeline_mode<synchronous>, transform_indices = @transform_12, window_bounds = array<i64: 1, 32>}, {pipeline_mode = #tpu.pipeline_mode<synchronous>, transform_indices = @transform_13, window_bounds = array<i64: 1, 128>}, {pipeline_mode = #tpu.pipeline_mode<synchronous>, transform_indices = @transform_14, window_bounds = array<i64: 1, 128>}, {pipeline_mode = #tpu.pipeline_mode<synchronous>, transform_indices = @transform_15, window_bounds = array<i64: 1, 128>}, {pipeline_mode = #tpu.pipeline_mode<synchronous>, transform_indices = @transform_16, window_bounds = array<i64: 64, 32>}, {pipeline_mode = #tpu.pipeline_mode<synchronous>, transform_indices = @transform_17, window_bounds = array<i64: 1, 32>}, {pipeline_mode = #tpu.pipeline_mode<synchronous>, transform_indices = @transform_18, window_bounds = array<i64: 1, 32>}, {pipeline_mode = #tpu.pipeline_mode<synchronous>, transform_indices = @transform_19, window_bounds = array<i64: 1, 1>}, {transform_indices = @transform_20, window_bounds = array<i64: 2, 1>}]} {
    %c0 = arith.constant 0 : index
    %c0_0 = arith.constant 0 : index
    %c0_1 = arith.constant 0 : index
    %0 = vector.load %arg1[%c0, %c0_0, %c0_1] : memref<2x4x8xf32, #tpu.memory_space<vmem>>, vector<2x4x8xf32>
    %c0_2 = arith.constant 0 : index
    %c0_3 = arith.constant 0 : index
    %1 = vector.load %arg2[%c0_2, %c0_3] : memref<2x8xf32, #tpu.memory_space<vmem>>, vector<2x8xf32>
    %2 = vector.shape_cast %0 : vector<2x4x8xf32> to vector<8x8xf32>
    %c0_4 = arith.constant 0 : index
    %c0_5 = arith.constant 0 : index
    %3 = vector.load %arg5[%c0_4, %c0_5] : memref<8x8xf32, #tpu.memory_space<vmem>>, vector<8x8xf32>
    %cst = arith.constant dense<0.000000e+00> : vector<8x8xf32>
    %4 = tpu.matmul %2, %3, %cst {dimension_numbers = #tpu.dot_dimension_numbers<[1], [0], [0], [1], [0, 0, 1, 1], [], []>} : vector<8x8xf32>, vector<8x8xf32>, vector<8x8xf32> -> vector<8x8xf32>
    %5 = vector.shape_cast %4 : vector<8x8xf32> to vector<2x4x8xf32>
    %c0_6 = arith.constant 0 : index
    %c0_7 = arith.constant 0 : index
    %6 = vector.load %arg3[%c0_6, %c0_7] : memref<64x136xf32, #tpu.memory_space<vmem>>, vector<64x136xf32>
    %c0_8 = arith.constant 0 : index
    %c0_9 = arith.constant 0 : index
    %7 = vector.load %arg4[%c0_8, %c0_9] : memref<1x8xf32, #tpu.memory_space<vmem>>, vector<1x8xf32>
    %c0_10 = arith.constant 0 : index
    %c0_11 = arith.constant 0 : index
    %8 = vector.load %arg6[%c0_10, %c0_11] : memref<1x8xf32, #tpu.memory_space<vmem>>, vector<1x8xf32>
    %c0_12 = arith.constant 0 : index
    %c0_13 = arith.constant 0 : index
    %9 = vector.load %arg7[%c0_12, %c0_13] : memref<4x128xf32, #tpu.memory_space<vmem>>, vector<4x128xf32>
    %c0_14 = arith.constant 0 : index
    %c0_15 = arith.constant 0 : index
    %10 = vector.load %arg8[%c0_14, %c0_15] : memref<1x128xf32, #tpu.memory_space<vmem>>, vector<1x128xf32>
    %c0_16 = arith.constant 0 : index
    %c0_17 = arith.constant 0 : index
    %11 = vector.load %arg9[%c0_16, %c0_17] : memref<32x32xf32, #tpu.memory_space<vmem>>, vector<32x32xf32>
    %cst_18 = arith.constant 0.000000e+00 : f32
    %12 = vector.broadcast %cst_18 : f32 to vector<2x32xf32>
    %cst_19 = arith.constant 0.000000e+00 : f32
    %13 = vector.broadcast %cst_19 : f32 to vector<2x32xf32>
    %14 = tpu.concatenate %12, %13 in 1 : vector<2x32xf32>, vector<2x32xf32> -> vector<2x64xf32>
    %cst_20 = arith.constant dense<0.000000e+00> : vector<2x136xf32>
    %15 = tpu.matmul %14, %6, %cst_20 {dimension_numbers = #tpu.dot_dimension_numbers<[1], [0], [0], [1], [0, 0, 1, 1], [], []>} : vector<2x64xf32>, vector<64x136xf32>, vector<2x136xf32> -> vector<2x136xf32>
    %16 = vector.extract_strided_slice %15 {offsets = [0, 128], sizes = [2, 8], strides = [1, 1]} : vector<2x136xf32> to vector<2x8xf32>
    %17 = vector.broadcast %7 : vector<1x8xf32> to vector<2x8xf32>
    %18 = arith.addf %16, %17 : vector<2x8xf32>
    %19 = vector.shape_cast %18 : vector<2x8xf32> to vector<2x1x8xf32>
    %20 = vector.broadcast %19 : vector<2x1x8xf32> to vector<2x4x8xf32>
    %21 = arith.addf %20, %5 : vector<2x4x8xf32>
    %22 = math.tanh %21 : vector<2x4x8xf32>
    %23 = vector.shape_cast %8 : vector<1x8xf32> to vector<1x1x8xf32>
    %24 = vector.broadcast %23 : vector<1x1x8xf32> to vector<2x4x8xf32>
    %25 = arith.mulf %22, %24 : vector<2x4x8xf32>
    %cst_21 = arith.constant dense<0.000000e+00> : vector<2x4xf32>
    %26 = vector.multi_reduction <add>, %25, %cst_21 [2] : vector<2x4x8xf32> to vector<2x4xf32>
    %cst_22 = arith.constant dense<0xFF800000> : vector<2xf32>
    %27 = vector.multi_reduction <maximumf>, %26, %cst_22 [1] : vector<2x4xf32> to vector<2xf32>
    %28 = vector.shape_cast %27 : vector<2xf32> to vector<2x1xf32>
    %29 = vector.broadcast %28 : vector<2x1xf32> to vector<2x4xf32>
    %30 = arith.subf %26, %29 : vector<2x4xf32>
    %31 = math.exp %30 : vector<2x4xf32>
    %cst_23 = arith.constant dense<0.000000e+00> : vector<2xf32>
    %32 = vector.multi_reduction <add>, %31, %cst_23 [1] : vector<2x4xf32> to vector<2xf32>
    %33 = vector.shape_cast %32 : vector<2xf32> to vector<2x1xf32>
    %34 = vector.broadcast %33 : vector<2x1xf32> to vector<2x4xf32>
    %35 = arith.divf %31, %34 : vector<2x4xf32>
    %36 = vector.extract_strided_slice %0 {offsets = [0, 0, 0], sizes = [2, 4, 1], strides = [1, 1, 1]} : vector<2x4x8xf32> to vector<2x4x1xf32>
    %37 = vector.shape_cast %36 : vector<2x4x1xf32> to vector<2x4xf32>
    %38 = arith.mulf %35, %37 : vector<2x4xf32>
    %cst_24 = arith.constant dense<0.000000e+00> : vector<2x128xf32>
    %39 = tpu.matmul %38, %9, %cst_24 {dimension_numbers = #tpu.dot_dimension_numbers<[1], [0], [0], [1], [0, 0, 1, 1], [], []>} : vector<2x4xf32>, vector<4x128xf32>, vector<2x128xf32> -> vector<2x128xf32>
    %40 = vector.extract_strided_slice %15 {offsets = [0, 0], sizes = [2, 128], strides = [1, 1]} : vector<2x136xf32> to vector<2x128xf32>
    %41 = arith.addf %39, %40 : vector<2x128xf32>
    %42 = vector.broadcast %10 : vector<1x128xf32> to vector<2x128xf32>
    %43 = arith.addf %41, %42 : vector<2x128xf32>
    %44 = vector.extract_strided_slice %43 {offsets = [0, 0], sizes = [2, 96], strides = [1, 1]} : vector<2x128xf32> to vector<2x96xf32>
    %45 = arith.negf %44 : vector<2x96xf32>
    %46 = math.exp %45 : vector<2x96xf32>
    %cst_25 = arith.constant 1.000000e+00 : f32
    %47 = vector.broadcast %cst_25 : f32 to vector<2x96xf32>
    %48 = arith.addf %47, %46 : vector<2x96xf32>
    %49 = arith.divf %47, %48 : vector<2x96xf32>
    %50 = vector.extract_strided_slice %43 {offsets = [0, 96], sizes = [2, 32], strides = [1, 1]} : vector<2x128xf32> to vector<2x32xf32>
    %51 = math.tanh %50 : vector<2x32xf32>
    %52 = vector.extract_strided_slice %49 {offsets = [0, 0], sizes = [2, 32], strides = [1, 1]} : vector<2x96xf32> to vector<2x32xf32>
    %53 = vector.extract_strided_slice %49 {offsets = [0, 32], sizes = [2, 32], strides = [1, 1]} : vector<2x96xf32> to vector<2x32xf32>
    %54 = vector.extract_strided_slice %49 {offsets = [0, 64], sizes = [2, 32], strides = [1, 1]} : vector<2x96xf32> to vector<2x32xf32>
    %55 = arith.mulf %53, %13 : vector<2x32xf32>
    %56 = arith.mulf %52, %51 : vector<2x32xf32>
    %57 = arith.addf %55, %56 : vector<2x32xf32>
    %58 = math.tanh %57 : vector<2x32xf32>
    %59 = arith.mulf %54, %58 : vector<2x32xf32>
    %60 = vector.shape_cast %59 : vector<2x32xf32> to vector<2x1x32xf32>
    %cst_26 = arith.constant dense<0.000000e+00> : vector<2x32xf32>
    %61 = tpu.matmul %59, %11, %cst_26 {dimension_numbers = #tpu.dot_dimension_numbers<[1], [0], [0], [1], [0, 0, 1, 1], [], []>} : vector<2x32xf32>, vector<32x32xf32>, vector<2x32xf32> -> vector<2x32xf32>
    %62 = vector.shape_cast %61 : vector<2x32xf32> to vector<2x1x32xf32>
    %63 = tpu.concatenate %59, %57 in 1 : vector<2x32xf32>, vector<2x32xf32> -> vector<2x64xf32>
    %cst_27 = arith.constant dense<0.000000e+00> : vector<2x136xf32>
    %64 = tpu.matmul %63, %6, %cst_27 {dimension_numbers = #tpu.dot_dimension_numbers<[1], [0], [0], [1], [0, 0, 1, 1], [], []>} : vector<2x64xf32>, vector<64x136xf32>, vector<2x136xf32> -> vector<2x136xf32>
    %65 = vector.extract_strided_slice %64 {offsets = [0, 128], sizes = [2, 8], strides = [1, 1]} : vector<2x136xf32> to vector<2x8xf32>
    %66 = vector.broadcast %7 : vector<1x8xf32> to vector<2x8xf32>
    %67 = arith.addf %65, %66 : vector<2x8xf32>
    %68 = vector.shape_cast %67 : vector<2x8xf32> to vector<2x1x8xf32>
    %69 = vector.broadcast %68 : vector<2x1x8xf32> to vector<2x4x8xf32>
    %70 = arith.addf %69, %5 : vector<2x4x8xf32>
    %71 = math.tanh %70 : vector<2x4x8xf32>
    %72 = vector.shape_cast %8 : vector<1x8xf32> to vector<1x1x8xf32>
    %73 = vector.broadcast %72 : vector<1x1x8xf32> to vector<2x4x8xf32>
    %74 = arith.mulf %71, %73 : vector<2x4x8xf32>
    %cst_28 = arith.constant dense<0.000000e+00> : vector<2x4xf32>
    %75 = vector.multi_reduction <add>, %74, %cst_28 [2] : vector<2x4x8xf32> to vector<2x4xf32>
    %cst_29 = arith.constant dense<0xFF800000> : vector<2xf32>
    %76 = vector.multi_reduction <maximumf>, %75, %cst_29 [1] : vector<2x4xf32> to vector<2xf32>
    %77 = vector.shape_cast %76 : vector<2xf32> to vector<2x1xf32>
    %78 = vector.broadcast %77 : vector<2x1xf32> to vector<2x4xf32>
    %79 = arith.subf %75, %78 : vector<2x4xf32>
    %80 = math.exp %79 : vector<2x4xf32>
    %cst_30 = arith.constant dense<0.000000e+00> : vector<2xf32>
    %81 = vector.multi_reduction <add>, %80, %cst_30 [1] : vector<2x4xf32> to vector<2xf32>
    %82 = vector.shape_cast %81 : vector<2xf32> to vector<2x1xf32>
    %83 = vector.broadcast %82 : vector<2x1xf32> to vector<2x4xf32>
    %84 = arith.divf %80, %83 : vector<2x4xf32>
    %85 = vector.extract_strided_slice %0 {offsets = [0, 0, 1], sizes = [2, 4, 1], strides = [1, 1, 1]} : vector<2x4x8xf32> to vector<2x4x1xf32>
    %86 = vector.shape_cast %85 : vector<2x4x1xf32> to vector<2x4xf32>
    %87 = arith.mulf %84, %86 : vector<2x4xf32>
    %cst_31 = arith.constant dense<0.000000e+00> : vector<2x128xf32>
    %88 = tpu.matmul %87, %9, %cst_31 {dimension_numbers = #tpu.dot_dimension_numbers<[1], [0], [0], [1], [0, 0, 1, 1], [], []>} : vector<2x4xf32>, vector<4x128xf32>, vector<2x128xf32> -> vector<2x128xf32>
    %89 = vector.extract_strided_slice %64 {offsets = [0, 0], sizes = [2, 128], strides = [1, 1]} : vector<2x136xf32> to vector<2x128xf32>
    %90 = arith.addf %88, %89 : vector<2x128xf32>
    %91 = vector.broadcast %10 : vector<1x128xf32> to vector<2x128xf32>
    %92 = arith.addf %90, %91 : vector<2x128xf32>
    %93 = vector.extract_strided_slice %92 {offsets = [0, 0], sizes = [2, 96], strides = [1, 1]} : vector<2x128xf32> to vector<2x96xf32>
    %94 = arith.negf %93 : vector<2x96xf32>
    %95 = math.exp %94 : vector<2x96xf32>
    %cst_32 = arith.constant 1.000000e+00 : f32
    %96 = vector.broadcast %cst_32 : f32 to vector<2x96xf32>
    %97 = arith.addf %96, %95 : vector<2x96xf32>
    %98 = arith.divf %96, %97 : vector<2x96xf32>
    %99 = vector.extract_strided_slice %92 {offsets = [0, 96], sizes = [2, 32], strides = [1, 1]} : vector<2x128xf32> to vector<2x32xf32>
    %100 = math.tanh %99 : vector<2x32xf32>
    %101 = vector.extract_strided_slice %98 {offsets = [0, 0], sizes = [2, 32], strides = [1, 1]} : vector<2x96xf32> to vector<2x32xf32>
    %102 = vector.extract_strided_slice %98 {offsets = [0, 32], sizes = [2, 32], strides = [1, 1]} : vector<2x96xf32> to vector<2x32xf32>
    %103 = vector.extract_strided_slice %98 {offsets = [0, 64], sizes = [2, 32], strides = [1, 1]} : vector<2x96xf32> to vector<2x32xf32>
    %104 = arith.mulf %102, %57 : vector<2x32xf32>
    %105 = arith.mulf %101, %100 : vector<2x32xf32>
    %106 = arith.addf %104, %105 : vector<2x32xf32>
    %107 = math.tanh %106 : vector<2x32xf32>
    %108 = arith.mulf %103, %107 : vector<2x32xf32>
    %109 = vector.shape_cast %108 : vector<2x32xf32> to vector<2x1x32xf32>
    %cst_33 = arith.constant dense<0.000000e+00> : vector<2x32xf32>
    %110 = tpu.matmul %108, %11, %cst_33 {dimension_numbers = #tpu.dot_dimension_numbers<[1], [0], [0], [1], [0, 0, 1, 1], [], []>} : vector<2x32xf32>, vector<32x32xf32>, vector<2x32xf32> -> vector<2x32xf32>
    %111 = vector.shape_cast %110 : vector<2x32xf32> to vector<2x1x32xf32>
    %112 = tpu.concatenate %108, %106 in 1 : vector<2x32xf32>, vector<2x32xf32> -> vector<2x64xf32>
    %cst_34 = arith.constant dense<0.000000e+00> : vector<2x136xf32>
    %113 = tpu.matmul %112, %6, %cst_34 {dimension_numbers = #tpu.dot_dimension_numbers<[1], [0], [0], [1], [0, 0, 1, 1], [], []>} : vector<2x64xf32>, vector<64x136xf32>, vector<2x136xf32> -> vector<2x136xf32>
    %114 = vector.extract_strided_slice %113 {offsets = [0, 128], sizes = [2, 8], strides = [1, 1]} : vector<2x136xf32> to vector<2x8xf32>
    %115 = vector.broadcast %7 : vector<1x8xf32> to vector<2x8xf32>
    %116 = arith.addf %114, %115 : vector<2x8xf32>
    %117 = vector.shape_cast %116 : vector<2x8xf32> to vector<2x1x8xf32>
    %118 = vector.broadcast %117 : vector<2x1x8xf32> to vector<2x4x8xf32>
    %119 = arith.addf %118, %5 : vector<2x4x8xf32>
    %120 = math.tanh %119 : vector<2x4x8xf32>
    %121 = vector.shape_cast %8 : vector<1x8xf32> to vector<1x1x8xf32>
    %122 = vector.broadcast %121 : vector<1x1x8xf32> to vector<2x4x8xf32>
    %123 = arith.mulf %120, %122 : vector<2x4x8xf32>
    %cst_35 = arith.constant dense<0.000000e+00> : vector<2x4xf32>
    %124 = vector.multi_reduction <add>, %123, %cst_35 [2] : vector<2x4x8xf32> to vector<2x4xf32>
    %cst_36 = arith.constant dense<0xFF800000> : vector<2xf32>
    %125 = vector.multi_reduction <maximumf>, %124, %cst_36 [1] : vector<2x4xf32> to vector<2xf32>
    %126 = vector.shape_cast %125 : vector<2xf32> to vector<2x1xf32>
    %127 = vector.broadcast %126 : vector<2x1xf32> to vector<2x4xf32>
    %128 = arith.subf %124, %127 : vector<2x4xf32>
    %129 = math.exp %128 : vector<2x4xf32>
    %cst_37 = arith.constant dense<0.000000e+00> : vector<2xf32>
    %130 = vector.multi_reduction <add>, %129, %cst_37 [1] : vector<2x4xf32> to vector<2xf32>
    %131 = vector.shape_cast %130 : vector<2xf32> to vector<2x1xf32>
    %132 = vector.broadcast %131 : vector<2x1xf32> to vector<2x4xf32>
    %133 = arith.divf %129, %132 : vector<2x4xf32>
    %134 = vector.extract_strided_slice %0 {offsets = [0, 0, 2], sizes = [2, 4, 1], strides = [1, 1, 1]} : vector<2x4x8xf32> to vector<2x4x1xf32>
    %135 = vector.shape_cast %134 : vector<2x4x1xf32> to vector<2x4xf32>
    %136 = arith.mulf %133, %135 : vector<2x4xf32>
    %cst_38 = arith.constant dense<0.000000e+00> : vector<2x128xf32>
    %137 = tpu.matmul %136, %9, %cst_38 {dimension_numbers = #tpu.dot_dimension_numbers<[1], [0], [0], [1], [0, 0, 1, 1], [], []>} : vector<2x4xf32>, vector<4x128xf32>, vector<2x128xf32> -> vector<2x128xf32>
    %138 = vector.extract_strided_slice %113 {offsets = [0, 0], sizes = [2, 128], strides = [1, 1]} : vector<2x136xf32> to vector<2x128xf32>
    %139 = arith.addf %137, %138 : vector<2x128xf32>
    %140 = vector.broadcast %10 : vector<1x128xf32> to vector<2x128xf32>
    %141 = arith.addf %139, %140 : vector<2x128xf32>
    %142 = vector.extract_strided_slice %141 {offsets = [0, 0], sizes = [2, 96], strides = [1, 1]} : vector<2x128xf32> to vector<2x96xf32>
    %143 = arith.negf %142 : vector<2x96xf32>
    %144 = math.exp %143 : vector<2x96xf32>
    %cst_39 = arith.constant 1.000000e+00 : f32
    %145 = vector.broadcast %cst_39 : f32 to vector<2x96xf32>
    %146 = arith.addf %145, %144 : vector<2x96xf32>
    %147 = arith.divf %145, %146 : vector<2x96xf32>
    %148 = vector.extract_strided_slice %141 {offsets = [0, 96], sizes = [2, 32], strides = [1, 1]} : vector<2x128xf32> to vector<2x32xf32>
    %149 = math.tanh %148 : vector<2x32xf32>
    %150 = vector.extract_strided_slice %147 {offsets = [0, 0], sizes = [2, 32], strides = [1, 1]} : vector<2x96xf32> to vector<2x32xf32>
    %151 = vector.extract_strided_slice %147 {offsets = [0, 32], sizes = [2, 32], strides = [1, 1]} : vector<2x96xf32> to vector<2x32xf32>
    %152 = vector.extract_strided_slice %147 {offsets = [0, 64], sizes = [2, 32], strides = [1, 1]} : vector<2x96xf32> to vector<2x32xf32>
    %153 = arith.mulf %151, %106 : vector<2x32xf32>
    %154 = arith.mulf %150, %149 : vector<2x32xf32>
    %155 = arith.addf %153, %154 : vector<2x32xf32>
    %156 = math.tanh %155 : vector<2x32xf32>
    %157 = arith.mulf %152, %156 : vector<2x32xf32>
    %158 = vector.shape_cast %157 : vector<2x32xf32> to vector<2x1x32xf32>
    %cst_40 = arith.constant dense<0.000000e+00> : vector<2x32xf32>
    %159 = tpu.matmul %157, %11, %cst_40 {dimension_numbers = #tpu.dot_dimension_numbers<[1], [0], [0], [1], [0, 0, 1, 1], [], []>} : vector<2x32xf32>, vector<32x32xf32>, vector<2x32xf32> -> vector<2x32xf32>
    %160 = vector.shape_cast %159 : vector<2x32xf32> to vector<2x1x32xf32>
    %161 = tpu.concatenate %157, %155 in 1 : vector<2x32xf32>, vector<2x32xf32> -> vector<2x64xf32>
    %cst_41 = arith.constant dense<0.000000e+00> : vector<2x136xf32>
    %162 = tpu.matmul %161, %6, %cst_41 {dimension_numbers = #tpu.dot_dimension_numbers<[1], [0], [0], [1], [0, 0, 1, 1], [], []>} : vector<2x64xf32>, vector<64x136xf32>, vector<2x136xf32> -> vector<2x136xf32>
    %163 = vector.extract_strided_slice %162 {offsets = [0, 128], sizes = [2, 8], strides = [1, 1]} : vector<2x136xf32> to vector<2x8xf32>
    %164 = vector.broadcast %7 : vector<1x8xf32> to vector<2x8xf32>
    %165 = arith.addf %163, %164 : vector<2x8xf32>
    %166 = vector.shape_cast %165 : vector<2x8xf32> to vector<2x1x8xf32>
    %167 = vector.broadcast %166 : vector<2x1x8xf32> to vector<2x4x8xf32>
    %168 = arith.addf %167, %5 : vector<2x4x8xf32>
    %169 = math.tanh %168 : vector<2x4x8xf32>
    %170 = vector.shape_cast %8 : vector<1x8xf32> to vector<1x1x8xf32>
    %171 = vector.broadcast %170 : vector<1x1x8xf32> to vector<2x4x8xf32>
    %172 = arith.mulf %169, %171 : vector<2x4x8xf32>
    %cst_42 = arith.constant dense<0.000000e+00> : vector<2x4xf32>
    %173 = vector.multi_reduction <add>, %172, %cst_42 [2] : vector<2x4x8xf32> to vector<2x4xf32>
    %cst_43 = arith.constant dense<0xFF800000> : vector<2xf32>
    %174 = vector.multi_reduction <maximumf>, %173, %cst_43 [1] : vector<2x4xf32> to vector<2xf32>
    %175 = vector.shape_cast %174 : vector<2xf32> to vector<2x1xf32>
    %176 = vector.broadcast %175 : vector<2x1xf32> to vector<2x4xf32>
    %177 = arith.subf %173, %176 : vector<2x4xf32>
    %178 = math.exp %177 : vector<2x4xf32>
    %cst_44 = arith.constant dense<0.000000e+00> : vector<2xf32>
    %179 = vector.multi_reduction <add>, %178, %cst_44 [1] : vector<2x4xf32> to vector<2xf32>
    %180 = vector.shape_cast %179 : vector<2xf32> to vector<2x1xf32>
    %181 = vector.broadcast %180 : vector<2x1xf32> to vector<2x4xf32>
    %182 = arith.divf %178, %181 : vector<2x4xf32>
    %183 = vector.extract_strided_slice %0 {offsets = [0, 0, 3], sizes = [2, 4, 1], strides = [1, 1, 1]} : vector<2x4x8xf32> to vector<2x4x1xf32>
    %184 = vector.shape_cast %183 : vector<2x4x1xf32> to vector<2x4xf32>
    %185 = arith.mulf %182, %184 : vector<2x4xf32>
    %cst_45 = arith.constant dense<0.000000e+00> : vector<2x128xf32>
    %186 = tpu.matmul %185, %9, %cst_45 {dimension_numbers = #tpu.dot_dimension_numbers<[1], [0], [0], [1], [0, 0, 1, 1], [], []>} : vector<2x4xf32>, vector<4x128xf32>, vector<2x128xf32> -> vector<2x128xf32>
    %187 = vector.extract_strided_slice %162 {offsets = [0, 0], sizes = [2, 128], strides = [1, 1]} : vector<2x136xf32> to vector<2x128xf32>
    %188 = arith.addf %186, %187 : vector<2x128xf32>
    %189 = vector.broadcast %10 : vector<1x128xf32> to vector<2x128xf32>
    %190 = arith.addf %188, %189 : vector<2x128xf32>
    %191 = vector.extract_strided_slice %190 {offsets = [0, 0], sizes = [2, 96], strides = [1, 1]} : vector<2x128xf32> to vector<2x96xf32>
    %192 = arith.negf %191 : vector<2x96xf32>
    %193 = math.exp %192 : vector<2x96xf32>
    %cst_46 = arith.constant 1.000000e+00 : f32
    %194 = vector.broadcast %cst_46 : f32 to vector<2x96xf32>
    %195 = arith.addf %194, %193 : vector<2x96xf32>
    %196 = arith.divf %194, %195 : vector<2x96xf32>
    %197 = vector.extract_strided_slice %190 {offsets = [0, 96], sizes = [2, 32], strides = [1, 1]} : vector<2x128xf32> to vector<2x32xf32>
    %198 = math.tanh %197 : vector<2x32xf32>
    %199 = vector.extract_strided_slice %196 {offsets = [0, 0], sizes = [2, 32], strides = [1, 1]} : vector<2x96xf32> to vector<2x32xf32>
    %200 = vector.extract_strided_slice %196 {offsets = [0, 32], sizes = [2, 32], strides = [1, 1]} : vector<2x96xf32> to vector<2x32xf32>
    %201 = vector.extract_strided_slice %196 {offsets = [0, 64], sizes = [2, 32], strides = [1, 1]} : vector<2x96xf32> to vector<2x32xf32>
    %202 = arith.mulf %200, %155 : vector<2x32xf32>
    %203 = arith.mulf %199, %198 : vector<2x32xf32>
    %204 = arith.addf %202, %203 : vector<2x32xf32>
    %205 = math.tanh %204 : vector<2x32xf32>
    %206 = arith.mulf %201, %205 : vector<2x32xf32>
    %207 = vector.shape_cast %206 : vector<2x32xf32> to vector<2x1x32xf32>
    %cst_47 = arith.constant dense<0.000000e+00> : vector<2x32xf32>
    %208 = tpu.matmul %206, %11, %cst_47 {dimension_numbers = #tpu.dot_dimension_numbers<[1], [0], [0], [1], [0, 0, 1, 1], [], []>} : vector<2x32xf32>, vector<32x32xf32>, vector<2x32xf32> -> vector<2x32xf32>
    %209 = vector.shape_cast %208 : vector<2x32xf32> to vector<2x1x32xf32>
    %210 = tpu.concatenate %206, %204 in 1 : vector<2x32xf32>, vector<2x32xf32> -> vector<2x64xf32>
    %cst_48 = arith.constant dense<0.000000e+00> : vector<2x136xf32>
    %211 = tpu.matmul %210, %6, %cst_48 {dimension_numbers = #tpu.dot_dimension_numbers<[1], [0], [0], [1], [0, 0, 1, 1], [], []>} : vector<2x64xf32>, vector<64x136xf32>, vector<2x136xf32> -> vector<2x136xf32>
    %212 = vector.extract_strided_slice %211 {offsets = [0, 128], sizes = [2, 8], strides = [1, 1]} : vector<2x136xf32> to vector<2x8xf32>
    %213 = vector.broadcast %7 : vector<1x8xf32> to vector<2x8xf32>
    %214 = arith.addf %212, %213 : vector<2x8xf32>
    %215 = vector.shape_cast %214 : vector<2x8xf32> to vector<2x1x8xf32>
    %216 = vector.broadcast %215 : vector<2x1x8xf32> to vector<2x4x8xf32>
    %217 = arith.addf %216, %5 : vector<2x4x8xf32>
    %218 = math.tanh %217 : vector<2x4x8xf32>
    %219 = vector.shape_cast %8 : vector<1x8xf32> to vector<1x1x8xf32>
    %220 = vector.broadcast %219 : vector<1x1x8xf32> to vector<2x4x8xf32>
    %221 = arith.mulf %218, %220 : vector<2x4x8xf32>
    %cst_49 = arith.constant dense<0.000000e+00> : vector<2x4xf32>
    %222 = vector.multi_reduction <add>, %221, %cst_49 [2] : vector<2x4x8xf32> to vector<2x4xf32>
    %cst_50 = arith.constant dense<0xFF800000> : vector<2xf32>
    %223 = vector.multi_reduction <maximumf>, %222, %cst_50 [1] : vector<2x4xf32> to vector<2xf32>
    %224 = vector.shape_cast %223 : vector<2xf32> to vector<2x1xf32>
    %225 = vector.broadcast %224 : vector<2x1xf32> to vector<2x4xf32>
    %226 = arith.subf %222, %225 : vector<2x4xf32>
    %227 = math.exp %226 : vector<2x4xf32>
    %cst_51 = arith.constant dense<0.000000e+00> : vector<2xf32>
    %228 = vector.multi_reduction <add>, %227, %cst_51 [1] : vector<2x4xf32> to vector<2xf32>
    %229 = vector.shape_cast %228 : vector<2xf32> to vector<2x1xf32>
    %230 = vector.broadcast %229 : vector<2x1xf32> to vector<2x4xf32>
    %231 = arith.divf %227, %230 : vector<2x4xf32>
    %232 = vector.extract_strided_slice %0 {offsets = [0, 0, 4], sizes = [2, 4, 1], strides = [1, 1, 1]} : vector<2x4x8xf32> to vector<2x4x1xf32>
    %233 = vector.shape_cast %232 : vector<2x4x1xf32> to vector<2x4xf32>
    %234 = arith.mulf %231, %233 : vector<2x4xf32>
    %cst_52 = arith.constant dense<0.000000e+00> : vector<2x128xf32>
    %235 = tpu.matmul %234, %9, %cst_52 {dimension_numbers = #tpu.dot_dimension_numbers<[1], [0], [0], [1], [0, 0, 1, 1], [], []>} : vector<2x4xf32>, vector<4x128xf32>, vector<2x128xf32> -> vector<2x128xf32>
    %236 = vector.extract_strided_slice %211 {offsets = [0, 0], sizes = [2, 128], strides = [1, 1]} : vector<2x136xf32> to vector<2x128xf32>
    %237 = arith.addf %235, %236 : vector<2x128xf32>
    %238 = vector.broadcast %10 : vector<1x128xf32> to vector<2x128xf32>
    %239 = arith.addf %237, %238 : vector<2x128xf32>
    %240 = vector.extract_strided_slice %239 {offsets = [0, 0], sizes = [2, 96], strides = [1, 1]} : vector<2x128xf32> to vector<2x96xf32>
    %241 = arith.negf %240 : vector<2x96xf32>
    %242 = math.exp %241 : vector<2x96xf32>
    %cst_53 = arith.constant 1.000000e+00 : f32
    %243 = vector.broadcast %cst_53 : f32 to vector<2x96xf32>
    %244 = arith.addf %243, %242 : vector<2x96xf32>
    %245 = arith.divf %243, %244 : vector<2x96xf32>
    %246 = vector.extract_strided_slice %239 {offsets = [0, 96], sizes = [2, 32], strides = [1, 1]} : vector<2x128xf32> to vector<2x32xf32>
    %247 = math.tanh %246 : vector<2x32xf32>
    %248 = vector.extract_strided_slice %245 {offsets = [0, 0], sizes = [2, 32], strides = [1, 1]} : vector<2x96xf32> to vector<2x32xf32>
    %249 = vector.extract_strided_slice %245 {offsets = [0, 32], sizes = [2, 32], strides = [1, 1]} : vector<2x96xf32> to vector<2x32xf32>
    %250 = vector.extract_strided_slice %245 {offsets = [0, 64], sizes = [2, 32], strides = [1, 1]} : vector<2x96xf32> to vector<2x32xf32>
    %251 = arith.mulf %249, %204 : vector<2x32xf32>
    %252 = arith.mulf %248, %247 : vector<2x32xf32>
    %253 = arith.addf %251, %252 : vector<2x32xf32>
    %254 = math.tanh %253 : vector<2x32xf32>
    %255 = arith.mulf %250, %254 : vector<2x32xf32>
    %256 = vector.shape_cast %255 : vector<2x32xf32> to vector<2x1x32xf32>
    %cst_54 = arith.constant dense<0.000000e+00> : vector<2x32xf32>
    %257 = tpu.matmul %255, %11, %cst_54 {dimension_numbers = #tpu.dot_dimension_numbers<[1], [0], [0], [1], [0, 0, 1, 1], [], []>} : vector<2x32xf32>, vector<32x32xf32>, vector<2x32xf32> -> vector<2x32xf32>
    %258 = vector.shape_cast %257 : vector<2x32xf32> to vector<2x1x32xf32>
    %259 = tpu.concatenate %255, %253 in 1 : vector<2x32xf32>, vector<2x32xf32> -> vector<2x64xf32>
    %cst_55 = arith.constant dense<0.000000e+00> : vector<2x136xf32>
    %260 = tpu.matmul %259, %6, %cst_55 {dimension_numbers = #tpu.dot_dimension_numbers<[1], [0], [0], [1], [0, 0, 1, 1], [], []>} : vector<2x64xf32>, vector<64x136xf32>, vector<2x136xf32> -> vector<2x136xf32>
    %261 = vector.extract_strided_slice %260 {offsets = [0, 128], sizes = [2, 8], strides = [1, 1]} : vector<2x136xf32> to vector<2x8xf32>
    %262 = vector.broadcast %7 : vector<1x8xf32> to vector<2x8xf32>
    %263 = arith.addf %261, %262 : vector<2x8xf32>
    %264 = vector.shape_cast %263 : vector<2x8xf32> to vector<2x1x8xf32>
    %265 = vector.broadcast %264 : vector<2x1x8xf32> to vector<2x4x8xf32>
    %266 = arith.addf %265, %5 : vector<2x4x8xf32>
    %267 = math.tanh %266 : vector<2x4x8xf32>
    %268 = vector.shape_cast %8 : vector<1x8xf32> to vector<1x1x8xf32>
    %269 = vector.broadcast %268 : vector<1x1x8xf32> to vector<2x4x8xf32>
    %270 = arith.mulf %267, %269 : vector<2x4x8xf32>
    %cst_56 = arith.constant dense<0.000000e+00> : vector<2x4xf32>
    %271 = vector.multi_reduction <add>, %270, %cst_56 [2] : vector<2x4x8xf32> to vector<2x4xf32>
    %cst_57 = arith.constant dense<0xFF800000> : vector<2xf32>
    %272 = vector.multi_reduction <maximumf>, %271, %cst_57 [1] : vector<2x4xf32> to vector<2xf32>
    %273 = vector.shape_cast %272 : vector<2xf32> to vector<2x1xf32>
    %274 = vector.broadcast %273 : vector<2x1xf32> to vector<2x4xf32>
    %275 = arith.subf %271, %274 : vector<2x4xf32>
    %276 = math.exp %275 : vector<2x4xf32>
    %cst_58 = arith.constant dense<0.000000e+00> : vector<2xf32>
    %277 = vector.multi_reduction <add>, %276, %cst_58 [1] : vector<2x4xf32> to vector<2xf32>
    %278 = vector.shape_cast %277 : vector<2xf32> to vector<2x1xf32>
    %279 = vector.broadcast %278 : vector<2x1xf32> to vector<2x4xf32>
    %280 = arith.divf %276, %279 : vector<2x4xf32>
    %281 = vector.extract_strided_slice %0 {offsets = [0, 0, 5], sizes = [2, 4, 1], strides = [1, 1, 1]} : vector<2x4x8xf32> to vector<2x4x1xf32>
    %282 = vector.shape_cast %281 : vector<2x4x1xf32> to vector<2x4xf32>
    %283 = arith.mulf %280, %282 : vector<2x4xf32>
    %cst_59 = arith.constant dense<0.000000e+00> : vector<2x128xf32>
    %284 = tpu.matmul %283, %9, %cst_59 {dimension_numbers = #tpu.dot_dimension_numbers<[1], [0], [0], [1], [0, 0, 1, 1], [], []>} : vector<2x4xf32>, vector<4x128xf32>, vector<2x128xf32> -> vector<2x128xf32>
    %285 = vector.extract_strided_slice %260 {offsets = [0, 0], sizes = [2, 128], strides = [1, 1]} : vector<2x136xf32> to vector<2x128xf32>
    %286 = arith.addf %284, %285 : vector<2x128xf32>
    %287 = vector.broadcast %10 : vector<1x128xf32> to vector<2x128xf32>
    %288 = arith.addf %286, %287 : vector<2x128xf32>
    %289 = vector.extract_strided_slice %288 {offsets = [0, 0], sizes = [2, 96], strides = [1, 1]} : vector<2x128xf32> to vector<2x96xf32>
    %290 = arith.negf %289 : vector<2x96xf32>
    %291 = math.exp %290 : vector<2x96xf32>
    %cst_60 = arith.constant 1.000000e+00 : f32
    %292 = vector.broadcast %cst_60 : f32 to vector<2x96xf32>
    %293 = arith.addf %292, %291 : vector<2x96xf32>
    %294 = arith.divf %292, %293 : vector<2x96xf32>
    %295 = vector.extract_strided_slice %288 {offsets = [0, 96], sizes = [2, 32], strides = [1, 1]} : vector<2x128xf32> to vector<2x32xf32>
    %296 = math.tanh %295 : vector<2x32xf32>
    %297 = vector.extract_strided_slice %294 {offsets = [0, 0], sizes = [2, 32], strides = [1, 1]} : vector<2x96xf32> to vector<2x32xf32>
    %298 = vector.extract_strided_slice %294 {offsets = [0, 32], sizes = [2, 32], strides = [1, 1]} : vector<2x96xf32> to vector<2x32xf32>
    %299 = vector.extract_strided_slice %294 {offsets = [0, 64], sizes = [2, 32], strides = [1, 1]} : vector<2x96xf32> to vector<2x32xf32>
    %300 = arith.mulf %298, %253 : vector<2x32xf32>
    %301 = arith.mulf %297, %296 : vector<2x32xf32>
    %302 = arith.addf %300, %301 : vector<2x32xf32>
    %303 = math.tanh %302 : vector<2x32xf32>
    %304 = arith.mulf %299, %303 : vector<2x32xf32>
    %305 = vector.shape_cast %304 : vector<2x32xf32> to vector<2x1x32xf32>
    %cst_61 = arith.constant dense<0.000000e+00> : vector<2x32xf32>
    %306 = tpu.matmul %304, %11, %cst_61 {dimension_numbers = #tpu.dot_dimension_numbers<[1], [0], [0], [1], [0, 0, 1, 1], [], []>} : vector<2x32xf32>, vector<32x32xf32>, vector<2x32xf32> -> vector<2x32xf32>
    %307 = vector.shape_cast %306 : vector<2x32xf32> to vector<2x1x32xf32>
    %308 = tpu.concatenate %304, %302 in 1 : vector<2x32xf32>, vector<2x32xf32> -> vector<2x64xf32>
    %cst_62 = arith.constant dense<0.000000e+00> : vector<2x136xf32>
    %309 = tpu.matmul %308, %6, %cst_62 {dimension_numbers = #tpu.dot_dimension_numbers<[1], [0], [0], [1], [0, 0, 1, 1], [], []>} : vector<2x64xf32>, vector<64x136xf32>, vector<2x136xf32> -> vector<2x136xf32>
    %310 = vector.extract_strided_slice %309 {offsets = [0, 128], sizes = [2, 8], strides = [1, 1]} : vector<2x136xf32> to vector<2x8xf32>
    %311 = vector.broadcast %7 : vector<1x8xf32> to vector<2x8xf32>
    %312 = arith.addf %310, %311 : vector<2x8xf32>
    %313 = vector.shape_cast %312 : vector<2x8xf32> to vector<2x1x8xf32>
    %314 = vector.broadcast %313 : vector<2x1x8xf32> to vector<2x4x8xf32>
    %315 = arith.addf %314, %5 : vector<2x4x8xf32>
    %316 = math.tanh %315 : vector<2x4x8xf32>
    %317 = vector.shape_cast %8 : vector<1x8xf32> to vector<1x1x8xf32>
    %318 = vector.broadcast %317 : vector<1x1x8xf32> to vector<2x4x8xf32>
    %319 = arith.mulf %316, %318 : vector<2x4x8xf32>
    %cst_63 = arith.constant dense<0.000000e+00> : vector<2x4xf32>
    %320 = vector.multi_reduction <add>, %319, %cst_63 [2] : vector<2x4x8xf32> to vector<2x4xf32>
    %cst_64 = arith.constant dense<0xFF800000> : vector<2xf32>
    %321 = vector.multi_reduction <maximumf>, %320, %cst_64 [1] : vector<2x4xf32> to vector<2xf32>
    %322 = vector.shape_cast %321 : vector<2xf32> to vector<2x1xf32>
    %323 = vector.broadcast %322 : vector<2x1xf32> to vector<2x4xf32>
    %324 = arith.subf %320, %323 : vector<2x4xf32>
    %325 = math.exp %324 : vector<2x4xf32>
    %cst_65 = arith.constant dense<0.000000e+00> : vector<2xf32>
    %326 = vector.multi_reduction <add>, %325, %cst_65 [1] : vector<2x4xf32> to vector<2xf32>
    %327 = vector.shape_cast %326 : vector<2xf32> to vector<2x1xf32>
    %328 = vector.broadcast %327 : vector<2x1xf32> to vector<2x4xf32>
    %329 = arith.divf %325, %328 : vector<2x4xf32>
    %330 = vector.extract_strided_slice %0 {offsets = [0, 0, 6], sizes = [2, 4, 1], strides = [1, 1, 1]} : vector<2x4x8xf32> to vector<2x4x1xf32>
    %331 = vector.shape_cast %330 : vector<2x4x1xf32> to vector<2x4xf32>
    %332 = arith.mulf %329, %331 : vector<2x4xf32>
    %cst_66 = arith.constant dense<0.000000e+00> : vector<2x128xf32>
    %333 = tpu.matmul %332, %9, %cst_66 {dimension_numbers = #tpu.dot_dimension_numbers<[1], [0], [0], [1], [0, 0, 1, 1], [], []>} : vector<2x4xf32>, vector<4x128xf32>, vector<2x128xf32> -> vector<2x128xf32>
    %334 = vector.extract_strided_slice %309 {offsets = [0, 0], sizes = [2, 128], strides = [1, 1]} : vector<2x136xf32> to vector<2x128xf32>
    %335 = arith.addf %333, %334 : vector<2x128xf32>
    %336 = vector.broadcast %10 : vector<1x128xf32> to vector<2x128xf32>
    %337 = arith.addf %335, %336 : vector<2x128xf32>
    %338 = vector.extract_strided_slice %337 {offsets = [0, 0], sizes = [2, 96], strides = [1, 1]} : vector<2x128xf32> to vector<2x96xf32>
    %339 = arith.negf %338 : vector<2x96xf32>
    %340 = math.exp %339 : vector<2x96xf32>
    %cst_67 = arith.constant 1.000000e+00 : f32
    %341 = vector.broadcast %cst_67 : f32 to vector<2x96xf32>
    %342 = arith.addf %341, %340 : vector<2x96xf32>
    %343 = arith.divf %341, %342 : vector<2x96xf32>
    %344 = vector.extract_strided_slice %337 {offsets = [0, 96], sizes = [2, 32], strides = [1, 1]} : vector<2x128xf32> to vector<2x32xf32>
    %345 = math.tanh %344 : vector<2x32xf32>
    %346 = vector.extract_strided_slice %343 {offsets = [0, 0], sizes = [2, 32], strides = [1, 1]} : vector<2x96xf32> to vector<2x32xf32>
    %347 = vector.extract_strided_slice %343 {offsets = [0, 32], sizes = [2, 32], strides = [1, 1]} : vector<2x96xf32> to vector<2x32xf32>
    %348 = vector.extract_strided_slice %343 {offsets = [0, 64], sizes = [2, 32], strides = [1, 1]} : vector<2x96xf32> to vector<2x32xf32>
    %349 = arith.mulf %347, %302 : vector<2x32xf32>
    %350 = arith.mulf %346, %345 : vector<2x32xf32>
    %351 = arith.addf %349, %350 : vector<2x32xf32>
    %352 = math.tanh %351 : vector<2x32xf32>
    %353 = arith.mulf %348, %352 : vector<2x32xf32>
    %354 = vector.shape_cast %353 : vector<2x32xf32> to vector<2x1x32xf32>
    %cst_68 = arith.constant dense<0.000000e+00> : vector<2x32xf32>
    %355 = tpu.matmul %353, %11, %cst_68 {dimension_numbers = #tpu.dot_dimension_numbers<[1], [0], [0], [1], [0, 0, 1, 1], [], []>} : vector<2x32xf32>, vector<32x32xf32>, vector<2x32xf32> -> vector<2x32xf32>
    %356 = vector.shape_cast %355 : vector<2x32xf32> to vector<2x1x32xf32>
    %357 = tpu.concatenate %353, %351 in 1 : vector<2x32xf32>, vector<2x32xf32> -> vector<2x64xf32>
    %cst_69 = arith.constant dense<0.000000e+00> : vector<2x136xf32>
    %358 = tpu.matmul %357, %6, %cst_69 {dimension_numbers = #tpu.dot_dimension_numbers<[1], [0], [0], [1], [0, 0, 1, 1], [], []>} : vector<2x64xf32>, vector<64x136xf32>, vector<2x136xf32> -> vector<2x136xf32>
    %359 = vector.extract_strided_slice %358 {offsets = [0, 128], sizes = [2, 8], strides = [1, 1]} : vector<2x136xf32> to vector<2x8xf32>
    %360 = vector.broadcast %7 : vector<1x8xf32> to vector<2x8xf32>
    %361 = arith.addf %359, %360 : vector<2x8xf32>
    %362 = vector.shape_cast %361 : vector<2x8xf32> to vector<2x1x8xf32>
    %363 = vector.broadcast %362 : vector<2x1x8xf32> to vector<2x4x8xf32>
    %364 = arith.addf %363, %5 : vector<2x4x8xf32>
    %365 = math.tanh %364 : vector<2x4x8xf32>
    %366 = vector.shape_cast %8 : vector<1x8xf32> to vector<1x1x8xf32>
    %367 = vector.broadcast %366 : vector<1x1x8xf32> to vector<2x4x8xf32>
    %368 = arith.mulf %365, %367 : vector<2x4x8xf32>
    %cst_70 = arith.constant dense<0.000000e+00> : vector<2x4xf32>
    %369 = vector.multi_reduction <add>, %368, %cst_70 [2] : vector<2x4x8xf32> to vector<2x4xf32>
    %cst_71 = arith.constant dense<0xFF800000> : vector<2xf32>
    %370 = vector.multi_reduction <maximumf>, %369, %cst_71 [1] : vector<2x4xf32> to vector<2xf32>
    %371 = vector.shape_cast %370 : vector<2xf32> to vector<2x1xf32>
    %372 = vector.broadcast %371 : vector<2x1xf32> to vector<2x4xf32>
    %373 = arith.subf %369, %372 : vector<2x4xf32>
    %374 = math.exp %373 : vector<2x4xf32>
    %cst_72 = arith.constant dense<0.000000e+00> : vector<2xf32>
    %375 = vector.multi_reduction <add>, %374, %cst_72 [1] : vector<2x4xf32> to vector<2xf32>
    %376 = vector.shape_cast %375 : vector<2xf32> to vector<2x1xf32>
    %377 = vector.broadcast %376 : vector<2x1xf32> to vector<2x4xf32>
    %378 = arith.divf %374, %377 : vector<2x4xf32>
    %379 = vector.extract_strided_slice %0 {offsets = [0, 0, 7], sizes = [2, 4, 1], strides = [1, 1, 1]} : vector<2x4x8xf32> to vector<2x4x1xf32>
    %380 = vector.shape_cast %379 : vector<2x4x1xf32> to vector<2x4xf32>
    %381 = arith.mulf %378, %380 : vector<2x4xf32>
    %cst_73 = arith.constant dense<0.000000e+00> : vector<2x128xf32>
    %382 = tpu.matmul %381, %9, %cst_73 {dimension_numbers = #tpu.dot_dimension_numbers<[1], [0], [0], [1], [0, 0, 1, 1], [], []>} : vector<2x4xf32>, vector<4x128xf32>, vector<2x128xf32> -> vector<2x128xf32>
    %383 = vector.extract_strided_slice %358 {offsets = [0, 0], sizes = [2, 128], strides = [1, 1]} : vector<2x136xf32> to vector<2x128xf32>
    %384 = arith.addf %382, %383 : vector<2x128xf32>
    %385 = vector.broadcast %10 : vector<1x128xf32> to vector<2x128xf32>
    %386 = arith.addf %384, %385 : vector<2x128xf32>
    %387 = vector.extract_strided_slice %386 {offsets = [0, 0], sizes = [2, 96], strides = [1, 1]} : vector<2x128xf32> to vector<2x96xf32>
    %388 = arith.negf %387 : vector<2x96xf32>
    %389 = math.exp %388 : vector<2x96xf32>
    %cst_74 = arith.constant 1.000000e+00 : f32
    %390 = vector.broadcast %cst_74 : f32 to vector<2x96xf32>
    %391 = arith.addf %390, %389 : vector<2x96xf32>
    %392 = arith.divf %390, %391 : vector<2x96xf32>
    %393 = vector.extract_strided_slice %386 {offsets = [0, 96], sizes = [2, 32], strides = [1, 1]} : vector<2x128xf32> to vector<2x32xf32>
    %394 = math.tanh %393 : vector<2x32xf32>
    %395 = vector.extract_strided_slice %392 {offsets = [0, 0], sizes = [2, 32], strides = [1, 1]} : vector<2x96xf32> to vector<2x32xf32>
    %396 = vector.extract_strided_slice %392 {offsets = [0, 32], sizes = [2, 32], strides = [1, 1]} : vector<2x96xf32> to vector<2x32xf32>
    %397 = vector.extract_strided_slice %392 {offsets = [0, 64], sizes = [2, 32], strides = [1, 1]} : vector<2x96xf32> to vector<2x32xf32>
    %398 = arith.mulf %396, %351 : vector<2x32xf32>
    %399 = arith.mulf %395, %394 : vector<2x32xf32>
    %400 = arith.addf %398, %399 : vector<2x32xf32>
    %401 = math.tanh %400 : vector<2x32xf32>
    %402 = arith.mulf %397, %401 : vector<2x32xf32>
    %403 = vector.shape_cast %402 : vector<2x32xf32> to vector<2x1x32xf32>
    %cst_75 = arith.constant dense<0.000000e+00> : vector<2x32xf32>
    %404 = tpu.matmul %402, %11, %cst_75 {dimension_numbers = #tpu.dot_dimension_numbers<[1], [0], [0], [1], [0, 0, 1, 1], [], []>} : vector<2x32xf32>, vector<32x32xf32>, vector<2x32xf32> -> vector<2x32xf32>
    %405 = vector.shape_cast %404 : vector<2x32xf32> to vector<2x1x32xf32>
    %406 = tpu.concatenate %60, %109, %158, %207, %256, %305, %354, %403 in 1 : vector<2x1x32xf32>, vector<2x1x32xf32>, vector<2x1x32xf32>, vector<2x1x32xf32>, vector<2x1x32xf32>, vector<2x1x32xf32>, vector<2x1x32xf32>, vector<2x1x32xf32> -> vector<2x8x32xf32>
    %407 = tpu.concatenate %62, %111, %160, %209, %258, %307, %356, %405 in 1 : vector<2x1x32xf32>, vector<2x1x32xf32>, vector<2x1x32xf32>, vector<2x1x32xf32>, vector<2x1x32xf32>, vector<2x1x32xf32>, vector<2x1x32xf32>, vector<2x1x32xf32> -> vector<2x8x32xf32>
    %c0_76 = arith.constant 0 : index
    %c0_77 = arith.constant 0 : index
    %408 = vector.load %arg10[%c0_76, %c0_77] : memref<64x160xf32, #tpu.memory_space<vmem>>, vector<64x160xf32>
    %c0_78 = arith.constant 0 : index
    %c0_79 = arith.constant 0 : index
    %409 = vector.load %arg11[%c0_78, %c0_79] : memref<1x32xf32, #tpu.memory_space<vmem>>, vector<1x32xf32>
    %c0_80 = arith.constant 0 : index
    %c0_81 = arith.constant 0 : index
    %410 = vector.load %arg12[%c0_80, %c0_81] : memref<1x32xf32, #tpu.memory_space<vmem>>, vector<1x32xf32>
    %c0_82 = arith.constant 0 : index
    %c0_83 = arith.constant 0 : index
    %411 = vector.load %arg13[%c0_82, %c0_83] : memref<1x32xf32, #tpu.memory_space<vmem>>, vector<1x32xf32>
    %c0_84 = arith.constant 0 : index
    %c0_85 = arith.constant 0 : index
    %412 = vector.load %arg14[%c0_84, %c0_85] : memref<1x128xf32, #tpu.memory_space<vmem>>, vector<1x128xf32>
    %c0_86 = arith.constant 0 : index
    %c0_87 = arith.constant 0 : index
    %413 = vector.load %arg15[%c0_86, %c0_87] : memref<1x128xf32, #tpu.memory_space<vmem>>, vector<1x128xf32>
    %c0_88 = arith.constant 0 : index
    %c0_89 = arith.constant 0 : index
    %414 = vector.load %arg16[%c0_88, %c0_89] : memref<1x128xf32, #tpu.memory_space<vmem>>, vector<1x128xf32>
    %cst_90 = arith.constant 0.000000e+00 : f32
    %415 = vector.broadcast %cst_90 : f32 to vector<2x32xf32>
    %cst_91 = arith.constant 0.000000e+00 : f32
    %416 = vector.broadcast %cst_91 : f32 to vector<2x32xf32>
    %417 = tpu.concatenate %415, %416 in 1 : vector<2x32xf32>, vector<2x32xf32> -> vector<2x64xf32>
    %cst_92 = arith.constant dense<0.000000e+00> : vector<2x160xf32>
    %418 = tpu.matmul %417, %408, %cst_92 {dimension_numbers = #tpu.dot_dimension_numbers<[1], [0], [0], [1], [0, 0, 1, 1], [], []>} : vector<2x64xf32>, vector<64x160xf32>, vector<2x160xf32> -> vector<2x160xf32>
    %419 = vector.extract_strided_slice %418 {offsets = [0, 128], sizes = [2, 32], strides = [1, 1]} : vector<2x160xf32> to vector<2x32xf32>
    %420 = vector.broadcast %409 : vector<1x32xf32> to vector<2x32xf32>
    %421 = arith.addf %419, %420 : vector<2x32xf32>
    %422 = vector.shape_cast %421 : vector<2x32xf32> to vector<2x1x32xf32>
    %423 = vector.broadcast %422 : vector<2x1x32xf32> to vector<2x8x32xf32>
    %424 = arith.addf %423, %407 : vector<2x8x32xf32>
    %425 = math.tanh %424 : vector<2x8x32xf32>
    %426 = vector.shape_cast %410 : vector<1x32xf32> to vector<1x1x32xf32>
    %427 = vector.broadcast %426 : vector<1x1x32xf32> to vector<2x8x32xf32>
    %428 = arith.mulf %425, %427 : vector<2x8x32xf32>
    %cst_93 = arith.constant dense<0.000000e+00> : vector<2x8xf32>
    %429 = vector.multi_reduction <add>, %428, %cst_93 [2] : vector<2x8x32xf32> to vector<2x8xf32>
    %cst_94 = arith.constant dense<0xFF800000> : vector<2xf32>
    %430 = vector.multi_reduction <maximumf>, %429, %cst_94 [1] : vector<2x8xf32> to vector<2xf32>
    %431 = vector.shape_cast %430 : vector<2xf32> to vector<2x1xf32>
    %432 = vector.broadcast %431 : vector<2x1xf32> to vector<2x8xf32>
    %433 = arith.subf %429, %432 : vector<2x8xf32>
    %434 = math.exp %433 : vector<2x8xf32>
    %cst_95 = arith.constant dense<0.000000e+00> : vector<2xf32>
    %435 = vector.multi_reduction <add>, %434, %cst_95 [1] : vector<2x8xf32> to vector<2xf32>
    %436 = vector.shape_cast %435 : vector<2xf32> to vector<2x1xf32>
    %437 = vector.broadcast %436 : vector<2x1xf32> to vector<2x8xf32>
    %438 = arith.divf %434, %437 : vector<2x8xf32>
    %439 = vector.shape_cast %438 : vector<2x8xf32> to vector<2x8x1xf32>
    %440 = vector.broadcast %439 : vector<2x8x1xf32> to vector<2x8x32xf32>
    %441 = arith.mulf %440, %406 : vector<2x8x32xf32>
    %cst_96 = arith.constant dense<0.000000e+00> : vector<2x32xf32>
    %442 = vector.multi_reduction <add>, %441, %cst_96 [1] : vector<2x8x32xf32> to vector<2x32xf32>
    %443 = vector.broadcast %411 : vector<1x32xf32> to vector<2x32xf32>
    %444 = arith.mulf %442, %443 : vector<2x32xf32>
    %cst_97 = arith.constant dense<0.000000e+00> : vector<2xf32>
    %445 = vector.multi_reduction <add>, %444, %cst_97 [1] : vector<2x32xf32> to vector<2xf32>
    %446 = vector.shape_cast %445 : vector<2xf32> to vector<2x1xf32>
    %447 = vector.extract_strided_slice %1 {offsets = [0, 0], sizes = [2, 1], strides = [1, 1]} : vector<2x8xf32> to vector<2x1xf32>
    %448 = vector.broadcast %446 : vector<2x1xf32> to vector<2x128xf32>
    %449 = vector.broadcast %412 : vector<1x128xf32> to vector<2x128xf32>
    %450 = arith.mulf %448, %449 : vector<2x128xf32>
    %451 = vector.broadcast %447 : vector<2x1xf32> to vector<2x128xf32>
    %452 = vector.broadcast %413 : vector<1x128xf32> to vector<2x128xf32>
    %453 = arith.mulf %451, %452 : vector<2x128xf32>
    %454 = arith.addf %450, %453 : vector<2x128xf32>
    %455 = vector.extract_strided_slice %418 {offsets = [0, 0], sizes = [2, 128], strides = [1, 1]} : vector<2x160xf32> to vector<2x128xf32>
    %456 = arith.addf %454, %455 : vector<2x128xf32>
    %457 = vector.broadcast %414 : vector<1x128xf32> to vector<2x128xf32>
    %458 = arith.addf %456, %457 : vector<2x128xf32>
    %459 = vector.extract_strided_slice %458 {offsets = [0, 0], sizes = [2, 96], strides = [1, 1]} : vector<2x128xf32> to vector<2x96xf32>
    %460 = arith.negf %459 : vector<2x96xf32>
    %461 = math.exp %460 : vector<2x96xf32>
    %cst_98 = arith.constant 1.000000e+00 : f32
    %462 = vector.broadcast %cst_98 : f32 to vector<2x96xf32>
    %463 = arith.addf %462, %461 : vector<2x96xf32>
    %464 = arith.divf %462, %463 : vector<2x96xf32>
    %465 = vector.extract_strided_slice %458 {offsets = [0, 96], sizes = [2, 32], strides = [1, 1]} : vector<2x128xf32> to vector<2x32xf32>
    %466 = math.tanh %465 : vector<2x32xf32>
    %467 = vector.extract_strided_slice %464 {offsets = [0, 0], sizes = [2, 32], strides = [1, 1]} : vector<2x96xf32> to vector<2x32xf32>
    %468 = vector.extract_strided_slice %464 {offsets = [0, 32], sizes = [2, 32], strides = [1, 1]} : vector<2x96xf32> to vector<2x32xf32>
    %469 = vector.extract_strided_slice %464 {offsets = [0, 64], sizes = [2, 32], strides = [1, 1]} : vector<2x96xf32> to vector<2x32xf32>
    %470 = arith.mulf %468, %416 : vector<2x32xf32>
    %471 = arith.mulf %467, %466 : vector<2x32xf32>
    %472 = arith.addf %470, %471 : vector<2x32xf32>
    %473 = math.tanh %472 : vector<2x32xf32>
    %474 = arith.mulf %469, %473 : vector<2x32xf32>
    %475 = tpu.concatenate %474, %472 in 1 : vector<2x32xf32>, vector<2x32xf32> -> vector<2x64xf32>
    %cst_99 = arith.constant dense<0.000000e+00> : vector<2x160xf32>
    %476 = tpu.matmul %475, %408, %cst_99 {dimension_numbers = #tpu.dot_dimension_numbers<[1], [0], [0], [1], [0, 0, 1, 1], [], []>} : vector<2x64xf32>, vector<64x160xf32>, vector<2x160xf32> -> vector<2x160xf32>
    %477 = vector.extract_strided_slice %476 {offsets = [0, 128], sizes = [2, 32], strides = [1, 1]} : vector<2x160xf32> to vector<2x32xf32>
    %478 = vector.broadcast %409 : vector<1x32xf32> to vector<2x32xf32>
    %479 = arith.addf %477, %478 : vector<2x32xf32>
    %480 = vector.shape_cast %479 : vector<2x32xf32> to vector<2x1x32xf32>
    %481 = vector.broadcast %480 : vector<2x1x32xf32> to vector<2x8x32xf32>
    %482 = arith.addf %481, %407 : vector<2x8x32xf32>
    %483 = math.tanh %482 : vector<2x8x32xf32>
    %484 = vector.shape_cast %410 : vector<1x32xf32> to vector<1x1x32xf32>
    %485 = vector.broadcast %484 : vector<1x1x32xf32> to vector<2x8x32xf32>
    %486 = arith.mulf %483, %485 : vector<2x8x32xf32>
    %cst_100 = arith.constant dense<0.000000e+00> : vector<2x8xf32>
    %487 = vector.multi_reduction <add>, %486, %cst_100 [2] : vector<2x8x32xf32> to vector<2x8xf32>
    %cst_101 = arith.constant dense<0xFF800000> : vector<2xf32>
    %488 = vector.multi_reduction <maximumf>, %487, %cst_101 [1] : vector<2x8xf32> to vector<2xf32>
    %489 = vector.shape_cast %488 : vector<2xf32> to vector<2x1xf32>
    %490 = vector.broadcast %489 : vector<2x1xf32> to vector<2x8xf32>
    %491 = arith.subf %487, %490 : vector<2x8xf32>
    %492 = math.exp %491 : vector<2x8xf32>
    %cst_102 = arith.constant dense<0.000000e+00> : vector<2xf32>
    %493 = vector.multi_reduction <add>, %492, %cst_102 [1] : vector<2x8xf32> to vector<2xf32>
    %494 = vector.shape_cast %493 : vector<2xf32> to vector<2x1xf32>
    %495 = vector.broadcast %494 : vector<2x1xf32> to vector<2x8xf32>
    %496 = arith.divf %492, %495 : vector<2x8xf32>
    %497 = vector.shape_cast %496 : vector<2x8xf32> to vector<2x8x1xf32>
    %498 = vector.broadcast %497 : vector<2x8x1xf32> to vector<2x8x32xf32>
    %499 = arith.mulf %498, %406 : vector<2x8x32xf32>
    %cst_103 = arith.constant dense<0.000000e+00> : vector<2x32xf32>
    %500 = vector.multi_reduction <add>, %499, %cst_103 [1] : vector<2x8x32xf32> to vector<2x32xf32>
    %501 = vector.broadcast %411 : vector<1x32xf32> to vector<2x32xf32>
    %502 = arith.mulf %500, %501 : vector<2x32xf32>
    %cst_104 = arith.constant dense<0.000000e+00> : vector<2xf32>
    %503 = vector.multi_reduction <add>, %502, %cst_104 [1] : vector<2x32xf32> to vector<2xf32>
    %504 = vector.shape_cast %503 : vector<2xf32> to vector<2x1xf32>
    %505 = vector.extract_strided_slice %1 {offsets = [0, 1], sizes = [2, 1], strides = [1, 1]} : vector<2x8xf32> to vector<2x1xf32>
    %506 = vector.broadcast %504 : vector<2x1xf32> to vector<2x128xf32>
    %507 = vector.broadcast %412 : vector<1x128xf32> to vector<2x128xf32>
    %508 = arith.mulf %506, %507 : vector<2x128xf32>
    %509 = vector.broadcast %505 : vector<2x1xf32> to vector<2x128xf32>
    %510 = vector.broadcast %413 : vector<1x128xf32> to vector<2x128xf32>
    %511 = arith.mulf %509, %510 : vector<2x128xf32>
    %512 = arith.addf %508, %511 : vector<2x128xf32>
    %513 = vector.extract_strided_slice %476 {offsets = [0, 0], sizes = [2, 128], strides = [1, 1]} : vector<2x160xf32> to vector<2x128xf32>
    %514 = arith.addf %512, %513 : vector<2x128xf32>
    %515 = vector.broadcast %414 : vector<1x128xf32> to vector<2x128xf32>
    %516 = arith.addf %514, %515 : vector<2x128xf32>
    %517 = vector.extract_strided_slice %516 {offsets = [0, 0], sizes = [2, 96], strides = [1, 1]} : vector<2x128xf32> to vector<2x96xf32>
    %518 = arith.negf %517 : vector<2x96xf32>
    %519 = math.exp %518 : vector<2x96xf32>
    %cst_105 = arith.constant 1.000000e+00 : f32
    %520 = vector.broadcast %cst_105 : f32 to vector<2x96xf32>
    %521 = arith.addf %520, %519 : vector<2x96xf32>
    %522 = arith.divf %520, %521 : vector<2x96xf32>
    %523 = vector.extract_strided_slice %516 {offsets = [0, 96], sizes = [2, 32], strides = [1, 1]} : vector<2x128xf32> to vector<2x32xf32>
    %524 = math.tanh %523 : vector<2x32xf32>
    %525 = vector.extract_strided_slice %522 {offsets = [0, 0], sizes = [2, 32], strides = [1, 1]} : vector<2x96xf32> to vector<2x32xf32>
    %526 = vector.extract_strided_slice %522 {offsets = [0, 32], sizes = [2, 32], strides = [1, 1]} : vector<2x96xf32> to vector<2x32xf32>
    %527 = vector.extract_strided_slice %522 {offsets = [0, 64], sizes = [2, 32], strides = [1, 1]} : vector<2x96xf32> to vector<2x32xf32>
    %528 = arith.mulf %526, %472 : vector<2x32xf32>
    %529 = arith.mulf %525, %524 : vector<2x32xf32>
    %530 = arith.addf %528, %529 : vector<2x32xf32>
    %531 = math.tanh %530 : vector<2x32xf32>
    %532 = arith.mulf %527, %531 : vector<2x32xf32>
    %533 = tpu.concatenate %532, %530 in 1 : vector<2x32xf32>, vector<2x32xf32> -> vector<2x64xf32>
    %cst_106 = arith.constant dense<0.000000e+00> : vector<2x160xf32>
    %534 = tpu.matmul %533, %408, %cst_106 {dimension_numbers = #tpu.dot_dimension_numbers<[1], [0], [0], [1], [0, 0, 1, 1], [], []>} : vector<2x64xf32>, vector<64x160xf32>, vector<2x160xf32> -> vector<2x160xf32>
    %535 = vector.extract_strided_slice %534 {offsets = [0, 128], sizes = [2, 32], strides = [1, 1]} : vector<2x160xf32> to vector<2x32xf32>
    %536 = vector.broadcast %409 : vector<1x32xf32> to vector<2x32xf32>
    %537 = arith.addf %535, %536 : vector<2x32xf32>
    %538 = vector.shape_cast %537 : vector<2x32xf32> to vector<2x1x32xf32>
    %539 = vector.broadcast %538 : vector<2x1x32xf32> to vector<2x8x32xf32>
    %540 = arith.addf %539, %407 : vector<2x8x32xf32>
    %541 = math.tanh %540 : vector<2x8x32xf32>
    %542 = vector.shape_cast %410 : vector<1x32xf32> to vector<1x1x32xf32>
    %543 = vector.broadcast %542 : vector<1x1x32xf32> to vector<2x8x32xf32>
    %544 = arith.mulf %541, %543 : vector<2x8x32xf32>
    %cst_107 = arith.constant dense<0.000000e+00> : vector<2x8xf32>
    %545 = vector.multi_reduction <add>, %544, %cst_107 [2] : vector<2x8x32xf32> to vector<2x8xf32>
    %cst_108 = arith.constant dense<0xFF800000> : vector<2xf32>
    %546 = vector.multi_reduction <maximumf>, %545, %cst_108 [1] : vector<2x8xf32> to vector<2xf32>
    %547 = vector.shape_cast %546 : vector<2xf32> to vector<2x1xf32>
    %548 = vector.broadcast %547 : vector<2x1xf32> to vector<2x8xf32>
    %549 = arith.subf %545, %548 : vector<2x8xf32>
    %550 = math.exp %549 : vector<2x8xf32>
    %cst_109 = arith.constant dense<0.000000e+00> : vector<2xf32>
    %551 = vector.multi_reduction <add>, %550, %cst_109 [1] : vector<2x8xf32> to vector<2xf32>
    %552 = vector.shape_cast %551 : vector<2xf32> to vector<2x1xf32>
    %553 = vector.broadcast %552 : vector<2x1xf32> to vector<2x8xf32>
    %554 = arith.divf %550, %553 : vector<2x8xf32>
    %555 = vector.shape_cast %554 : vector<2x8xf32> to vector<2x8x1xf32>
    %556 = vector.broadcast %555 : vector<2x8x1xf32> to vector<2x8x32xf32>
    %557 = arith.mulf %556, %406 : vector<2x8x32xf32>
    %cst_110 = arith.constant dense<0.000000e+00> : vector<2x32xf32>
    %558 = vector.multi_reduction <add>, %557, %cst_110 [1] : vector<2x8x32xf32> to vector<2x32xf32>
    %559 = vector.broadcast %411 : vector<1x32xf32> to vector<2x32xf32>
    %560 = arith.mulf %558, %559 : vector<2x32xf32>
    %cst_111 = arith.constant dense<0.000000e+00> : vector<2xf32>
    %561 = vector.multi_reduction <add>, %560, %cst_111 [1] : vector<2x32xf32> to vector<2xf32>
    %562 = vector.shape_cast %561 : vector<2xf32> to vector<2x1xf32>
    %563 = vector.extract_strided_slice %1 {offsets = [0, 2], sizes = [2, 1], strides = [1, 1]} : vector<2x8xf32> to vector<2x1xf32>
    %564 = vector.broadcast %562 : vector<2x1xf32> to vector<2x128xf32>
    %565 = vector.broadcast %412 : vector<1x128xf32> to vector<2x128xf32>
    %566 = arith.mulf %564, %565 : vector<2x128xf32>
    %567 = vector.broadcast %563 : vector<2x1xf32> to vector<2x128xf32>
    %568 = vector.broadcast %413 : vector<1x128xf32> to vector<2x128xf32>
    %569 = arith.mulf %567, %568 : vector<2x128xf32>
    %570 = arith.addf %566, %569 : vector<2x128xf32>
    %571 = vector.extract_strided_slice %534 {offsets = [0, 0], sizes = [2, 128], strides = [1, 1]} : vector<2x160xf32> to vector<2x128xf32>
    %572 = arith.addf %570, %571 : vector<2x128xf32>
    %573 = vector.broadcast %414 : vector<1x128xf32> to vector<2x128xf32>
    %574 = arith.addf %572, %573 : vector<2x128xf32>
    %575 = vector.extract_strided_slice %574 {offsets = [0, 0], sizes = [2, 96], strides = [1, 1]} : vector<2x128xf32> to vector<2x96xf32>
    %576 = arith.negf %575 : vector<2x96xf32>
    %577 = math.exp %576 : vector<2x96xf32>
    %cst_112 = arith.constant 1.000000e+00 : f32
    %578 = vector.broadcast %cst_112 : f32 to vector<2x96xf32>
    %579 = arith.addf %578, %577 : vector<2x96xf32>
    %580 = arith.divf %578, %579 : vector<2x96xf32>
    %581 = vector.extract_strided_slice %574 {offsets = [0, 96], sizes = [2, 32], strides = [1, 1]} : vector<2x128xf32> to vector<2x32xf32>
    %582 = math.tanh %581 : vector<2x32xf32>
    %583 = vector.extract_strided_slice %580 {offsets = [0, 0], sizes = [2, 32], strides = [1, 1]} : vector<2x96xf32> to vector<2x32xf32>
    %584 = vector.extract_strided_slice %580 {offsets = [0, 32], sizes = [2, 32], strides = [1, 1]} : vector<2x96xf32> to vector<2x32xf32>
    %585 = vector.extract_strided_slice %580 {offsets = [0, 64], sizes = [2, 32], strides = [1, 1]} : vector<2x96xf32> to vector<2x32xf32>
    %586 = arith.mulf %584, %530 : vector<2x32xf32>
    %587 = arith.mulf %583, %582 : vector<2x32xf32>
    %588 = arith.addf %586, %587 : vector<2x32xf32>
    %589 = math.tanh %588 : vector<2x32xf32>
    %590 = arith.mulf %585, %589 : vector<2x32xf32>
    %591 = tpu.concatenate %590, %588 in 1 : vector<2x32xf32>, vector<2x32xf32> -> vector<2x64xf32>
    %cst_113 = arith.constant dense<0.000000e+00> : vector<2x160xf32>
    %592 = tpu.matmul %591, %408, %cst_113 {dimension_numbers = #tpu.dot_dimension_numbers<[1], [0], [0], [1], [0, 0, 1, 1], [], []>} : vector<2x64xf32>, vector<64x160xf32>, vector<2x160xf32> -> vector<2x160xf32>
    %593 = vector.extract_strided_slice %592 {offsets = [0, 128], sizes = [2, 32], strides = [1, 1]} : vector<2x160xf32> to vector<2x32xf32>
    %594 = vector.broadcast %409 : vector<1x32xf32> to vector<2x32xf32>
    %595 = arith.addf %593, %594 : vector<2x32xf32>
    %596 = vector.shape_cast %595 : vector<2x32xf32> to vector<2x1x32xf32>
    %597 = vector.broadcast %596 : vector<2x1x32xf32> to vector<2x8x32xf32>
    %598 = arith.addf %597, %407 : vector<2x8x32xf32>
    %599 = math.tanh %598 : vector<2x8x32xf32>
    %600 = vector.shape_cast %410 : vector<1x32xf32> to vector<1x1x32xf32>
    %601 = vector.broadcast %600 : vector<1x1x32xf32> to vector<2x8x32xf32>
    %602 = arith.mulf %599, %601 : vector<2x8x32xf32>
    %cst_114 = arith.constant dense<0.000000e+00> : vector<2x8xf32>
    %603 = vector.multi_reduction <add>, %602, %cst_114 [2] : vector<2x8x32xf32> to vector<2x8xf32>
    %cst_115 = arith.constant dense<0xFF800000> : vector<2xf32>
    %604 = vector.multi_reduction <maximumf>, %603, %cst_115 [1] : vector<2x8xf32> to vector<2xf32>
    %605 = vector.shape_cast %604 : vector<2xf32> to vector<2x1xf32>
    %606 = vector.broadcast %605 : vector<2x1xf32> to vector<2x8xf32>
    %607 = arith.subf %603, %606 : vector<2x8xf32>
    %608 = math.exp %607 : vector<2x8xf32>
    %cst_116 = arith.constant dense<0.000000e+00> : vector<2xf32>
    %609 = vector.multi_reduction <add>, %608, %cst_116 [1] : vector<2x8xf32> to vector<2xf32>
    %610 = vector.shape_cast %609 : vector<2xf32> to vector<2x1xf32>
    %611 = vector.broadcast %610 : vector<2x1xf32> to vector<2x8xf32>
    %612 = arith.divf %608, %611 : vector<2x8xf32>
    %613 = vector.shape_cast %612 : vector<2x8xf32> to vector<2x8x1xf32>
    %614 = vector.broadcast %613 : vector<2x8x1xf32> to vector<2x8x32xf32>
    %615 = arith.mulf %614, %406 : vector<2x8x32xf32>
    %cst_117 = arith.constant dense<0.000000e+00> : vector<2x32xf32>
    %616 = vector.multi_reduction <add>, %615, %cst_117 [1] : vector<2x8x32xf32> to vector<2x32xf32>
    %617 = vector.broadcast %411 : vector<1x32xf32> to vector<2x32xf32>
    %618 = arith.mulf %616, %617 : vector<2x32xf32>
    %cst_118 = arith.constant dense<0.000000e+00> : vector<2xf32>
    %619 = vector.multi_reduction <add>, %618, %cst_118 [1] : vector<2x32xf32> to vector<2xf32>
    %620 = vector.shape_cast %619 : vector<2xf32> to vector<2x1xf32>
    %621 = vector.extract_strided_slice %1 {offsets = [0, 3], sizes = [2, 1], strides = [1, 1]} : vector<2x8xf32> to vector<2x1xf32>
    %622 = vector.broadcast %620 : vector<2x1xf32> to vector<2x128xf32>
    %623 = vector.broadcast %412 : vector<1x128xf32> to vector<2x128xf32>
    %624 = arith.mulf %622, %623 : vector<2x128xf32>
    %625 = vector.broadcast %621 : vector<2x1xf32> to vector<2x128xf32>
    %626 = vector.broadcast %413 : vector<1x128xf32> to vector<2x128xf32>
    %627 = arith.mulf %625, %626 : vector<2x128xf32>
    %628 = arith.addf %624, %627 : vector<2x128xf32>
    %629 = vector.extract_strided_slice %592 {offsets = [0, 0], sizes = [2, 128], strides = [1, 1]} : vector<2x160xf32> to vector<2x128xf32>
    %630 = arith.addf %628, %629 : vector<2x128xf32>
    %631 = vector.broadcast %414 : vector<1x128xf32> to vector<2x128xf32>
    %632 = arith.addf %630, %631 : vector<2x128xf32>
    %633 = vector.extract_strided_slice %632 {offsets = [0, 0], sizes = [2, 96], strides = [1, 1]} : vector<2x128xf32> to vector<2x96xf32>
    %634 = arith.negf %633 : vector<2x96xf32>
    %635 = math.exp %634 : vector<2x96xf32>
    %cst_119 = arith.constant 1.000000e+00 : f32
    %636 = vector.broadcast %cst_119 : f32 to vector<2x96xf32>
    %637 = arith.addf %636, %635 : vector<2x96xf32>
    %638 = arith.divf %636, %637 : vector<2x96xf32>
    %639 = vector.extract_strided_slice %632 {offsets = [0, 96], sizes = [2, 32], strides = [1, 1]} : vector<2x128xf32> to vector<2x32xf32>
    %640 = math.tanh %639 : vector<2x32xf32>
    %641 = vector.extract_strided_slice %638 {offsets = [0, 0], sizes = [2, 32], strides = [1, 1]} : vector<2x96xf32> to vector<2x32xf32>
    %642 = vector.extract_strided_slice %638 {offsets = [0, 32], sizes = [2, 32], strides = [1, 1]} : vector<2x96xf32> to vector<2x32xf32>
    %643 = vector.extract_strided_slice %638 {offsets = [0, 64], sizes = [2, 32], strides = [1, 1]} : vector<2x96xf32> to vector<2x32xf32>
    %644 = arith.mulf %642, %588 : vector<2x32xf32>
    %645 = arith.mulf %641, %640 : vector<2x32xf32>
    %646 = arith.addf %644, %645 : vector<2x32xf32>
    %647 = math.tanh %646 : vector<2x32xf32>
    %648 = arith.mulf %643, %647 : vector<2x32xf32>
    %649 = tpu.concatenate %648, %646 in 1 : vector<2x32xf32>, vector<2x32xf32> -> vector<2x64xf32>
    %cst_120 = arith.constant dense<0.000000e+00> : vector<2x160xf32>
    %650 = tpu.matmul %649, %408, %cst_120 {dimension_numbers = #tpu.dot_dimension_numbers<[1], [0], [0], [1], [0, 0, 1, 1], [], []>} : vector<2x64xf32>, vector<64x160xf32>, vector<2x160xf32> -> vector<2x160xf32>
    %651 = vector.extract_strided_slice %650 {offsets = [0, 128], sizes = [2, 32], strides = [1, 1]} : vector<2x160xf32> to vector<2x32xf32>
    %652 = vector.broadcast %409 : vector<1x32xf32> to vector<2x32xf32>
    %653 = arith.addf %651, %652 : vector<2x32xf32>
    %654 = vector.shape_cast %653 : vector<2x32xf32> to vector<2x1x32xf32>
    %655 = vector.broadcast %654 : vector<2x1x32xf32> to vector<2x8x32xf32>
    %656 = arith.addf %655, %407 : vector<2x8x32xf32>
    %657 = math.tanh %656 : vector<2x8x32xf32>
    %658 = vector.shape_cast %410 : vector<1x32xf32> to vector<1x1x32xf32>
    %659 = vector.broadcast %658 : vector<1x1x32xf32> to vector<2x8x32xf32>
    %660 = arith.mulf %657, %659 : vector<2x8x32xf32>
    %cst_121 = arith.constant dense<0.000000e+00> : vector<2x8xf32>
    %661 = vector.multi_reduction <add>, %660, %cst_121 [2] : vector<2x8x32xf32> to vector<2x8xf32>
    %cst_122 = arith.constant dense<0xFF800000> : vector<2xf32>
    %662 = vector.multi_reduction <maximumf>, %661, %cst_122 [1] : vector<2x8xf32> to vector<2xf32>
    %663 = vector.shape_cast %662 : vector<2xf32> to vector<2x1xf32>
    %664 = vector.broadcast %663 : vector<2x1xf32> to vector<2x8xf32>
    %665 = arith.subf %661, %664 : vector<2x8xf32>
    %666 = math.exp %665 : vector<2x8xf32>
    %cst_123 = arith.constant dense<0.000000e+00> : vector<2xf32>
    %667 = vector.multi_reduction <add>, %666, %cst_123 [1] : vector<2x8xf32> to vector<2xf32>
    %668 = vector.shape_cast %667 : vector<2xf32> to vector<2x1xf32>
    %669 = vector.broadcast %668 : vector<2x1xf32> to vector<2x8xf32>
    %670 = arith.divf %666, %669 : vector<2x8xf32>
    %671 = vector.shape_cast %670 : vector<2x8xf32> to vector<2x8x1xf32>
    %672 = vector.broadcast %671 : vector<2x8x1xf32> to vector<2x8x32xf32>
    %673 = arith.mulf %672, %406 : vector<2x8x32xf32>
    %cst_124 = arith.constant dense<0.000000e+00> : vector<2x32xf32>
    %674 = vector.multi_reduction <add>, %673, %cst_124 [1] : vector<2x8x32xf32> to vector<2x32xf32>
    %675 = vector.broadcast %411 : vector<1x32xf32> to vector<2x32xf32>
    %676 = arith.mulf %674, %675 : vector<2x32xf32>
    %cst_125 = arith.constant dense<0.000000e+00> : vector<2xf32>
    %677 = vector.multi_reduction <add>, %676, %cst_125 [1] : vector<2x32xf32> to vector<2xf32>
    %678 = vector.shape_cast %677 : vector<2xf32> to vector<2x1xf32>
    %679 = vector.extract_strided_slice %1 {offsets = [0, 4], sizes = [2, 1], strides = [1, 1]} : vector<2x8xf32> to vector<2x1xf32>
    %680 = vector.broadcast %678 : vector<2x1xf32> to vector<2x128xf32>
    %681 = vector.broadcast %412 : vector<1x128xf32> to vector<2x128xf32>
    %682 = arith.mulf %680, %681 : vector<2x128xf32>
    %683 = vector.broadcast %679 : vector<2x1xf32> to vector<2x128xf32>
    %684 = vector.broadcast %413 : vector<1x128xf32> to vector<2x128xf32>
    %685 = arith.mulf %683, %684 : vector<2x128xf32>
    %686 = arith.addf %682, %685 : vector<2x128xf32>
    %687 = vector.extract_strided_slice %650 {offsets = [0, 0], sizes = [2, 128], strides = [1, 1]} : vector<2x160xf32> to vector<2x128xf32>
    %688 = arith.addf %686, %687 : vector<2x128xf32>
    %689 = vector.broadcast %414 : vector<1x128xf32> to vector<2x128xf32>
    %690 = arith.addf %688, %689 : vector<2x128xf32>
    %691 = vector.extract_strided_slice %690 {offsets = [0, 0], sizes = [2, 96], strides = [1, 1]} : vector<2x128xf32> to vector<2x96xf32>
    %692 = arith.negf %691 : vector<2x96xf32>
    %693 = math.exp %692 : vector<2x96xf32>
    %cst_126 = arith.constant 1.000000e+00 : f32
    %694 = vector.broadcast %cst_126 : f32 to vector<2x96xf32>
    %695 = arith.addf %694, %693 : vector<2x96xf32>
    %696 = arith.divf %694, %695 : vector<2x96xf32>
    %697 = vector.extract_strided_slice %690 {offsets = [0, 96], sizes = [2, 32], strides = [1, 1]} : vector<2x128xf32> to vector<2x32xf32>
    %698 = math.tanh %697 : vector<2x32xf32>
    %699 = vector.extract_strided_slice %696 {offsets = [0, 0], sizes = [2, 32], strides = [1, 1]} : vector<2x96xf32> to vector<2x32xf32>
    %700 = vector.extract_strided_slice %696 {offsets = [0, 32], sizes = [2, 32], strides = [1, 1]} : vector<2x96xf32> to vector<2x32xf32>
    %701 = vector.extract_strided_slice %696 {offsets = [0, 64], sizes = [2, 32], strides = [1, 1]} : vector<2x96xf32> to vector<2x32xf32>
    %702 = arith.mulf %700, %646 : vector<2x32xf32>
    %703 = arith.mulf %699, %698 : vector<2x32xf32>
    %704 = arith.addf %702, %703 : vector<2x32xf32>
    %705 = math.tanh %704 : vector<2x32xf32>
    %706 = arith.mulf %701, %705 : vector<2x32xf32>
    %707 = tpu.concatenate %706, %704 in 1 : vector<2x32xf32>, vector<2x32xf32> -> vector<2x64xf32>
    %cst_127 = arith.constant dense<0.000000e+00> : vector<2x160xf32>
    %708 = tpu.matmul %707, %408, %cst_127 {dimension_numbers = #tpu.dot_dimension_numbers<[1], [0], [0], [1], [0, 0, 1, 1], [], []>} : vector<2x64xf32>, vector<64x160xf32>, vector<2x160xf32> -> vector<2x160xf32>
    %709 = vector.extract_strided_slice %708 {offsets = [0, 128], sizes = [2, 32], strides = [1, 1]} : vector<2x160xf32> to vector<2x32xf32>
    %710 = vector.broadcast %409 : vector<1x32xf32> to vector<2x32xf32>
    %711 = arith.addf %709, %710 : vector<2x32xf32>
    %712 = vector.shape_cast %711 : vector<2x32xf32> to vector<2x1x32xf32>
    %713 = vector.broadcast %712 : vector<2x1x32xf32> to vector<2x8x32xf32>
    %714 = arith.addf %713, %407 : vector<2x8x32xf32>
    %715 = math.tanh %714 : vector<2x8x32xf32>
    %716 = vector.shape_cast %410 : vector<1x32xf32> to vector<1x1x32xf32>
    %717 = vector.broadcast %716 : vector<1x1x32xf32> to vector<2x8x32xf32>
    %718 = arith.mulf %715, %717 : vector<2x8x32xf32>
    %cst_128 = arith.constant dense<0.000000e+00> : vector<2x8xf32>
    %719 = vector.multi_reduction <add>, %718, %cst_128 [2] : vector<2x8x32xf32> to vector<2x8xf32>
    %cst_129 = arith.constant dense<0xFF800000> : vector<2xf32>
    %720 = vector.multi_reduction <maximumf>, %719, %cst_129 [1] : vector<2x8xf32> to vector<2xf32>
    %721 = vector.shape_cast %720 : vector<2xf32> to vector<2x1xf32>
    %722 = vector.broadcast %721 : vector<2x1xf32> to vector<2x8xf32>
    %723 = arith.subf %719, %722 : vector<2x8xf32>
    %724 = math.exp %723 : vector<2x8xf32>
    %cst_130 = arith.constant dense<0.000000e+00> : vector<2xf32>
    %725 = vector.multi_reduction <add>, %724, %cst_130 [1] : vector<2x8xf32> to vector<2xf32>
    %726 = vector.shape_cast %725 : vector<2xf32> to vector<2x1xf32>
    %727 = vector.broadcast %726 : vector<2x1xf32> to vector<2x8xf32>
    %728 = arith.divf %724, %727 : vector<2x8xf32>
    %729 = vector.shape_cast %728 : vector<2x8xf32> to vector<2x8x1xf32>
    %730 = vector.broadcast %729 : vector<2x8x1xf32> to vector<2x8x32xf32>
    %731 = arith.mulf %730, %406 : vector<2x8x32xf32>
    %cst_131 = arith.constant dense<0.000000e+00> : vector<2x32xf32>
    %732 = vector.multi_reduction <add>, %731, %cst_131 [1] : vector<2x8x32xf32> to vector<2x32xf32>
    %733 = vector.broadcast %411 : vector<1x32xf32> to vector<2x32xf32>
    %734 = arith.mulf %732, %733 : vector<2x32xf32>
    %cst_132 = arith.constant dense<0.000000e+00> : vector<2xf32>
    %735 = vector.multi_reduction <add>, %734, %cst_132 [1] : vector<2x32xf32> to vector<2xf32>
    %736 = vector.shape_cast %735 : vector<2xf32> to vector<2x1xf32>
    %737 = vector.extract_strided_slice %1 {offsets = [0, 5], sizes = [2, 1], strides = [1, 1]} : vector<2x8xf32> to vector<2x1xf32>
    %738 = vector.broadcast %736 : vector<2x1xf32> to vector<2x128xf32>
    %739 = vector.broadcast %412 : vector<1x128xf32> to vector<2x128xf32>
    %740 = arith.mulf %738, %739 : vector<2x128xf32>
    %741 = vector.broadcast %737 : vector<2x1xf32> to vector<2x128xf32>
    %742 = vector.broadcast %413 : vector<1x128xf32> to vector<2x128xf32>
    %743 = arith.mulf %741, %742 : vector<2x128xf32>
    %744 = arith.addf %740, %743 : vector<2x128xf32>
    %745 = vector.extract_strided_slice %708 {offsets = [0, 0], sizes = [2, 128], strides = [1, 1]} : vector<2x160xf32> to vector<2x128xf32>
    %746 = arith.addf %744, %745 : vector<2x128xf32>
    %747 = vector.broadcast %414 : vector<1x128xf32> to vector<2x128xf32>
    %748 = arith.addf %746, %747 : vector<2x128xf32>
    %749 = vector.extract_strided_slice %748 {offsets = [0, 0], sizes = [2, 96], strides = [1, 1]} : vector<2x128xf32> to vector<2x96xf32>
    %750 = arith.negf %749 : vector<2x96xf32>
    %751 = math.exp %750 : vector<2x96xf32>
    %cst_133 = arith.constant 1.000000e+00 : f32
    %752 = vector.broadcast %cst_133 : f32 to vector<2x96xf32>
    %753 = arith.addf %752, %751 : vector<2x96xf32>
    %754 = arith.divf %752, %753 : vector<2x96xf32>
    %755 = vector.extract_strided_slice %748 {offsets = [0, 96], sizes = [2, 32], strides = [1, 1]} : vector<2x128xf32> to vector<2x32xf32>
    %756 = math.tanh %755 : vector<2x32xf32>
    %757 = vector.extract_strided_slice %754 {offsets = [0, 0], sizes = [2, 32], strides = [1, 1]} : vector<2x96xf32> to vector<2x32xf32>
    %758 = vector.extract_strided_slice %754 {offsets = [0, 32], sizes = [2, 32], strides = [1, 1]} : vector<2x96xf32> to vector<2x32xf32>
    %759 = vector.extract_strided_slice %754 {offsets = [0, 64], sizes = [2, 32], strides = [1, 1]} : vector<2x96xf32> to vector<2x32xf32>
    %760 = arith.mulf %758, %704 : vector<2x32xf32>
    %761 = arith.mulf %757, %756 : vector<2x32xf32>
    %762 = arith.addf %760, %761 : vector<2x32xf32>
    %763 = math.tanh %762 : vector<2x32xf32>
    %764 = arith.mulf %759, %763 : vector<2x32xf32>
    %765 = tpu.concatenate %764, %762 in 1 : vector<2x32xf32>, vector<2x32xf32> -> vector<2x64xf32>
    %cst_134 = arith.constant dense<0.000000e+00> : vector<2x160xf32>
    %766 = tpu.matmul %765, %408, %cst_134 {dimension_numbers = #tpu.dot_dimension_numbers<[1], [0], [0], [1], [0, 0, 1, 1], [], []>} : vector<2x64xf32>, vector<64x160xf32>, vector<2x160xf32> -> vector<2x160xf32>
    %767 = vector.extract_strided_slice %766 {offsets = [0, 128], sizes = [2, 32], strides = [1, 1]} : vector<2x160xf32> to vector<2x32xf32>
    %768 = vector.broadcast %409 : vector<1x32xf32> to vector<2x32xf32>
    %769 = arith.addf %767, %768 : vector<2x32xf32>
    %770 = vector.shape_cast %769 : vector<2x32xf32> to vector<2x1x32xf32>
    %771 = vector.broadcast %770 : vector<2x1x32xf32> to vector<2x8x32xf32>
    %772 = arith.addf %771, %407 : vector<2x8x32xf32>
    %773 = math.tanh %772 : vector<2x8x32xf32>
    %774 = vector.shape_cast %410 : vector<1x32xf32> to vector<1x1x32xf32>
    %775 = vector.broadcast %774 : vector<1x1x32xf32> to vector<2x8x32xf32>
    %776 = arith.mulf %773, %775 : vector<2x8x32xf32>
    %cst_135 = arith.constant dense<0.000000e+00> : vector<2x8xf32>
    %777 = vector.multi_reduction <add>, %776, %cst_135 [2] : vector<2x8x32xf32> to vector<2x8xf32>
    %cst_136 = arith.constant dense<0xFF800000> : vector<2xf32>
    %778 = vector.multi_reduction <maximumf>, %777, %cst_136 [1] : vector<2x8xf32> to vector<2xf32>
    %779 = vector.shape_cast %778 : vector<2xf32> to vector<2x1xf32>
    %780 = vector.broadcast %779 : vector<2x1xf32> to vector<2x8xf32>
    %781 = arith.subf %777, %780 : vector<2x8xf32>
    %782 = math.exp %781 : vector<2x8xf32>
    %cst_137 = arith.constant dense<0.000000e+00> : vector<2xf32>
    %783 = vector.multi_reduction <add>, %782, %cst_137 [1] : vector<2x8xf32> to vector<2xf32>
    %784 = vector.shape_cast %783 : vector<2xf32> to vector<2x1xf32>
    %785 = vector.broadcast %784 : vector<2x1xf32> to vector<2x8xf32>
    %786 = arith.divf %782, %785 : vector<2x8xf32>
    %787 = vector.shape_cast %786 : vector<2x8xf32> to vector<2x8x1xf32>
    %788 = vector.broadcast %787 : vector<2x8x1xf32> to vector<2x8x32xf32>
    %789 = arith.mulf %788, %406 : vector<2x8x32xf32>
    %cst_138 = arith.constant dense<0.000000e+00> : vector<2x32xf32>
    %790 = vector.multi_reduction <add>, %789, %cst_138 [1] : vector<2x8x32xf32> to vector<2x32xf32>
    %791 = vector.broadcast %411 : vector<1x32xf32> to vector<2x32xf32>
    %792 = arith.mulf %790, %791 : vector<2x32xf32>
    %cst_139 = arith.constant dense<0.000000e+00> : vector<2xf32>
    %793 = vector.multi_reduction <add>, %792, %cst_139 [1] : vector<2x32xf32> to vector<2xf32>
    %794 = vector.shape_cast %793 : vector<2xf32> to vector<2x1xf32>
    %795 = vector.extract_strided_slice %1 {offsets = [0, 6], sizes = [2, 1], strides = [1, 1]} : vector<2x8xf32> to vector<2x1xf32>
    %796 = vector.broadcast %794 : vector<2x1xf32> to vector<2x128xf32>
    %797 = vector.broadcast %412 : vector<1x128xf32> to vector<2x128xf32>
    %798 = arith.mulf %796, %797 : vector<2x128xf32>
    %799 = vector.broadcast %795 : vector<2x1xf32> to vector<2x128xf32>
    %800 = vector.broadcast %413 : vector<1x128xf32> to vector<2x128xf32>
    %801 = arith.mulf %799, %800 : vector<2x128xf32>
    %802 = arith.addf %798, %801 : vector<2x128xf32>
    %803 = vector.extract_strided_slice %766 {offsets = [0, 0], sizes = [2, 128], strides = [1, 1]} : vector<2x160xf32> to vector<2x128xf32>
    %804 = arith.addf %802, %803 : vector<2x128xf32>
    %805 = vector.broadcast %414 : vector<1x128xf32> to vector<2x128xf32>
    %806 = arith.addf %804, %805 : vector<2x128xf32>
    %807 = vector.extract_strided_slice %806 {offsets = [0, 0], sizes = [2, 96], strides = [1, 1]} : vector<2x128xf32> to vector<2x96xf32>
    %808 = arith.negf %807 : vector<2x96xf32>
    %809 = math.exp %808 : vector<2x96xf32>
    %cst_140 = arith.constant 1.000000e+00 : f32
    %810 = vector.broadcast %cst_140 : f32 to vector<2x96xf32>
    %811 = arith.addf %810, %809 : vector<2x96xf32>
    %812 = arith.divf %810, %811 : vector<2x96xf32>
    %813 = vector.extract_strided_slice %806 {offsets = [0, 96], sizes = [2, 32], strides = [1, 1]} : vector<2x128xf32> to vector<2x32xf32>
    %814 = math.tanh %813 : vector<2x32xf32>
    %815 = vector.extract_strided_slice %812 {offsets = [0, 0], sizes = [2, 32], strides = [1, 1]} : vector<2x96xf32> to vector<2x32xf32>
    %816 = vector.extract_strided_slice %812 {offsets = [0, 32], sizes = [2, 32], strides = [1, 1]} : vector<2x96xf32> to vector<2x32xf32>
    %817 = vector.extract_strided_slice %812 {offsets = [0, 64], sizes = [2, 32], strides = [1, 1]} : vector<2x96xf32> to vector<2x32xf32>
    %818 = arith.mulf %816, %762 : vector<2x32xf32>
    %819 = arith.mulf %815, %814 : vector<2x32xf32>
    %820 = arith.addf %818, %819 : vector<2x32xf32>
    %821 = math.tanh %820 : vector<2x32xf32>
    %822 = arith.mulf %817, %821 : vector<2x32xf32>
    %823 = tpu.concatenate %822, %820 in 1 : vector<2x32xf32>, vector<2x32xf32> -> vector<2x64xf32>
    %cst_141 = arith.constant dense<0.000000e+00> : vector<2x160xf32>
    %824 = tpu.matmul %823, %408, %cst_141 {dimension_numbers = #tpu.dot_dimension_numbers<[1], [0], [0], [1], [0, 0, 1, 1], [], []>} : vector<2x64xf32>, vector<64x160xf32>, vector<2x160xf32> -> vector<2x160xf32>
    %825 = vector.extract_strided_slice %824 {offsets = [0, 128], sizes = [2, 32], strides = [1, 1]} : vector<2x160xf32> to vector<2x32xf32>
    %826 = vector.broadcast %409 : vector<1x32xf32> to vector<2x32xf32>
    %827 = arith.addf %825, %826 : vector<2x32xf32>
    %828 = vector.shape_cast %827 : vector<2x32xf32> to vector<2x1x32xf32>
    %829 = vector.broadcast %828 : vector<2x1x32xf32> to vector<2x8x32xf32>
    %830 = arith.addf %829, %407 : vector<2x8x32xf32>
    %831 = math.tanh %830 : vector<2x8x32xf32>
    %832 = vector.shape_cast %410 : vector<1x32xf32> to vector<1x1x32xf32>
    %833 = vector.broadcast %832 : vector<1x1x32xf32> to vector<2x8x32xf32>
    %834 = arith.mulf %831, %833 : vector<2x8x32xf32>
    %cst_142 = arith.constant dense<0.000000e+00> : vector<2x8xf32>
    %835 = vector.multi_reduction <add>, %834, %cst_142 [2] : vector<2x8x32xf32> to vector<2x8xf32>
    %cst_143 = arith.constant dense<0xFF800000> : vector<2xf32>
    %836 = vector.multi_reduction <maximumf>, %835, %cst_143 [1] : vector<2x8xf32> to vector<2xf32>
    %837 = vector.shape_cast %836 : vector<2xf32> to vector<2x1xf32>
    %838 = vector.broadcast %837 : vector<2x1xf32> to vector<2x8xf32>
    %839 = arith.subf %835, %838 : vector<2x8xf32>
    %840 = math.exp %839 : vector<2x8xf32>
    %cst_144 = arith.constant dense<0.000000e+00> : vector<2xf32>
    %841 = vector.multi_reduction <add>, %840, %cst_144 [1] : vector<2x8xf32> to vector<2xf32>
    %842 = vector.shape_cast %841 : vector<2xf32> to vector<2x1xf32>
    %843 = vector.broadcast %842 : vector<2x1xf32> to vector<2x8xf32>
    %844 = arith.divf %840, %843 : vector<2x8xf32>
    %845 = vector.shape_cast %844 : vector<2x8xf32> to vector<2x8x1xf32>
    %846 = vector.broadcast %845 : vector<2x8x1xf32> to vector<2x8x32xf32>
    %847 = arith.mulf %846, %406 : vector<2x8x32xf32>
    %cst_145 = arith.constant dense<0.000000e+00> : vector<2x32xf32>
    %848 = vector.multi_reduction <add>, %847, %cst_145 [1] : vector<2x8x32xf32> to vector<2x32xf32>
    %849 = vector.broadcast %411 : vector<1x32xf32> to vector<2x32xf32>
    %850 = arith.mulf %848, %849 : vector<2x32xf32>
    %cst_146 = arith.constant dense<0.000000e+00> : vector<2xf32>
    %851 = vector.multi_reduction <add>, %850, %cst_146 [1] : vector<2x32xf32> to vector<2xf32>
    %852 = vector.shape_cast %851 : vector<2xf32> to vector<2x1xf32>
    %853 = vector.extract_strided_slice %1 {offsets = [0, 7], sizes = [2, 1], strides = [1, 1]} : vector<2x8xf32> to vector<2x1xf32>
    %854 = vector.broadcast %852 : vector<2x1xf32> to vector<2x128xf32>
    %855 = vector.broadcast %412 : vector<1x128xf32> to vector<2x128xf32>
    %856 = arith.mulf %854, %855 : vector<2x128xf32>
    %857 = vector.broadcast %853 : vector<2x1xf32> to vector<2x128xf32>
    %858 = vector.broadcast %413 : vector<1x128xf32> to vector<2x128xf32>
    %859 = arith.mulf %857, %858 : vector<2x128xf32>
    %860 = arith.addf %856, %859 : vector<2x128xf32>
    %861 = vector.extract_strided_slice %824 {offsets = [0, 0], sizes = [2, 128], strides = [1, 1]} : vector<2x160xf32> to vector<2x128xf32>
    %862 = arith.addf %860, %861 : vector<2x128xf32>
    %863 = vector.broadcast %414 : vector<1x128xf32> to vector<2x128xf32>
    %864 = arith.addf %862, %863 : vector<2x128xf32>
    %865 = vector.extract_strided_slice %864 {offsets = [0, 0], sizes = [2, 96], strides = [1, 1]} : vector<2x128xf32> to vector<2x96xf32>
    %866 = arith.negf %865 : vector<2x96xf32>
    %867 = math.exp %866 : vector<2x96xf32>
    %cst_147 = arith.constant 1.000000e+00 : f32
    %868 = vector.broadcast %cst_147 : f32 to vector<2x96xf32>
    %869 = arith.addf %868, %867 : vector<2x96xf32>
    %870 = arith.divf %868, %869 : vector<2x96xf32>
    %871 = vector.extract_strided_slice %864 {offsets = [0, 96], sizes = [2, 32], strides = [1, 1]} : vector<2x128xf32> to vector<2x32xf32>
    %872 = math.tanh %871 : vector<2x32xf32>
    %873 = vector.extract_strided_slice %870 {offsets = [0, 0], sizes = [2, 32], strides = [1, 1]} : vector<2x96xf32> to vector<2x32xf32>
    %874 = vector.extract_strided_slice %870 {offsets = [0, 32], sizes = [2, 32], strides = [1, 1]} : vector<2x96xf32> to vector<2x32xf32>
    %875 = vector.extract_strided_slice %870 {offsets = [0, 64], sizes = [2, 32], strides = [1, 1]} : vector<2x96xf32> to vector<2x32xf32>
    %876 = arith.mulf %874, %820 : vector<2x32xf32>
    %877 = arith.mulf %873, %872 : vector<2x32xf32>
    %878 = arith.addf %876, %877 : vector<2x32xf32>
    %879 = math.tanh %878 : vector<2x32xf32>
    %880 = arith.mulf %875, %879 : vector<2x32xf32>
    %881 = tpu.concatenate %880, %848 in 1 : vector<2x32xf32>, vector<2x32xf32> -> vector<2x64xf32>
    %c0_148 = arith.constant 0 : index
    %c0_149 = arith.constant 0 : index
    %882 = vector.load %arg17[%c0_148, %c0_149] : memref<64x32xf32, #tpu.memory_space<vmem>>, vector<64x32xf32>
    %cst_150 = arith.constant dense<0.000000e+00> : vector<2x32xf32>
    %883 = tpu.matmul %881, %882, %cst_150 {dimension_numbers = #tpu.dot_dimension_numbers<[1], [0], [0], [1], [0, 0, 1, 1], [], []>} : vector<2x64xf32>, vector<64x32xf32>, vector<2x32xf32> -> vector<2x32xf32>
    %c0_151 = arith.constant 0 : index
    %c0_152 = arith.constant 0 : index
    %884 = vector.load %arg18[%c0_151, %c0_152] : memref<1x32xf32, #tpu.memory_space<vmem>>, vector<1x32xf32>
    %885 = vector.broadcast %884 : vector<1x32xf32> to vector<2x32xf32>
    %886 = arith.addf %883, %885 : vector<2x32xf32>
    %c0_153 = arith.constant 0 : index
    %c0_154 = arith.constant 0 : index
    %887 = vector.load %arg19[%c0_153, %c0_154] : memref<1x32xf32, #tpu.memory_space<vmem>>, vector<1x32xf32>
    %888 = vector.broadcast %887 : vector<1x32xf32> to vector<2x32xf32>
    %889 = arith.mulf %886, %888 : vector<2x32xf32>
    %cst_155 = arith.constant dense<0.000000e+00> : vector<2xf32>
    %890 = vector.multi_reduction <add>, %889, %cst_155 [1] : vector<2x32xf32> to vector<2xf32>
    %891 = vector.shape_cast %890 : vector<2xf32> to vector<2x1xf32>
    %c0_156 = arith.constant 0 : index
    %c0_157 = arith.constant 0 : index
    %892 = vector.load %arg20[%c0_156, %c0_157] : memref<1x1xf32, #tpu.memory_space<vmem>>, vector<1x1xf32>
    %893 = vector.broadcast %892 : vector<1x1xf32> to vector<2x1xf32>
    %894 = arith.addf %891, %893 : vector<2x1xf32>
    %c0_158 = arith.constant 0 : index
    %c0_159 = arith.constant 0 : index
    %895 = vector.load %arg21[%c0_158, %c0_159] : memref<2x1xf32, #tpu.memory_space<vmem>>, vector<2x1xf32>
    tpu.vector_store %arg21[%c0_158, %c0_159], %894 {strides = array<i32>} : memref<2x1xf32, #tpu.memory_space<vmem>>, vector<2x1xf32>,
    return
  }
  func.func @transform_0(%arg0: i32) -> (i32, i32, i32) {
    %c0_i32 = arith.constant 0 : i32
    %c0_i32_0 = arith.constant 0 : i32
    %c0_i32_1 = arith.constant 0 : i32
    return %arg0, %c0_i32, %c0_i32_0 : i32, i32, i32
  }
  func.func @transform_1(%arg0: i32) -> (i32, i32) {
    %c0_i32 = arith.constant 0 : i32
    %c0_i32_0 = arith.constant 0 : i32
    return %arg0, %c0_i32 : i32, i32
  }
  func.func @transform_2(%arg0: i32) -> (i32, i32) {
    %c0_i32 = arith.constant 0 : i32
    %c0_i32_0 = arith.constant 0 : i32
    %c0_i32_1 = arith.constant 0 : i32
    return %c0_i32, %c0_i32_0 : i32, i32
  }
  func.func @transform_3(%arg0: i32) -> (i32, i32) {
    %c0_i32 = arith.constant 0 : i32
    %c0_i32_0 = arith.constant 0 : i32
    %c0_i32_1 = arith.constant 0 : i32
    return %c0_i32, %c0_i32_0 : i32, i32
  }
  func.func @transform_4(%arg0: i32) -> (i32, i32) {
    %c0_i32 = arith.constant 0 : i32
    %c0_i32_0 = arith.constant 0 : i32
    %c0_i32_1 = arith.constant 0 : i32
    return %c0_i32, %c0_i32_0 : i32, i32
  }
  func.func @transform_5(%arg0: i32) -> (i32, i32) {
    %c0_i32 = arith.constant 0 : i32
    %c0_i32_0 = arith.constant 0 : i32
    %c0_i32_1 = arith.constant 0 : i32
    return %c0_i32, %c0_i32_0 : i32, i32
  }
  func.func @transform_6(%arg0: i32) -> (i32, i32) {
    %c0_i32 = arith.constant 0 : i32
    %c0_i32_0 = arith.constant 0 : i32
    %c0_i32_1 = arith.constant 0 : i32
    return %c0_i32, %c0_i32_0 : i32, i32
  }
  func.func @transform_7(%arg0: i32) -> (i32, i32) {
    %c0_i32 = arith.constant 0 : i32
    %c0_i32_0 = arith.constant 0 : i32
    %c0_i32_1 = arith.constant 0 : i32
    return %c0_i32, %c0_i32_0 : i32, i32
  }
  func.func @transform_8(%arg0: i32) -> (i32, i32) {
    %c0_i32 = arith.constant 0 : i32
    %c0_i32_0 = arith.constant 0 : i32
    %c0_i32_1 = arith.constant 0 : i32
    return %c0_i32, %c0_i32_0 : i32, i32
  }
  func.func @transform_9(%arg0: i32) -> (i32, i32) {
    %c0_i32 = arith.constant 0 : i32
    %c0_i32_0 = arith.constant 0 : i32
    %c0_i32_1 = arith.constant 0 : i32
    return %c0_i32, %c0_i32_0 : i32, i32
  }
  func.func @transform_10(%arg0: i32) -> (i32, i32) {
    %c0_i32 = arith.constant 0 : i32
    %c0_i32_0 = arith.constant 0 : i32
    %c0_i32_1 = arith.constant 0 : i32
    return %c0_i32, %c0_i32_0 : i32, i32
  }
  func.func @transform_11(%arg0: i32) -> (i32, i32) {
    %c0_i32 = arith.constant 0 : i32
    %c0_i32_0 = arith.constant 0 : i32
    %c0_i32_1 = arith.constant 0 : i32
    return %c0_i32, %c0_i32_0 : i32, i32
  }
  func.func @transform_12(%arg0: i32) -> (i32, i32) {
    %c0_i32 = arith.constant 0 : i32
    %c0_i32_0 = arith.constant 0 : i32
    %c0_i32_1 = arith.constant 0 : i32
    return %c0_i32, %c0_i32_0 : i32, i32
  }
  func.func @transform_13(%arg0: i32) -> (i32, i32) {
    %c0_i32 = arith.constant 0 : i32
    %c0_i32_0 = arith.constant 0 : i32
    %c0_i32_1 = arith.constant 0 : i32
    return %c0_i32, %c0_i32_0 : i32, i32
  }
  func.func @transform_14(%arg0: i32) -> (i32, i32) {
    %c0_i32 = arith.constant 0 : i32
    %c0_i32_0 = arith.constant 0 : i32
    %c0_i32_1 = arith.constant 0 : i32
    return %c0_i32, %c0_i32_0 : i32, i32
  }
  func.func @transform_15(%arg0: i32) -> (i32, i32) {
    %c0_i32 = arith.constant 0 : i32
    %c0_i32_0 = arith.constant 0 : i32
    %c0_i32_1 = arith.constant 0 : i32
    return %c0_i32, %c0_i32_0 : i32, i32
  }
  func.func @transform_16(%arg0: i32) -> (i32, i32) {
    %c0_i32 = arith.constant 0 : i32
    %c0_i32_0 = arith.constant 0 : i32
    %c0_i32_1 = arith.constant 0 : i32
    return %c0_i32, %c0_i32_0 : i32, i32
  }
  func.func @transform_17(%arg0: i32) -> (i32, i32) {
    %c0_i32 = arith.constant 0 : i32
    %c0_i32_0 = arith.constant 0 : i32
    %c0_i32_1 = arith.constant 0 : i32
    return %c0_i32, %c0_i32_0 : i32, i32
  }
  func.func @transform_18(%arg0: i32) -> (i32, i32) {
    %c0_i32 = arith.constant 0 : i32
    %c0_i32_0 = arith.constant 0 : i32
    %c0_i32_1 = arith.constant 0 : i32
    return %c0_i32, %c0_i32_0 : i32, i32
  }
  func.func @transform_19(%arg0: i32) -> (i32, i32) {
    %c0_i32 = arith.constant 0 : i32
    %c0_i32_0 = arith.constant 0 : i32
    %c0_i32_1 = arith.constant 0 : i32
    return %c0_i32, %c0_i32_0 : i32, i32
  }
  func.func @transform_20(%arg0: i32) -> (i32, i32) {
    %c0_i32 = arith.constant 0 : i32
    %c0_i32_0 = arith.constant 0 : i32
    return %arg0, %c0_i32 : i32, i32
  }
}

</mosaic_0001>

<bundles_post_ra>
// kernel: tpu_custom_call.1
= control target key start
LH: loop header
LB: loop body
LE: loop exit
PB: predicated region body
PF: predicated region fallthrough
CT: control target
= control target key end

     0   :  { %s9380_s0 = inlined_call_operand.hbm [shape: f32[2,4,8], index: 0, kind: input, shape index: {}]   ;;  %s9381_s1 = inlined_call_operand.hbm [shape: f32[2,8], index: 1, kind: input, shape index: {}]   ;;  %s9382_s2 = inlined_call_operand.hbm [shape: f32[64,136], index: 2, kind: input, shape index: {}]   ;;  %s9383_s3 = inlined_call_operand.hbm [shape: f32[1,8], index: 3, kind: input, shape index: {}]   ;;  %s9384_s4 = inlined_call_operand.hbm [shape: f32[8,8], index: 4, kind: input, shape index: {}]   ;;  %s9385_s5 = inlined_call_operand.hbm [shape: f32[1,8], index: 5, kind: input, shape index: {}]   ;;  %s9386_s6 = inlined_call_operand.hbm [shape: f32[4,128], index: 6, kind: input, shape index: {}]   ;;  %s9387_s7 = inlined_call_operand.hbm [shape: f32[1,128], index: 7, kind: input, shape index: {}]   ;;  %s9388_s8 = inlined_call_operand.hbm [shape: f32[32,32], index: 8, kind: input, shape index: {}]   ;;  %s9389_s9 = inlined_call_operand.vmem [shape: f32[64,160], index: 9, kind: input, shape index: {}]   ;;  %s9390_s10 = inlined_call_operand.hbm [shape: f32[1,32], index: 10, kind: input, shape index: {}]   ;;  %s9391_s11 = inlined_call_operand.hbm [shape: f32[1,32], index: 11, kind: input, shape index: {}]   ;;  %s9392_s12 = inlined_call_operand.hbm [shape: f32[1,32], index: 12, kind: input, shape index: {}]   ;;  %s9393_s13 = inlined_call_operand.hbm [shape: f32[1,128], index: 13, kind: input, shape index: {}]   ;;  %s9394_s14 = inlined_call_operand.hbm [shape: f32[1,128], index: 14, kind: input, shape index: {}]   ;;  %s9395_s15 = inlined_call_operand.hbm [shape: f32[1,128], index: 15, kind: input, shape index: {}]   ;;  %s9396_s16 = inlined_call_operand.vmem [shape: f32[64,32], index: 16, kind: input, shape index: {}]   ;;  %s9397_s17 = inlined_call_operand.vmem [shape: f32[1,32], index: 17, kind: input, shape index: {}]   ;;  %s9398_s18 = inlined_call_operand.vmem [shape: f32[1,32], index: 18, kind: input, shape index: {}]   ;;  %s9399_s19 = inlined_call_operand.<no memory space> [shape: f32[1,1], index: 19, kind: input, shape index: {}]   ;;  %s9400_s20 = inlined_call_operand.vmem [shape: f32[2,1], index: 20, kind: output, shape index: {}]  }
   0x1   :  { %9406 = sst [smem:[#allocation34_spill]] %s9380_s0  ;;  %v25_v0 = vstv %s9399_s19 }
   0x2   :  { %9407 = sst [smem:[#allocation35_spill]] %s9381_s1  ;;  %26 = vst [vmem:[#allocation2] sm:$0x1] %v25_v0 }
   0x3   :  { %9408 = sst [smem:[#allocation36_spill]] %s9382_s2 }
   0x4   :  { %9409 = sst [smem:[#allocation37_spill]] %s9383_s3 }
   0x5   :  { %9410 = sst [smem:[#allocation38_spill]] %s9384_s4 }
   0x6   :  { %27 = vsyncpa [#allocation4], 0 }
   0x7   :  { %28 = vsyncpa [#allocation6], 0 }
   0x8   :  { %29 = vsyncpa [#allocation9], 0 }
   0x9   :  { %30 = vsyncpa [#allocation12], 0 }
   0xa   :  { %31 = vsyncpa [#allocation15], 0 }
   0xb   :  { %32 = vsyncpa [#allocation18], 0 }
   0xc   :  { %33 = vsyncpa [#allocation21], 0 }
   0xd   :  { %34 = vsyncpa [#allocation24], 0  ;;  %s7649_s23 = smov [#allocation5]   ;;  %s7650_s2 = smov [#allocation8]  }
   0xe   :  { %s53_s24 = sshll.u32 %s7649_s23, 4  ;;  %s75_s25 = sshll.u32 %s7650_s2, 4  ;;  %s54_s24 = int_to_ptr.vmem [resolvable:$true] %s53_s24  ;;  %s76_s25 = int_to_ptr.vmem [resolvable:$true] %s75_s25 }
   0xf   :  { %s9411_s27 = sld [smem:[#allocation35_spill]] }
  0x15   :  { %s7303_s28 = scalar_lea.hbm %s9411_s27, 32 }
  0x16   :  { %p7304_p0 = scmp.ne.s32.totalorder %s9411_s27, %s7303_s28  ;;  %p7307_p1 = scmp.lt.u32.totalorder %s7303_s28, %s9411_s27 }
  0x18   :  { %p7309_p2 = pnand %p7307_p1, %p7304_p0 }
  0x1a   :  { %7312 = shalt.err (!%p7309_p2)
}
  0x1b   :  { %s7313_s0 = scalar_lea.vmem %s54_s24, 32  ;;  %p7318_p4 = scmp.lt.s32.totalorder %s54_s24, %s54_s24 }
  0x1c   :  { %p7314_p3 = scmp.ne.s32.totalorder %s54_s24, %s7313_s0  ;;  %p7319_p5 = scmp.lt.s32.totalorder %s7313_s0, %s7313_s0 }
  0x1e   :  { %p7320_p6 = por %p7319_p5, %p7318_p4 }
  0x20   :  { %p7321_p7 = pnand %p7320_p6, %p7314_p3 }
  0x22   :  { %7324 = shalt.err (!%p7321_p7)
}
  0x23   :  { %56 = dma.hbm_to_vmem [thread:$0]  %s9411_s27, 32, %s54_s24, [#allocation6]  }
  0x24   :  { %s9412_s2 = sld [smem:[#allocation37_spill]] }
  0x2a   :  { %s7325_s3 = scalar_lea.hbm %s9412_s2, 16 }
  0x2b   :  { %p7326_p8 = scmp.ne.s32.totalorder %s9412_s2, %s7325_s3  ;;  %p7329_p9 = scmp.lt.u32.totalorder %s7325_s3, %s9412_s2 }
  0x2d   :  { %p7331_p10 = pnand %p7329_p9, %p7326_p8 }
  0x2f   :  { %7334 = shalt.err (!%p7331_p10)
}
  0x30   :  { %s7335_s29 = scalar_lea.vmem %s76_s25, 16  ;;  %s7339_s30 = scalar_lea.vmem %s76_s25, 32 }
  0x31   :  { %p7336_p11 = scmp.ne.s32.totalorder %s76_s25, %s7335_s29  ;;  %p7340_p12 = scmp.lt.s32.totalorder %s76_s25, %s76_s25 }
  0x32   :  { %p7341_p13 = scmp.lt.s32.totalorder %s7339_s30, %s7335_s29 }
  0x34   :  { %p7342_p0 = por %p7341_p13, %p7340_p12 }
  0x36   :  { %p7343_p1 = pnand %p7342_p0, %p7336_p11 }
  0x38   :  { %7346 = shalt.err (!%p7343_p1)
}
  0x39   :  { %78 = dma.hbm_to_vmem [thread:$0]  %s9412_s2, 16, %s76_s25, [#allocation9]  }
  0x3a   :  { %s7651_s0 = smov [#allocation11]   ;;  %s7652_s1 = smov [#allocation14]  }
  0x3b   :  { %s95_s21 = sshll.u32 %s7651_s0, 4  ;;  %s115_s22 = sshll.u32 %s7652_s1, 4  ;;  %s96_s21 = int_to_ptr.vmem [resolvable:$true] %s95_s21  ;;  %s116_s22 = int_to_ptr.vmem [resolvable:$true] %s115_s22 }
  0x3c   :  { %s7347_s26 = scalar_lea.hbm %s9385_s5, 16 }
  0x3d   :  { %p7348_p2 = scmp.ne.s32.totalorder %s9385_s5, %s7347_s26  ;;  %p7351_p3 = scmp.lt.u32.totalorder %s7347_s26, %s9385_s5 }
  0x3f   :  { %p7353_p4 = pnand %p7351_p3, %p7348_p2 }
  0x41   :  { %7356 = shalt.err (!%p7353_p4)
}
  0x42   :  { %s7357_s25 = scalar_lea.vmem %s96_s21, 16  ;;  %s7361_s2 = scalar_lea.vmem %s96_s21, 32 }
  0x43   :  { %p7358_p5 = scmp.ne.s32.totalorder %s96_s21, %s7357_s25  ;;  %p7362_p6 = scmp.lt.s32.totalorder %s96_s21, %s96_s21 }
  0x44   :  { %p7363_p7 = scmp.lt.s32.totalorder %s7361_s2, %s7357_s25 }
  0x46   :  { %p7364_p8 = por %p7363_p7, %p7362_p6 }
  0x48   :  { %p7365_p9 = pnand %p7364_p8, %p7358_p5 }
  0x4a   :  { %7368 = shalt.err (!%p7365_p9)
}
  0x4b   :  { %98 = dma.hbm_to_vmem [thread:$0]  %s9385_s5, 16, %s96_s21, [#allocation12]  }
  0x4c   :  { %s7369_s1 = scalar_lea.hbm %s9387_s7, 16 }
  0x4d   :  { %p7370_p10 = scmp.ne.s32.totalorder %s9387_s7, %s7369_s1  ;;  %p7373_p11 = scmp.lt.u32.totalorder %s7369_s1, %s9387_s7 }
  0x4f   :  { %p7375_p12 = pnand %p7373_p11, %p7370_p10 }
  0x51   :  { %7378 = shalt.err (!%p7375_p12)
}
  0x52   :  { %s7379_s28 = scalar_lea.vmem %s116_s22, 16  ;;  %s7383_s4 = scalar_lea.vmem %s116_s22, 32 }
  0x53   :  { %p7380_p13 = scmp.ne.s32.totalorder %s116_s22, %s7379_s28  ;;  %p7384_p0 = scmp.lt.s32.totalorder %s116_s22, %s116_s22 }
  0x54   :  { %p7385_p1 = scmp.lt.s32.totalorder %s7383_s4, %s7379_s28 }
  0x56   :  { %p7386_p2 = por %p7385_p1, %p7384_p0 }
  0x58   :  { %p7387_p3 = pnand %p7386_p2, %p7380_p13 }
  0x5a   :  { %7390 = shalt.err (!%p7387_p3)
}
  0x5b   :  { %118 = dma.hbm_to_vmem [thread:$0]  %s9387_s7, 16, %s116_s22, [#allocation15]  }
  0x5c   :  { %s7653_s29 = smov [#allocation17]   ;;  %s7654_s2 = smov [#allocation20]  }
  0x5d   :  { %s139_s25 = sshll.u32 %s7653_s29, 4  ;;  %s159_s30 = sshll.u32 %s7654_s2, 4  ;;  %s140_s25 = int_to_ptr.vmem [resolvable:$true] %s139_s25  ;;  %s160_s30 = int_to_ptr.vmem [resolvable:$true] %s159_s30 }
  0x5e   :  { %s7391_s0 = scalar_lea.hbm %s9390_s10, 16 }
  0x5f   :  { %p7392_p4 = scmp.ne.s32.totalorder %s9390_s10, %s7391_s0  ;;  %p7395_p5 = scmp.lt.u32.totalorder %s7391_s0, %s9390_s10 }
  0x61   :  { %p7397_p6 = pnand %p7395_p5, %p7392_p4 }
  0x63   :  { %7400 = shalt.err (!%p7397_p6)
}
  0x64   :  { %s7401_s7 = scalar_lea.vmem %s140_s25, 16  ;;  %s7405_s22 = scalar_lea.vmem %s140_s25, 32 }
  0x65   :  { %p7402_p7 = scmp.ne.s32.totalorder %s140_s25, %s7401_s7  ;;  %p7406_p8 = scmp.lt.s32.totalorder %s140_s25, %s140_s25 }
  0x66   :  { %p7407_p9 = scmp.lt.s32.totalorder %s7405_s22, %s7401_s7 }
  0x68   :  { %p7408_p10 = por %p7407_p9, %p7406_p8 }
  0x6a   :  { %p7409_p11 = pnand %p7408_p10, %p7402_p7 }
  0x6c   :  { %7412 = shalt.err (!%p7409_p11)
}
  0x6d   :  { %142 = dma.hbm_to_vmem [thread:$0]  %s9390_s10, 16, %s140_s25, [#allocation18]  }
  0x6e   :  { %s7413_s21 = scalar_lea.hbm %s9392_s12, 16 }
  0x6f   :  { %p7414_p12 = scmp.ne.s32.totalorder %s9392_s12, %s7413_s21  ;;  %p7417_p13 = scmp.lt.u32.totalorder %s7413_s21, %s9392_s12 }
  0x71   :  { %p7419_p0 = pnand %p7417_p13, %p7414_p12 }
  0x73   :  { %7422 = shalt.err (!%p7419_p0)
}
  0x74   :  { %s7423_s0 = scalar_lea.vmem %s160_s30, 16  ;;  %s7427_s1 = scalar_lea.vmem %s160_s30, 32 }
  0x75   :  { %p7424_p1 = scmp.ne.s32.totalorder %s160_s30, %s7423_s0  ;;  %p7428_p2 = scmp.lt.s32.totalorder %s160_s30, %s160_s30 }
  0x76   :  { %p7429_p3 = scmp.lt.s32.totalorder %s7427_s1, %s7423_s0 }
  0x78   :  { %p7430_p4 = por %p7429_p3, %p7428_p2 }
  0x7a   :  { %p7431_p5 = pnand %p7430_p4, %p7424_p1 }
  0x7c   :  { %7434 = shalt.err (!%p7431_p5)
}
  0x7d   :  { %162 = dma.hbm_to_vmem [thread:$0]  %s9392_s12, 16, %s160_s30, [#allocation21]  }
  0x7e   :  { %s7655_s23 = smov [#allocation23]   ;;  %s7656_s26 = smov [#allocation3]  }
  0x7f   :  { %s179_s3 = sshll.u32 %s7655_s23, 4  ;;  %s40_s7 = sshll.u32 %s7656_s26, 4  ;;  %s180_s3 = int_to_ptr.vmem [resolvable:$true] %s179_s3  ;;  %s7871_s7 = int_to_ptr.vmem [resolvable:$true] %s40_s7 }
  0x80   :  { %s7435_s28 = scalar_lea.hbm %s9394_s14, 16 }
  0x81   :  { %p7436_p6 = scmp.ne.s32.totalorder %s9394_s14, %s7435_s28  ;;  %p7439_p7 = scmp.lt.u32.totalorder %s7435_s28, %s9394_s14 }
  0x83   :  { %p7441_p8 = pnand %p7439_p7, %p7436_p6 }
  0x85   :  { %7444 = shalt.err (!%p7441_p8)
}
  0x86   :  { %s7445_s12 = scalar_lea.vmem %s180_s3, 16  ;;  %s7449_s30 = scalar_lea.vmem %s180_s3, 32 }
  0x87   :  { %p7446_p9 = scmp.ne.s32.totalorder %s180_s3, %s7445_s12  ;;  %p7450_p10 = scmp.lt.s32.totalorder %s180_s3, %s180_s3 }
  0x88   :  { %p7451_p11 = scmp.lt.s32.totalorder %s7449_s30, %s7445_s12 }
  0x8a   :  { %p7452_p12 = por %p7451_p11, %p7450_p10 }
  0x8c   :  { %p7453_p13 = pnand %p7452_p12, %p7446_p9 }
  0x8e   :  { %7456 = shalt.err (!%p7453_p13)
}
  0x8f   :  { %182 = dma.hbm_to_vmem [thread:$0]  %s9394_s14, 16, %s180_s3, [#allocation24]  }
  0x90   :  { %s9413_s1 = sld [smem:[#allocation34_spill]] }
  0x96   :  { %s7457_s10 = scalar_lea.hbm %s9413_s1, 128 }
  0x97   :  { %p7458_p0 = scmp.ne.s32.totalorder %s9413_s1, %s7457_s10  ;;  %p7461_p1 = scmp.lt.u32.totalorder %s7457_s10, %s9413_s1 }
  0x99   :  { %p7463_p2 = pnand %p7461_p1, %p7458_p0 }
  0x9b   :  { %7466 = shalt.err (!%p7463_p2)
}
  0x9c   :  { %s7467_s19 = scalar_lea.vmem %s7871_s7, 128  ;;  %p7472_p4 = scmp.lt.s32.totalorder %s7871_s7, %s7871_s7 }
  0x9d   :  { %p7468_p3 = scmp.ne.s32.totalorder %s7871_s7, %s7467_s19  ;;  %p7473_p5 = scmp.lt.s32.totalorder %s7467_s19, %s7467_s19 }
  0x9f   :  { %p7474_p6 = por %p7473_p5, %p7472_p4 }
  0xa1   :  { %p7475_p7 = pnand %p7474_p6, %p7468_p3 }
  0xa3   :  { %7478 = shalt.err (!%p7475_p7)
}
  0xa4   :  { %s7657_s14 = smov 64   ;;  %s7658_s3 = smov 4  }
  0xa5   :  { %46 = dma.hbm_to_vmem [thread:$0]  %s9413_s1, 128, %s7871_s7, [#allocation4], %s7657_s14, %s7657_s14, %s7658_s3  }
  0xa6   :  { %s7659_s5 = smov [#allocation7]   ;;  %s9414_s30 = sld [smem:[#allocation36_spill]] }
  0xa7   :  { %s62_s21 = sshll.u32 %s7659_s5, 4  ;;  %s63_s21 = int_to_ptr.vmem [resolvable:$true] %s62_s21 }
  0xac   :  { %s7479_s2 = scalar_lea.hbm %s9414_s30, 2048 }
  0xad   :  { %p7480_p8 = scmp.ne.s32.totalorder %s9414_s30, %s7479_s2  ;;  %p7483_p9 = scmp.lt.u32.totalorder %s7479_s2, %s9414_s30 }
  0xaf   :  { %p7485_p10 = pnand %p7483_p9, %p7480_p8 }
  0xb1   :  { %7488 = shalt.err (!%p7485_p10)
}
  0xb2   :  { %s7489_s25 = scalar_lea.vmem %s63_s21, 2048  ;;  %p7494_p12 = scmp.lt.s32.totalorder %s63_s21, %s63_s21 }
  0xb3   :  { %p7490_p11 = scmp.ne.s32.totalorder %s63_s21, %s7489_s25  ;;  %p7495_p13 = scmp.lt.s32.totalorder %s7489_s25, %s7489_s25 }
  0xb5   :  { %p7496_p0 = por %p7495_p13, %p7494_p12 }
  0xb7   :  { %p7497_p1 = pnand %p7496_p0, %p7490_p11 }
  0xb9   :  { %7500 = shalt.err (!%p7497_p1)
}
  0xba   :  { %s7660_s7 = smov 256   ;;  %s7661_s1 = smov 16  }
  0xbb   :  { %68 = dma.hbm_to_vmem [thread:$0]  %s9414_s30, 2048, %s63_s21, [#allocation6], %s7660_s7, %s7660_s7, %s7661_s1  }
  0xbc   :  { %s7662_s22 = smov [#allocation10]   ;;  %s7663_s3 = smov [#allocation13]  }
  0xbd   :  { %s85_s19 = sshll.u32 %s7662_s22, 4  ;;  %s105_s28 = sshll.u32 %s7663_s3, 4  ;;  %s86_s19 = int_to_ptr.vmem [resolvable:$true] %s85_s19  ;;  %s106_s28 = int_to_ptr.vmem [resolvable:$true] %s105_s28 }
  0xbe   :  { %s9415_s29 = sld [smem:[#allocation38_spill]] }
  0xc4   :  { %s7501_s12 = scalar_lea.hbm %s9415_s29, 128 }
  0xc5   :  { %p7502_p2 = scmp.ne.s32.totalorder %s9415_s29, %s7501_s12  ;;  %p7505_p3 = scmp.lt.u32.totalorder %s7501_s12, %s9415_s29 }
  0xc7   :  { %p7507_p4 = pnand %p7505_p3, %p7502_p2 }
  0xc9   :  { %7510 = shalt.err (!%p7507_p4)
}
  0xca   :  { %s7511_s21 = scalar_lea.vmem %s86_s19, 128  ;;  %p7516_p6 = scmp.lt.s32.totalorder %s86_s19, %s86_s19 }
  0xcb   :  { %p7512_p5 = scmp.ne.s32.totalorder %s86_s19, %s7511_s21  ;;  %p7517_p7 = scmp.lt.s32.totalorder %s7511_s21, %s7511_s21 }
  0xcd   :  { %p7518_p8 = por %p7517_p7, %p7516_p6 }
  0xcf   :  { %p7519_p9 = pnand %p7518_p8, %p7512_p5 }
  0xd1   :  { %7522 = shalt.err (!%p7519_p9)
}
  0xd2   :  { %88 = dma.hbm_to_vmem [thread:$0]  %s9415_s29, 128, %s86_s19, [#allocation9]  }
  0xd3   :  { %s7523_s1 = scalar_lea.hbm %s9386_s6, 64 }
  0xd4   :  { %p7524_p10 = scmp.ne.s32.totalorder %s9386_s6, %s7523_s1  ;;  %p7527_p11 = scmp.lt.u32.totalorder %s7523_s1, %s9386_s6 }
  0xd6   :  { %p7529_p12 = pnand %p7527_p11, %p7524_p10 }
  0xd8   :  { %7532 = shalt.err (!%p7529_p12)
}
  0xd9   :  { %s7533_s4 = scalar_lea.vmem %s106_s28, 64  ;;  %p7538_p0 = scmp.lt.s32.totalorder %s106_s28, %s106_s28 }
  0xda   :  { %p7534_p13 = scmp.ne.s32.totalorder %s106_s28, %s7533_s4  ;;  %p7539_p1 = scmp.lt.s32.totalorder %s7533_s4, %s7533_s4 }
  0xdc   :  { %p7540_p2 = por %p7539_p1, %p7538_p0 }
  0xde   :  { %p7541_p3 = pnand %p7540_p2, %p7534_p13 }
  0xe0   :  { %7544 = shalt.err (!%p7541_p3)
}
  0xe1   :  { %108 = dma.hbm_to_vmem [thread:$0]  %s9386_s6, 64, %s106_s28, [#allocation12]  }
  0xe2   :  { %s7664_s29 = smov [#allocation16]   ;;  %s7545_s27 = scalar_lea.hbm %s9388_s8, 512 }
  0xe3   :  { %s124_s12 = sshll.u32 %s7664_s29, 4  ;;  %p7546_p4 = scmp.ne.s32.totalorder %s9388_s8, %s7545_s27  ;;  %s125_s12 = int_to_ptr.vmem [resolvable:$true] %s124_s12 }
  0xe4   :  { %p7549_p5 = scmp.lt.u32.totalorder %s7545_s27, %s9388_s8 }
  0xe6   :  { %p7551_p6 = pnand %p7549_p5, %p7546_p4 }
  0xe8   :  { %7554 = shalt.err (!%p7551_p6)
}
  0xe9   :  { %s7555_s25 = scalar_lea.vmem %s125_s12, 512  ;;  %p7560_p8 = scmp.lt.s32.totalorder %s125_s12, %s125_s12 }
  0xea   :  { %p7556_p7 = scmp.ne.s32.totalorder %s125_s12, %s7555_s25  ;;  %p7561_p9 = scmp.lt.s32.totalorder %s7555_s25, %s7555_s25 }
  0xec   :  { %p7562_p10 = por %p7561_p9, %p7560_p8 }
  0xee   :  { %p7563_p11 = pnand %p7562_p10, %p7556_p7 }
  0xf0   :  { %7566 = shalt.err (!%p7563_p11)
}
  0xf1   :  { %s7665_s6 = smov 128   ;;  %s7666_s28 = smov 8  }
  0xf2   :  { %130 = dma.hbm_to_vmem [thread:$0]  %s9388_s8, 512, %s125_s12, [#allocation15], %s7665_s6, %s7665_s6, %s7666_s28  }
  0xf3   :  { %s7667_s23 = smov [#allocation19]   ;;  %s7668_s22 = smov [#allocation22]  }
  0xf4   :  { %s149_s26 = sshll.u32 %s7667_s23, 4  ;;  %s169_s3 = sshll.u32 %s7668_s22, 4  ;;  %s150_s26 = int_to_ptr.vmem [resolvable:$true] %s149_s26  ;;  %s170_s3 = int_to_ptr.vmem [resolvable:$true] %s169_s3 }
  0xf5   :  { %s7567_s5 = scalar_lea.hbm %s9391_s11, 16 }
  0xf6   :  { %p7568_p12 = scmp.ne.s32.totalorder %s9391_s11, %s7567_s5  ;;  %p7571_p13 = scmp.lt.u32.totalorder %s7567_s5, %s9391_s11 }
  0xf8   :  { %p7573_p0 = pnand %p7571_p13, %p7568_p12 }
  0xfa   :  { %7576 = shalt.err (!%p7573_p0)
}
  0xfb   :  { %s7577_s8 = scalar_lea.vmem %s150_s26, 16  ;;  %s7581_s12 = scalar_lea.vmem %s150_s26, 32 }
  0xfc   :  { %p7578_p1 = scmp.ne.s32.totalorder %s150_s26, %s7577_s8  ;;  %p7582_p2 = scmp.lt.s32.totalorder %s150_s26, %s150_s26 }
  0xfd   :  { %p7583_p3 = scmp.lt.s32.totalorder %s7581_s12, %s7577_s8 }
  0xff   :  { %p7584_p4 = por %p7583_p3, %p7582_p2 }
 0x101   :  { %p7585_p5 = pnand %p7584_p4, %p7578_p1 }
 0x103   :  { %7588 = shalt.err (!%p7585_p5)
}
 0x104   :  { %152 = dma.hbm_to_vmem [thread:$0]  %s9391_s11, 16, %s150_s26, [#allocation18]  }
 0x105   :  { %s7589_s25 = scalar_lea.hbm %s9393_s13, 16 }
 0x106   :  { %p7590_p6 = scmp.ne.s32.totalorder %s9393_s13, %s7589_s25  ;;  %p7593_p7 = scmp.lt.u32.totalorder %s7589_s25, %s9393_s13 }
 0x108   :  { %p7595_p8 = pnand %p7593_p7, %p7590_p6 }
 0x10a   :  { %7598 = shalt.err (!%p7595_p8)
}
 0x10b   :  { %s7599_s23 = scalar_lea.vmem %s170_s3, 16  ;;  %s7603_s22 = scalar_lea.vmem %s170_s3, 32 }
 0x10c   :  { %p7600_p9 = scmp.ne.s32.totalorder %s170_s3, %s7599_s23  ;;  %p7604_p10 = scmp.lt.s32.totalorder %s170_s3, %s170_s3 }
 0x10d   :  { %p7605_p11 = scmp.lt.s32.totalorder %s7603_s22, %s7599_s23 }
 0x10f   :  { %p7606_p12 = por %p7605_p11, %p7604_p10 }
 0x111   :  { %p7607_p13 = pnand %p7606_p12, %p7600_p9 }
 0x113   :  { %7610 = shalt.err (!%p7607_p13)
}
 0x114   :  { %172 = dma.hbm_to_vmem [thread:$0]  %s9393_s13, 16, %s170_s3, [#allocation21]  }
 0x115   :  { %s7669_s4 = smov [#allocation25]   ;;  %s7611_s2 = scalar_lea.hbm %s9395_s15, 16 }
 0x116   :  { %s189_s19 = sshll.u32 %s7669_s4, 4  ;;  %p7612_p0 = scmp.ne.s32.totalorder %s9395_s15, %s7611_s2  ;;  %s190_s19 = int_to_ptr.vmem [resolvable:$true] %s189_s19 }
 0x117   :  { %p7615_p1 = scmp.lt.u32.totalorder %s7611_s2, %s9395_s15 }
 0x119   :  { %p7617_p2 = pnand %p7615_p1, %p7612_p0 }
 0x11b   :  { %7620 = shalt.err (!%p7617_p2)
}
 0x11c   :  { %s7621_s0 = scalar_lea.vmem %s190_s19, 16  ;;  %s7625_s13 = scalar_lea.vmem %s190_s19, 32 }
 0x11d   :  { %p7622_p3 = scmp.ne.s32.totalorder %s190_s19, %s7621_s0  ;;  %p7626_p4 = scmp.lt.s32.totalorder %s190_s19, %s190_s19 }
 0x11e   :  { %p7627_p5 = scmp.lt.s32.totalorder %s7625_s13, %s7621_s0 }
 0x120   :  { %p7628_p6 = por %p7627_p5, %p7626_p4 }
 0x122   :  { %p7629_p7 = pnand %p7628_p6, %p7622_p3 }
 0x124   :  { %7632 = shalt.err (!%p7629_p7)
}
 0x125   :  { %192 = dma.hbm_to_vmem [thread:$0]  %s9395_s15, 16, %s190_s19, [#allocation24]  }
 0x126   :  { %7633 = dma.done.wait [#allocation4], 128  }
 0x127   :  { %7634 = vsyncadd [#allocation4], 4294967168 }
 0x128   :  { %7635 = dma.done.wait [#allocation6], 2080  }
 0x129   :  { %7636 = vsyncadd [#allocation6], 4294965216 }
 0x12a   :  { %7637 = dma.done.wait [#allocation9], 144  }
 0x12b   :  { %7638 = vsyncadd [#allocation9], 4294967152 }
 0x12c   :  { %7639 = dma.done.wait [#allocation12], 80  }
 0x12d   :  { %7640 = vsyncadd [#allocation12], 4294967216 }
 0x12e   :  { %7641 = dma.done.wait [#allocation15], 528  }
 0x12f   :  { %7642 = vsyncadd [#allocation15], 4294966768 }
 0x130   :  { %7643 = dma.done.wait [#allocation18], 32  }
 0x131   :  { %7644 = vsyncadd [#allocation18], 4294967264 }
 0x132   :  { %7645 = dma.done.wait [#allocation21], 32  }
 0x133   :  { %7646 = vsyncadd [#allocation21], 4294967264 }
 0x134   :  { %7647 = dma.done.wait [#allocation24], 32  }
 0x135   :  { %7648 = vsyncadd [#allocation24], 4294967264  ;;  %v7670_v1 = vmov 0.0   ;;  %vm7671_vm0 = vmmov 0   ;;  %v330_v2 = vld [vmem:[#allocation7 + $0x8] sm:$0xff]  ;;  %v332_v3 = vld [vmem:[#allocation7 + $0x18] sm:$0xff]  ;;  %v439_v34 = vlaneseq }
 0x136   :  { %421 = vmatprep.mubr.f32.mxu1 %v7670_v1  ;;  %6444 = vmatprep.subr.mxu0 %v7670_v1  ;;  %v329_v4 = vld [vmem:[#allocation7] sm:$0xff]  ;;  %v7992_v5 = vpack.c.bf16 %v332_v3, %v330_v2  ;;  %v331_v6 = vld [vmem:[#allocation7 + $0x10] sm:$0xff]  ;;  %v334_v7 = vld [vmem:[#allocation7 + $0x28] sm:$0xff]  ;;  %vm253_vm1 = vcmask 64512   ;;  %v7672_v32 = vmov 1966171168  }
 0x137   :  { %6446 = vmatprep.mubr.msk.f32.mxu0 %vm7671_vm0, %v7670_v1  ;;  %v336_v8 = vld [vmem:[#allocation7 + $0x38] sm:$0xff]  ;;  %v7994_v9 = vpack.c.bf16 %v331_v6, %v329_v4  ;;  %v333_v11 = vld [vmem:[#allocation7 + $0x20] sm:$0xff]  ;;  %v335_v12 = vld [vmem:[#allocation7 + $0x30] sm:$0xff]  ;;  %v437_v33 = vunpack.c.l.s4 %v7672_v32  ;;  %v440_v36 = vshrl.u32 %v439_v34, 7  ;;  %vm480_vm2 = vcmask 60416   ;;  %s7674_s15 = smov 32  }
 0x138   :  { %v7996_v10 = vpack.c.bf16 %v336_v8, %v334_v7  ;;  %v338_v13 = vld [vmem:[#allocation7 + $0x48] sm:$0xff]  ;;  %6597 = vmatprep.subr.bf16.mxu1 %v7992_v5  ;;  %v340_v14 = vld [vmem:[#allocation7 + $0x58] sm:$0xff]  ;;  %v8000_v15 = vpack.c.bf16 %v335_v12, %v333_v11  ;;  %v337_v16 = vld [vmem:[#allocation7 + $0x40] sm:$0xff]  ;;  %v490_v59 = vand.u32 127, %v439_v34  ;;  %vm499_vm3 = vcmask 1041409   ;;  %s7676_s30 = smov 127  }
 0x139   :  { %6599 = vmatpush1.bf16.msra.mxu1 %v7994_v9  ;;  %v8003_v17 = vpack.c.bf16 %v340_v14, %v338_v13  ;;  %v339_v18 = vld [vmem:[#allocation7 + $0x50] sm:$0xff]  ;;  %v249_v19 = vld [vmem:[#allocation10] sm:$0xff]  ;;  %v344_v22 = vld [vmem:[#allocation7 + $0x78] sm:$0xff]  ;;  %v438_v35 = vunpack.c.0.s8 %v437_v33  ;;  %v8039_v43 = vsub.s32 0, %v440_v36  ;;  %vm502_vm4 = vcmask 25600   ;;  %s7677_s10 = smov 126  }
 0x13a   :  { %6601 = vmatprep.subr.bf16.mxu1 %v7996_v10  ;;  %v8005_v20 = vld [vmem:[#allocation3] sm:$0xf]  ;;  %v342_v21 = vld [vmem:[#allocation7 + $0x68] sm:$0xff]  ;;  %6445 = vmatpush3.msra.mxu0 %v249_v19  ;;  %v8007_v23 = vld [vmem:[#allocation3 + $0x4] sm:$0xf]  ;;  %v8013_v25 = vpack.c.bf16 %v339_v18, %v337_v16  ;;  %v8057_v61 = vsub.s32 %v490_v59, %v440_v36  ;;  %v7673_v4 = vmov 0  }
 0x13b   :  { %v252_v24 = vcombine.low %v8005_v20, %v8007_v23  ;;  %6449 = vmatprep.subr.mxu0 %v7670_v1  ;;  %v8016_v26 = vpack.c.bf16 %v344_v22, %v342_v21  ;;  %v341_v27 = vld [vmem:[#allocation7 + $0x60] sm:$0xff]  ;;  %v343_v28 = vld [vmem:[#allocation7 + $0x70] sm:$0xff]  ;;  %v8035_v39 = vsub.s32 %v438_v35, %v440_v36  ;;  %v8051_v52 = vld [vmem:[#allocation11] ss:$0 sm:$0xff]  ;;  %6955 = vset.pattern.permute.xlu0 %v7673_v4  ;;  %v8065_v6 = vsub.s32 1, %v440_v36  ;;  %s7678_s25 = smov 125  }
 0x13c   :  { %v8021_v29 = vpack.c.bf16 %v343_v28, %v341_v27  ;;  %v8031_v37 = vld [vmem:[#allocation8] ss:$0 sm:$0xff]  ;;  %6954 = vset.pattern.permute.xlu1 %v7673_v4  ;;  %vm581_vm5 = vcmask 1043456   ;;  %vm578_vm6 = vcmask 31744   ;;  %vm713_vm7 = vcmask 261120   ;;  %s7679_s6 = smov 124  }
 0x13d   :  { %6603 = vmatpush1.bf16.msra.mxu1 %v8000_v15  ;;  %6447 = vmatmul.mubr.msk.f32.vlgmr.msra.gmra.mrb[0].mxu0 %vm253_vm1, %v252_v24  ;;  %vm353_vm8 = vcmask 523264   ;;  %vm3905_vm9 = vcmask 1040384   ;;  %vm3908_vm10 = vcmask 1041408   ;;  %vm3911_vm11 = vcmask 1042432   ;;  %s7680_s28 = smov 123   ;;  %s7681_s7 = smov 122  }
 0x13e   :  { %6605 = vmatprep.subr.bf16.mxu1 %v8003_v17  ;;  %6451 = vmatprep.mubr.msk.f32.mxu0 %vm7671_vm0, %v7670_v1  ;;  %vm3916_vm12 = vcmask 1044480   ;;  %vm3919_vm13 = vcmask 1045504   ;;  %s7682_s1 = smov 121   ;;  %vm3922_vm14 = vcmask 1046528   ;;  %vm4172_vm15 = vcmask 58368  }
 0x13f   :  { %vm4241_vm1 = vcmask 785920  }
 0x141   :  { %6607 = vmatpush1.bf16.msra.mxu1 %v8013_v25 }
 0x142   :  { %6609 = vmatprep.subr.bf16.mxu1 %v8016_v26 }
 0x145   :  { %6611 = vmatpush1.bf16.msra.mxu1 %v8021_v29 }
 0x146   :  { %6465 = vmatprep.subr.mxu1 %v7670_v1 }
 0x148   :  { %422 = vmatmul.mubr.f32.vlgmr.msra.gmra.mrb[0].mxu1 %v7670_v1 }
 0x149   :  { %6467 = vmatprep.mubr.msk.f32.mxu1 %vm7671_vm0, %v7670_v1 }
 0x210   :  { %v8029_v30 = vpop.f32.mrb[0].mxu0 }
 0x211   :  { %v6448_v31 = vpop.f32.mrb[1].mxu0  ;;  %v8046_v48 = vcombine.high %v8029_v30, %v8029_v30 }
 0x21b   :  { %v8033_v38 = vpop.f32.mrb[0].mxu1 }
 0x21c   :  { %v425_v40 = vpop.f32.mrb[1].mxu1 }
 0x21d   :  { %v434_v41 = vadd.f32 %v8031_v37, %v425_v40 }
 0x21f   :  { %v442_v42 = vrot.slane %v434_v41, %v8035_v39 }
 0x221   :  { %v443_v44 = vcombine.high %v442_v42, %v442_v42  ;;  %v450_v45 = vrot.slane %v442_v42, %v8035_v39 }
 0x223   :  { %v457_v46 = vrot.slane %v443_v44, %v8035_v39  ;;  %v461_v47 = vrot.slane %v450_v45, %v8039_v43  ;;  %v8076_v44 = vld [vmem:[#allocation13] sm:$0xf] }
 0x224   :  { %6450 = vmatpush3.msk.msra.mxu0 %vm581_vm5, %v8076_v44  ;;  %6466 = vmatpush3.msk.msra.mxu1 %vm581_vm5, %v8076_v44 }
 0x225   :  { %v465_v49 = vrot.slane %v457_v46, %v8039_v43  ;;  %v468_v50 = vadd.f32 %v461_v47, %v8029_v30  ;;  %6641 = vmatprep.subr.bf16.mxu1 %v7992_v5 }
 0x227   :  { %6971 = vtanh.f32 %v468_v50  ;;  %v469_v51 = vadd.f32 %v465_v49, %v8046_v48 }
 0x229   :  { %6973 = vtanh.f32 %v469_v51 }
 0x231   :  { %v6972_v53 = vpop.eup %6971 }
 0x232   :  { %v478_v54 = vmul.f32 %v6972_v53, %v8051_v52  ;;  %v8090_v53 = vld [vmem:[#allocation14] ss:$0 sm:$0xff] }
 0x233   :  { %v6974_v55 = vpop.eup %6973 }
 0x234   :  { %v481_v56 = vsel %vm480_vm2, %v478_v54, 0.0  ;;  %v479_v57 = vmul.f32 %v6974_v55, %v8051_v52 }
 0x235   :  { %482 = vadd.xlane.f32.xlu0 %v481_v56 }
 0x236   :  { %v484_v58 = vsel %vm480_vm2, %v479_v57, 0.0 }
 0x239   :  { %485 = vadd.xlane.f32.xlu0 %v484_v58 }
 0x2c2   :  { %v483_v60 = vpop.xlane.xlu0 %482 }
 0x2c3   :  { %v494_v63 = vrot.slane %v483_v60, %v8057_v61 }
 0x2c6   :  { %v486_v62 = vpop.xlane.xlu0 %485 }
 0x2c7   :  { %v498_v0 = vrot.slane %v486_v62, %v8057_v61 }
 0x2c9   :  { %v500_v2 = vsel %vm499_vm3, %v498_v0, %v494_v63 }
 0x2ca   :  { %v503_v3 = vsel %vm502_vm4, %v500_v2, -inf }
 0x2cb   :  { %504 = vmax.xlane.f32.xlu1 %v503_v3 }
 0x358   :  { %v505_v7 = vpop.xlane.xlu1 %504 }
 0x359   :  { %v510_v8 = vrot.slane %v505_v7, %v8039_v43  ;;  %v514_v11 = vrot.slane %v505_v7, %v8065_v6 }
 0x35b   :  { %v517_v12 = vsub.f32 %v483_v60, %v510_v8  ;;  %v518_v13 = vsub.f32 %v486_v62, %v514_v11  ;;  %v349_v8 = vld [vmem:[#allocation16] sm:$0xff]  ;;  %v350_v11 = vld [vmem:[#allocation16 + $0x8] sm:$0xff] }
 0x35d   :  { %v519_v14 = vmul.f32 1.442695, %v517_v12  ;;  %v521_v16 = vmul.f32 1.442695, %v518_v13  ;;  %v351_v12 = vld [vmem:[#allocation16 + $0x10] sm:$0xff]  ;;  %v7675_v13 = vmov 0.0|0.0  }
 0x35e   :  { %6612 = vmatprep.subr.bf16.mxu0 %v7675_v13 }
 0x35f   :  { %6975 = vpow2.f32 %v519_v14  ;;  %v8100_v14 = vpack.c.bf16 %v350_v11, %v349_v8 }
 0x360   :  { %6977 = vpow2.f32 %v521_v16  ;;  %v352_v16 = vld [vmem:[#allocation16 + $0x18] sm:$0xff] }
 0x369   :  { %v6976_v18 = vpop.eup %6975 }
 0x36a   :  { %v6978_v19 = vpop.eup %6977  ;;  %526 = vperm.xlu1 %6954, %v6976_v18  }
 0x36b   :  { %529 = vperm.xlu0 %6955, %v6978_v19  }
 0x3e9   :  { %v527_v21 = vpop.permute.xlu1 %526 }
 0x3ea   :  { %v530_v22 = vpop.permute.xlu0 %529  ;;  %v534_v24 = vrot.slane %v527_v21, %v8057_v61 }
 0x3eb   :  { %v538_v27 = vrot.slane %v530_v22, %v8057_v61 }
 0x3ed   :  { %v539_v28 = vsel %vm499_vm3, %v538_v27, %v534_v24 }
 0x3ee   :  { %v541_v31 = vsel %vm502_vm4, %v539_v28, 0.0 }
 0x3ef   :  { %542 = vadd.xlane.f32.xlu1 %v541_v31 }
 0x47c   :  { %v543_v32 = vpop.xlane.xlu1 %542 }
 0x47d   :  { %v548_v33 = vrot.slane %v543_v32, %v8039_v43  ;;  %v552_v34 = vrot.slane %v543_v32, %v8065_v6 }
 0x47f   :  { %6979 = vrcp.f32 %v548_v33 }
 0x480   :  { %6981 = vrcp.f32 %v552_v34 }
 0x489   :  { %v6980_v35 = vpop.eup %6979 }
 0x48a   :  { %v6982_v36 = vpop.eup %6981  ;;  %v556_v40 = vmul.f32 %v6980_v35, %v6976_v18  ;;  %v8103_v18 = vpack.c.bf16 %v352_v16, %v351_v12 }
 0x48b   :  { %v558_v42 = vmul.f32 %v6982_v36, %v6978_v19 }
 0x48c   :  { %v559_v41 = vmul.f32 %v556_v40, %v8005_v20 }
 0x48d   :  { %v560_v45 = vmul.f32 %v558_v42, %v8007_v23 }
 0x48e   :  { %564 = vperm.xlu0 %6955, %v559_v41  }
 0x492   :  { %567 = vperm.xlu0 %6955, %v560_v45  }
 0x50d   :  { %v565_v46 = vpop.permute.xlu0 %564 }
 0x50e   :  { %v572_v49 = vrot.slane %v565_v46, %v8057_v61 }
 0x511   :  { %v568_v47 = vpop.permute.xlu0 %567 }
 0x512   :  { %v576_v50 = vrot.slane %v568_v47, %v8057_v61 }
 0x514   :  { %v577_v51 = vsel %vm499_vm3, %v576_v50, %v572_v49 }
 0x515   :  { %6452 = vmatmul.mubr.msk.f32.vlgmr.msra.gmra.mrb[2].mxu0 %vm578_vm6, %v577_v51 }
 0x516   :  { %6462 = vmatprep.mubr.msk.f32.mxu0 %vm7671_vm0, %v7670_v1  ;;  %6614 = vmatpush3.bf16.msra.mxu0 %v8100_v14 }
 0x517   :  { %6615 = vmatprep.subr.bf16.mxu0 %v7675_v13 }
 0x51a   :  { %6617 = vmatpush3.bf16.msra.mxu0 %v8103_v18 }
 0x51b   :  { %6619 = vmatprep.subr.bf16.mxu0 %v7992_v5 }
 0x5e8   :  { %v651_v54 = vpop.f32.mrb[2].mxu0 }
 0x5e9   :  { %v652_v55 = vadd.f32 %v651_v54, %v8033_v38  ;;  %v6453_v56 = vpop.f32.mrb[3].mxu0 }
 0x5eb   :  { %v661_v57 = vadd.f32 %v8090_v53, %v652_v55 }
 0x5ed   :  { %6983 = vtanh.f32 %v661_v57  ;;  %v6315_v59 = vmul.f32 -1.442695, %v661_v57 }
 0x5ef   :  { %6985 = vpow2.f32 %v6315_v59 }
 0x5f7   :  { %v6984_v58 = vpop.eup %6983 }
 0x5f8   :  { %671 = vrot.lane.b32.xlu1 %v6984_v58, %s7674_s15 }
 0x5f9   :  { %v6986_v60 = vpop.eup %6985 }
 0x5fa   :  { %v665_v62 = vadd.f32 1.0, %v6986_v60 }
 0x5fc   :  { %6987 = vrcp.f32 %v665_v62 }
 0x606   :  { %v6988_v63 = vpop.eup %6987 }
 0x607   :  { %v669_v3 = vmul.f32 0.0, %v6988_v63 }
 0x66a   :  { %v672_v0 = vpop.permute.xlu1 %671 }
 0x66b   :  { %v674_v2 = vmul.f32 %v6988_v63, %v672_v0 }
 0x66d   :  { %676 = vrot.lane.b32.xlu0 %v674_v2, %s7674_s15 }
 0x6df   :  { %v677_v38 = vpop.permute.xlu0 %676 }
 0x6e0   :  { %v8096_v7 = vadd.f32 %v677_v38, %v669_v3 }
 0x6e2   :  { %6989 = vtanh.f32 %v8096_v7 }
 0x6ec   :  { %v6990_v19 = vpop.eup %6989 }
 0x6ed   :  { %682 = vrot.lane.b32.xlu0 %v6990_v19, %s7674_s15 }
 0x75f   :  { %v683_v21 = vpop.permute.xlu0 %682 }
 0x760   :  { %v8109_v22 = vmul.f32 %v6988_v63, %v683_v21 }
 0x762   :  { %711 = vrot.lane.b32.xlu0 %v8109_v22, %s7657_s14 }
 0x7d4   :  { %v712_v24 = vpop.permute.xlu0 %711 }
 0x7d5   :  { %6463 = vmatmul.mubr.msk.f32.vlgmr.msra.gmra.mrb[4].mxu0 %vm713_vm7, %v712_v24  ;;  %v812_v27 = vsel %vm713_vm7, %v712_v24, %v8096_v7 }
 0x7d6   :  { %6621 = vmatpush1.bf16.msra.mxu0 %v7994_v9  ;;  %880 = vmatprep.mubr.f32.mxu0 %v7670_v1 }
 0x7d7   :  { %6623 = vmatprep.subr.bf16.mxu0 %v7996_v10 }
 0x7da   :  { %6625 = vmatpush1.bf16.msra.mxu0 %v8000_v15 }
 0x7db   :  { %6627 = vmatprep.subr.bf16.mxu0 %v8003_v17 }
 0x7de   :  { %6629 = vmatpush1.bf16.msra.mxu0 %v8013_v25 }
 0x7df   :  { %6631 = vmatprep.subr.bf16.mxu0 %v8016_v26 }
 0x7e2   :  { %6633 = vmatpush1.bf16.msra.mxu0 %v8021_v29 }
 0x7e3   :  { %6634 = vmatprep.subr.bf16.mxu0 %v7675_v13 }
 0x7e5   :  { %6317 = vmatmul.mubr.msk.f32.vlgmr.msra.gmra.mrb[6].mxu0 %vm353_vm8, %v812_v27 }
 0x7e6   :  { %6636 = vmatpush3.bf16.msra.mxu0 %v8100_v14  ;;  %6478 = vmatprep.mubr.msk.f32.mxu0 %vm7671_vm0, %v7670_v1 }
 0x7e7   :  { %6637 = vmatprep.subr.bf16.mxu0 %v7675_v13 }
 0x7ea   :  { %6639 = vmatpush3.bf16.msra.mxu0 %v8103_v18 }
 0x7eb   :  { %6481 = vmatprep.subr.mxu0 %v7670_v1 }
 0x8a8   :  { %v8132_v28 = vpop.f32.mrb[4].mxu0 }
 0x8a9   :  { %v6464_v31 = vpop.f32.mrb[5].mxu0 }
 0x8b8   :  { %v8134_v32 = vpop.f32.mrb[6].mxu0 }
 0x8b9   :  { %v884_v33 = vpop.f32.mrb[7].mxu0 }
 0x8ba   :  { %v887_v34 = vadd.f32 %v8031_v37, %v884_v33 }
 0x8bc   :  { %v895_v35 = vrot.slane %v887_v34, %v8035_v39 }
 0x8be   :  { %v896_v36 = vcombine.high %v895_v35, %v895_v35  ;;  %v903_v40 = vrot.slane %v895_v35, %v8035_v39 }
 0x8c0   :  { %v910_v41 = vrot.slane %v896_v36, %v8035_v39  ;;  %v914_v42 = vrot.slane %v903_v40, %v8039_v43 }
 0x8c2   :  { %v918_v45 = vrot.slane %v910_v41, %v8039_v43  ;;  %v921_v46 = vadd.f32 %v914_v42, %v8029_v30 }
 0x8c4   :  { %v922_v47 = vadd.f32 %v918_v45, %v8046_v48  ;;  %6991 = vtanh.f32 %v921_v46 }
 0x8c6   :  { %6993 = vtanh.f32 %v922_v47 }
 0x8ce   :  { %v6992_v49 = vpop.eup %6991 }
 0x8cf   :  { %v925_v50 = vmul.f32 %v6992_v49, %v8051_v52 }
 0x8d0   :  { %v6994_v51 = vpop.eup %6993 }
 0x8d1   :  { %v927_v54 = vsel %vm480_vm2, %v925_v50, 0.0  ;;  %v926_v55 = vmul.f32 %v6994_v51, %v8051_v52 }
 0x8d2   :  { %928 = vadd.xlane.f32.xlu0 %v927_v54 }
 0x8d3   :  { %v930_v56 = vsel %vm480_vm2, %v926_v55, 0.0 }
 0x8d4   :  { %931 = vadd.xlane.f32.xlu1 %v930_v56 }
 0x95f   :  { %v929_v57 = vpop.xlane.xlu0 %928 }
 0x960   :  { %v938_v59 = vrot.slane %v929_v57, %v8057_v61 }
 0x961   :  { %v932_v58 = vpop.xlane.xlu1 %931 }
 0x962   :  { %v942_v60 = vrot.slane %v932_v58, %v8057_v61 }
 0x964   :  { %v943_v62 = vsel %vm499_vm3, %v942_v60, %v938_v59 }
 0x965   :  { %v945_v63 = vsel %vm502_vm4, %v943_v62, -inf }
 0x966   :  { %946 = vmax.xlane.f32.xlu0 %v945_v63 }
 0x9f3   :  { %v947_v0 = vpop.xlane.xlu0 %946 }
 0x9f4   :  { %v952_v2 = vrot.slane %v947_v0, %v8039_v43  ;;  %v956_v3 = vrot.slane %v947_v0, %v8065_v6 }
 0x9f6   :  { %v959_v38 = vsub.f32 %v929_v57, %v952_v2  ;;  %v960_v8 = vsub.f32 %v932_v58, %v956_v3 }
 0x9f8   :  { %v961_v11 = vmul.f32 1.442695, %v959_v38  ;;  %v963_v12 = vmul.f32 1.442695, %v960_v8 }
 0x9fa   :  { %6995 = vpow2.f32 %v961_v11 }
 0x9fb   :  { %6997 = vpow2.f32 %v963_v12 }
 0xa04   :  { %v6996_v16 = vpop.eup %6995 }
 0xa05   :  { %v6998_v19 = vpop.eup %6997  ;;  %968 = vperm.xlu0 %6955, %v6996_v16  }
 0xa06   :  { %971 = vperm.xlu1 %6954, %v6998_v19  }
 0xa09   :  { %1001 = vrot.lane.b32.xlu0 %v8005_v20, %s7676_s30 }
 0xa0d   :  { %1003 = vrot.lane.b32.xlu0 %v8007_v23, %s7676_s30 }
 0xa84   :  { %v969_v21 = vpop.permute.xlu0 %968 }
 0xa85   :  { %v972_v24 = vpop.permute.xlu1 %971  ;;  %v976_v27 = vrot.slane %v969_v21, %v8057_v61 }
 0xa86   :  { %v980_v31 = vrot.slane %v972_v24, %v8057_v61 }
 0xa88   :  { %v981_v33 = vsel %vm499_vm3, %v980_v31, %v976_v27  ;;  %v1002_v41 = vpop.permute.xlu0 %1001  ;;  %v693_v27 = vrot.slane %v8109_v22, %v8035_v39 }
 0xa89   :  { %v983_v34 = vsel %vm502_vm4, %v981_v33, 0.0 }
 0xa8a   :  { %984 = vadd.xlane.f32.xlu1 %v983_v34  ;;  %v694_v34 = vcombine.high %v693_v27, %v693_v27 }
 0xa8c   :  { %v1004_v50 = vpop.permute.xlu0 %1003 }
 0xb17   :  { %v985_v35 = vpop.xlane.xlu1 %984 }
 0xb18   :  { %v990_v36 = vrot.slane %v985_v35, %v8039_v43  ;;  %v994_v40 = vrot.slane %v985_v35, %v8065_v6 }
 0xb1a   :  { %6999 = vrcp.f32 %v990_v36  ;;  %v701_v36 = vrot.slane %v693_v27, %v8035_v39 }
 0xb1b   :  { %7001 = vrcp.f32 %v994_v40 }
 0xb24   :  { %v7000_v42 = vpop.eup %6999 }
 0xb25   :  { %v7002_v45 = vpop.eup %7001  ;;  %v998_v46 = vmul.f32 %v7000_v42, %v6996_v16  ;;  %v708_v42 = vrot.slane %v694_v34, %v8035_v39 }
 0xb26   :  { %v1000_v49 = vmul.f32 %v7002_v45, %v6998_v19 }
 0xb27   :  { %v1007_v47 = vmul.f32 %v1002_v41, %v998_v46 }
 0xb28   :  { %v1008_v51 = vmul.f32 %v1004_v50, %v1000_v49  ;;  %v793_v50 = vrot.slane %v8132_v28, %v8035_v39 }
 0xb29   :  { %1012 = vperm.xlu0 %6955, %v1007_v47  }
 0xb2d   :  { %1015 = vperm.xlu0 %6955, %v1008_v51  }
 0xba8   :  { %v1013_v54 = vpop.permute.xlu0 %1012 }
 0xba9   :  { %v1020_v56 = vrot.slane %v1013_v54, %v8057_v61 }
 0xbac   :  { %v1016_v55 = vpop.permute.xlu0 %1015 }
 0xbad   :  { %v1024_v57 = vrot.slane %v1016_v55, %v8057_v61 }
 0xbaf   :  { %v1025_v58 = vsel %vm499_vm3, %v1024_v57, %v1020_v56  ;;  %v794_v57 = vcombine.high %v793_v50, %v793_v50 }
 0xbb0   :  { %6468 = vmatmul.mubr.msk.f32.vlgmr.msra.gmra.mrb[2].mxu1 %vm578_vm6, %v1025_v58 }
 0xbb1   :  { %6643 = vmatpush1.bf16.msra.mxu1 %v7994_v9  ;;  %1312 = vmatprep.mubr.f32.mxu1 %v7670_v1 }
 0xbb2   :  { %6645 = vmatprep.subr.bf16.mxu1 %v7996_v10 }
 0xbb5   :  { %6647 = vmatpush1.bf16.msra.mxu1 %v8000_v15 }
 0xbb6   :  { %6649 = vmatprep.subr.bf16.mxu1 %v8003_v17 }
 0xbb9   :  { %6651 = vmatpush1.bf16.msra.mxu1 %v8013_v25 }
 0xbba   :  { %6653 = vmatprep.subr.bf16.mxu1 %v8016_v26 }
 0xbbd   :  { %6655 = vmatpush1.bf16.msra.mxu1 %v8021_v29 }
 0xbbe   :  { %6497 = vmatprep.subr.mxu1 %v7670_v1 }
 0xc83   :  { %v1094_v59 = vpop.f32.mrb[2].mxu1 }
 0xc84   :  { %v1095_v60 = vadd.f32 %v1094_v59, %v8134_v32  ;;  %v6469_v62 = vpop.f32.mrb[3].mxu1 }
 0xc86   :  { %v1098_v63 = vadd.f32 %v8090_v53, %v1095_v60 }
 0xc88   :  { %7003 = vtanh.f32 %v1098_v63  ;;  %v6320_v2 = vmul.f32 -1.442695, %v1098_v63  ;;  %v801_v63 = vrot.slane %v793_v50, %v8035_v39 }
 0xc8a   :  { %7005 = vpow2.f32 %v6320_v2 }
 0xc92   :  { %v7004_v0 = vpop.eup %7003 }
 0xc93   :  { %1108 = vrot.lane.b32.xlu0 %v7004_v0, %s7674_s15 }
 0xc94   :  { %v7006_v3 = vpop.eup %7005 }
 0xc95   :  { %v1102_v38 = vadd.f32 1.0, %v7006_v3  ;;  %v808_v3 = vrot.slane %v794_v57, %v8035_v39 }
 0xc97   :  { %7007 = vrcp.f32 %v1102_v38 }
 0xca1   :  { %v7008_v8 = vpop.eup %7007 }
 0xca2   :  { %v1106_v16 = vmul.f32 %v7008_v8, %v8096_v7 }
 0xd05   :  { %v1109_v11 = vpop.permute.xlu0 %1108 }
 0xd06   :  { %v1111_v12 = vmul.f32 %v7008_v8, %v1109_v11 }
 0xd08   :  { %1113 = vrot.lane.b32.xlu0 %v1111_v12, %s7674_s15 }
 0xd7a   :  { %v1114_v32 = vpop.permute.xlu0 %1113 }
 0xd7b   :  { %v8180_v19 = vadd.f32 %v1114_v32, %v1106_v16 }
 0xd7d   :  { %7009 = vtanh.f32 %v8180_v19 }
 0xd87   :  { %v7010_v21 = vpop.eup %7009 }
 0xd88   :  { %1119 = vrot.lane.b32.xlu0 %v7010_v21, %s7674_s15 }
 0xdfa   :  { %v1120_v24 = vpop.permute.xlu0 %1119 }
 0xdfb   :  { %v1122_v31 = vmul.f32 %v7008_v8, %v1120_v24 }
 0xdfd   :  { %1146 = vrot.lane.b32.xlu0 %v1122_v31, %s7657_s14  ;;  %v1130_v33 = vrot.slane %v1122_v31, %v8035_v39 }
 0xdff   :  { %v1131_v35 = vcombine.high %v1130_v33, %v1130_v33  ;;  %v1138_v7 = vrot.slane %v1130_v33, %v8035_v39 }
 0xe01   :  { %v1145_v40 = vrot.slane %v1131_v35, %v8035_v39  ;;  %v3838_v41 = vrot.slane %v1138_v7, %v8039_v43 }
 0xe03   :  { %v3842_v22 = vrot.slane %v1145_v40, %v8039_v43  ;;  %v8195_v45 = vsel %vm3905_vm9, %v701_v36, %v3838_v41 }
 0xe05   :  { %v8198_v46 = vsel %vm3905_vm9, %v708_v42, %v3842_v22 }
 0xe6f   :  { %v1147_v47 = vpop.permute.xlu0 %1146 }
 0xe70   :  { %v1244_v49 = vsel %vm713_vm7, %v1147_v47, %v8180_v19  ;;  %6479 = vmatmul.mubr.msk.f32.vlgmr.msra.gmra.mrb[8].mxu0 %vm713_vm7, %v1147_v47 }
 0xe71   :  { %6322 = vmatmul.mubr.msk.f32.vlgmr.msra.gmra.mrb[4].mxu1 %vm353_vm8, %v1244_v49  ;;  %6482 = vmatpush3.msk.msra.mxu0 %vm581_vm5, %v8076_v44 }
 0xe72   :  { %6483 = vmatprep.mubr.msk.f32.mxu0 %vm7671_vm0, %v7670_v1  ;;  %6656 = vmatprep.subr.bf16.mxu0 %v7675_v13 }
 0xe73   :  { %6498 = vmatpush3.msk.msra.mxu1 %vm581_vm5, %v8076_v44  ;;  %6499 = vmatprep.mubr.msk.f32.mxu1 %vm7671_vm0, %v7670_v1 }
 0xe74   :  { %6678 = vmatprep.subr.bf16.mxu1 %v7675_v13 }
 0xf43   :  { %v1216_v51 = vpop.f32.mrb[8].mxu0 }
 0xf44   :  { %v1227_v54 = vrot.slane %v1216_v51, %v8035_v39  ;;  %v6480_v55 = vpop.f32.mrb[9].mxu0  ;;  %v8217_v56 = vpop.f32.mrb[4].mxu1 }
 0xf45   :  { %v1316_v58 = vpop.f32.mrb[5].mxu1 }
 0xf46   :  { %v1228_v59 = vcombine.high %v1227_v54, %v1227_v54  ;;  %v1235_v60 = vrot.slane %v1227_v54, %v8035_v39  ;;  %v1319_v62 = vadd.f32 %v8031_v37, %v1316_v58 }
 0xf48   :  { %v1242_v0 = vrot.slane %v1228_v59, %v8035_v39  ;;  %v3928_v2 = vrot.slane %v1235_v60, %v8039_v43  ;;  %v1327_v28 = vrot.slane %v1319_v62, %v8035_v39 }
 0xf4a   :  { %v3932_v38 = vrot.slane %v1242_v0, %v8039_v43  ;;  %v8228_v8 = vsel %vm3905_vm9, %v801_v63, %v3928_v2  ;;  %v1328_v11 = vcombine.high %v1327_v28, %v1327_v28  ;;  %v1335_v12 = vrot.slane %v1327_v28, %v8035_v39 }
 0xf4c   :  { %v8232_v16 = vsel %vm3905_vm9, %v808_v3, %v3932_v38  ;;  %v1342_v32 = vrot.slane %v1328_v11, %v8035_v39  ;;  %v1346_v21 = vrot.slane %v1335_v12, %v8039_v43 }
 0xf4e   :  { %v1350_v24 = vrot.slane %v1342_v32, %v8039_v43  ;;  %v1353_v27 = vadd.f32 %v1346_v21, %v8029_v30 }
 0xf50   :  { %v1354_v31 = vadd.f32 %v1350_v24, %v8046_v48  ;;  %7011 = vtanh.f32 %v1353_v27 }
 0xf52   :  { %7013 = vtanh.f32 %v1354_v31 }
 0xf5a   :  { %v7012_v33 = vpop.eup %7011 }
 0xf5b   :  { %v1357_v34 = vmul.f32 %v7012_v33, %v8051_v52 }
 0xf5c   :  { %v7014_v35 = vpop.eup %7013 }
 0xf5d   :  { %v1359_v7 = vsel %vm480_vm2, %v1357_v34, 0.0  ;;  %v1358_v36 = vmul.f32 %v7014_v35, %v8051_v52 }
 0xf5e   :  { %1360 = vadd.xlane.f32.xlu0 %v1359_v7 }
 0xf5f   :  { %v1362_v40 = vsel %vm480_vm2, %v1358_v36, 0.0 }
 0xf60   :  { %1363 = vadd.xlane.f32.xlu1 %v1362_v40 }
 0xfeb   :  { %v1361_v41 = vpop.xlane.xlu0 %1360 }
 0xfec   :  { %v1370_v22 = vrot.slane %v1361_v41, %v8057_v61 }
 0xfed   :  { %v1364_v42 = vpop.xlane.xlu1 %1363 }
 0xfee   :  { %v1374_v47 = vrot.slane %v1364_v42, %v8057_v61 }
 0xff0   :  { %v1375_v49 = vsel %vm499_vm3, %v1374_v47, %v1370_v22 }
 0xff1   :  { %v1377_v50 = vsel %vm502_vm4, %v1375_v49, -inf }
 0xff2   :  { %1378 = vmax.xlane.f32.xlu1 %v1377_v50 }
0x107f   :  { %v1379_v51 = vpop.xlane.xlu1 %1378 }
0x1080   :  { %v1384_v54 = vrot.slane %v1379_v51, %v8039_v43  ;;  %v1388_v55 = vrot.slane %v1379_v51, %v8065_v6 }
0x1082   :  { %v1391_v57 = vsub.f32 %v1361_v41, %v1384_v54  ;;  %v1392_v58 = vsub.f32 %v1364_v42, %v1388_v55 }
0x1084   :  { %v1393_v59 = vmul.f32 1.442695, %v1391_v57  ;;  %v1395_v60 = vmul.f32 1.442695, %v1392_v58 }
0x1086   :  { %7015 = vpow2.f32 %v1393_v59 }
0x1087   :  { %7017 = vpow2.f32 %v1395_v60 }
0x1090   :  { %v7016_v62 = vpop.eup %7015 }
0x1091   :  { %1400 = vperm.xlu1 %6954, %v7016_v62   ;;  %v7018_v63 = vpop.eup %7017 }
0x1095   :  { %1403 = vperm.xlu1 %6954, %v7018_v63  }
0x1099   :  { %1433 = vrot.lane.b32.xlu1 %v8005_v20, %s7677_s10 }
0x1110   :  { %v1401_v0 = vpop.permute.xlu1 %1400 }
0x1111   :  { %v1408_v28 = vrot.slane %v1401_v0, %v8057_v61 }
0x1114   :  { %v1404_v2 = vpop.permute.xlu1 %1403 }
0x1115   :  { %v1412_v3 = vrot.slane %v1404_v2, %v8057_v61 }
0x1117   :  { %v1413_v38 = vsel %vm499_vm3, %v1412_v3, %v1408_v28 }
0x1118   :  { %v1415_v11 = vsel %vm502_vm4, %v1413_v38, 0.0  ;;  %v1434_v27 = vpop.permute.xlu1 %1433 }
0x1119   :  { %1416 = vadd.xlane.f32.xlu0 %v1415_v11 }
0x112f   :  { %1435 = vrot.lane.b32.xlu0 %v8007_v23, %s7677_s10 }
0x11a6   :  { %v1417_v12 = vpop.xlane.xlu0 %1416 }
0x11a7   :  { %v1422_v32 = vrot.slane %v1417_v12, %v8039_v43  ;;  %v1426_v21 = vrot.slane %v1417_v12, %v8065_v6 }
0x11a9   :  { %7019 = vrcp.f32 %v1422_v32 }
0x11aa   :  { %7021 = vrcp.f32 %v1426_v21  ;;  %v1436_v7 = vpop.permute.xlu0 %1435 }
0x11b3   :  { %v7020_v24 = vpop.eup %7019 }
0x11b4   :  { %v7022_v31 = vpop.eup %7021  ;;  %v1430_v33 = vmul.f32 %v7020_v24, %v7016_v62 }
0x11b5   :  { %v1432_v34 = vmul.f32 %v7022_v31, %v7018_v63 }
0x11b6   :  { %v1439_v35 = vmul.f32 %v1434_v27, %v1430_v33 }
0x11b7   :  { %v1440_v36 = vmul.f32 %v1436_v7, %v1432_v34 }
0x11b8   :  { %1444 = vperm.xlu1 %6954, %v1439_v35  }
0x11bc   :  { %1447 = vperm.xlu1 %6954, %v1440_v36  }
0x1237   :  { %v1445_v40 = vpop.permute.xlu1 %1444 }
0x1238   :  { %v1452_v42 = vrot.slane %v1445_v40, %v8057_v61 }
0x123b   :  { %v1448_v41 = vpop.permute.xlu1 %1447 }
0x123c   :  { %v1456_v22 = vrot.slane %v1448_v41, %v8057_v61 }
0x123e   :  { %v1457_v47 = vsel %vm499_vm3, %v1456_v22, %v1452_v42 }
0x123f   :  { %6484 = vmatmul.mubr.msk.f32.vlgmr.msra.gmra.mrb[10].mxu0 %vm578_vm6, %v1457_v47 }
0x1240   :  { %6658 = vmatpush3.bf16.msra.mxu0 %v8100_v14  ;;  %6494 = vmatprep.mubr.msk.f32.mxu0 %vm7671_vm0, %v7670_v1 }
0x1241   :  { %6659 = vmatprep.subr.bf16.mxu0 %v7675_v13 }
0x1244   :  { %6661 = vmatpush3.bf16.msra.mxu0 %v8103_v18 }
0x1245   :  { %6663 = vmatprep.subr.bf16.mxu0 %v7992_v5 }
0x1312   :  { %v1526_v49 = vpop.f32.mrb[10].mxu0 }
0x1313   :  { %v1527_v50 = vadd.f32 %v1526_v49, %v8217_v56  ;;  %v6485_v51 = vpop.f32.mrb[11].mxu0 }
0x1315   :  { %v1530_v54 = vadd.f32 %v8090_v53, %v1527_v50 }
0x1317   :  { %7023 = vtanh.f32 %v1530_v54  ;;  %v6325_v57 = vmul.f32 -1.442695, %v1530_v54 }
0x1319   :  { %7025 = vpow2.f32 %v6325_v57 }
0x1321   :  { %v7024_v55 = vpop.eup %7023 }
0x1322   :  { %1540 = vrot.lane.b32.xlu1 %v7024_v55, %s7674_s15 }
0x1323   :  { %v7026_v58 = vpop.eup %7025 }
0x1324   :  { %v1534_v59 = vadd.f32 1.0, %v7026_v58 }
0x1326   :  { %7027 = vrcp.f32 %v1534_v59 }
0x1330   :  { %v7028_v60 = vpop.eup %7027 }
0x1331   :  { %v1538_v0 = vmul.f32 %v7028_v60, %v8180_v19 }
0x1394   :  { %v1541_v62 = vpop.permute.xlu1 %1540 }
0x1395   :  { %v1543_v63 = vmul.f32 %v7028_v60, %v1541_v62 }
0x1397   :  { %1545 = vrot.lane.b32.xlu1 %v1543_v63, %s7674_s15 }
0x1409   :  { %v1546_v56 = vpop.permute.xlu1 %1545 }
0x140a   :  { %v8272_v2 = vadd.f32 %v1546_v56, %v1538_v0 }
0x140c   :  { %7029 = vtanh.f32 %v8272_v2 }
0x1416   :  { %v7030_v28 = vpop.eup %7029 }
0x1417   :  { %1551 = vrot.lane.b32.xlu1 %v7030_v28, %s7674_s15 }
0x1489   :  { %v1552_v3 = vpop.permute.xlu1 %1551 }
0x148a   :  { %v1554_v38 = vmul.f32 %v7028_v60, %v1552_v3 }
0x148c   :  { %1578 = vrot.lane.b32.xlu1 %v1554_v38, %s7657_s14  ;;  %v1562_v11 = vrot.slane %v1554_v38, %v8035_v39 }
0x148e   :  { %v1563_v12 = vcombine.high %v1562_v11, %v1562_v11  ;;  %v1570_v32 = vrot.slane %v1562_v11, %v8035_v39 }
0x1490   :  { %v1577_v19 = vrot.slane %v1563_v12, %v8035_v39  ;;  %v3848_v21 = vrot.slane %v1570_v32, %v8039_v43 }
0x1492   :  { %v3852_v24 = vrot.slane %v1577_v19, %v8039_v43  ;;  %v8284_v27 = vsel %vm3908_vm10, %v8195_v45, %v3848_v21 }
0x1494   :  { %v8288_v31 = vsel %vm3908_vm10, %v8198_v46, %v3852_v24 }
0x14fe   :  { %v1579_v33 = vpop.permute.xlu1 %1578 }
0x14ff   :  { %6495 = vmatmul.mubr.msk.f32.vlgmr.msra.gmra.mrb[12].mxu0 %vm713_vm7, %v1579_v33  ;;  %v1676_v45 = vsel %vm713_vm7, %v1579_v33, %v8272_v2 }
0x1500   :  { %6665 = vmatpush1.bf16.msra.mxu0 %v7994_v9  ;;  %1744 = vmatprep.mubr.f32.mxu0 %v7670_v1 }
0x1501   :  { %6667 = vmatprep.subr.bf16.mxu0 %v7996_v10 }
0x1504   :  { %6669 = vmatpush1.bf16.msra.mxu0 %v8000_v15 }
0x1505   :  { %6671 = vmatprep.subr.bf16.mxu0 %v8003_v17 }
0x1508   :  { %6673 = vmatpush1.bf16.msra.mxu0 %v8013_v25 }
0x1509   :  { %6675 = vmatprep.subr.bf16.mxu0 %v8016_v26 }
0x150c   :  { %6677 = vmatpush1.bf16.msra.mxu0 %v8021_v29 }
0x150d   :  { %6513 = vmatprep.subr.mxu0 %v7670_v1 }
0x150f   :  { %6327 = vmatmul.mubr.msk.f32.vlgmr.msra.gmra.mrb[14].mxu0 %vm353_vm8, %v1676_v45 }
0x1510   :  { %6514 = vmatpush3.msk.msra.mxu0 %vm581_vm5, %v8076_v44  ;;  %6515 = vmatprep.mubr.msk.f32.mxu0 %vm7671_vm0, %v7670_v1 }
0x1511   :  { %6700 = vmatprep.subr.bf16.mxu0 %v7675_v13 }
0x15d2   :  { %v1648_v46 = vpop.f32.mrb[12].mxu0 }
0x15d3   :  { %v1659_v34 = vrot.slane %v1648_v46, %v8035_v39  ;;  %v6496_v35 = vpop.f32.mrb[13].mxu0 }
0x15d5   :  { %v1660_v7 = vcombine.high %v1659_v34, %v1659_v34  ;;  %v1667_v36 = vrot.slane %v1659_v34, %v8035_v39 }
0x15d7   :  { %v1674_v40 = vrot.slane %v1660_v7, %v8035_v39  ;;  %v3938_v41 = vrot.slane %v1667_v36, %v8039_v43 }
0x15d9   :  { %v3942_v42 = vrot.slane %v1674_v40, %v8039_v43  ;;  %v8315_v22 = vsel %vm3908_vm10, %v8228_v8, %v3938_v41 }
0x15db   :  { %v8319_v47 = vsel %vm3908_vm10, %v8232_v16, %v3942_v42 }
0x15e2   :  { %v8321_v49 = vpop.f32.mrb[14].mxu0 }
0x15e3   :  { %v1748_v50 = vpop.f32.mrb[15].mxu0 }
0x15e4   :  { %v1751_v51 = vadd.f32 %v8031_v37, %v1748_v50 }
0x15e6   :  { %v1759_v54 = vrot.slane %v1751_v51, %v8035_v39 }
0x15e8   :  { %v1760_v55 = vcombine.high %v1759_v54, %v1759_v54  ;;  %v1767_v57 = vrot.slane %v1759_v54, %v8035_v39 }
0x15ea   :  { %v1774_v58 = vrot.slane %v1760_v55, %v8035_v39  ;;  %v1778_v59 = vrot.slane %v1767_v57, %v8039_v43 }
0x15ec   :  { %v1782_v8 = vrot.slane %v1774_v58, %v8039_v43  ;;  %v1785_v60 = vadd.f32 %v1778_v59, %v8029_v30 }
0x15ee   :  { %v1786_v16 = vadd.f32 %v1782_v8, %v8046_v48  ;;  %7031 = vtanh.f32 %v1785_v60 }
0x15f0   :  { %7033 = vtanh.f32 %v1786_v16 }
0x15f8   :  { %v7032_v62 = vpop.eup %7031 }
0x15f9   :  { %v1789_v37 = vmul.f32 %v7032_v62, %v8051_v52 }
0x15fa   :  { %v7034_v63 = vpop.eup %7033 }
0x15fb   :  { %v1791_v0 = vsel %vm480_vm2, %v1789_v37, 0.0  ;;  %v1790_v56 = vmul.f32 %v7034_v63, %v8051_v52 }
0x15fc   :  { %1792 = vadd.xlane.f32.xlu0 %v1791_v0 }
0x15fd   :  { %v1794_v28 = vsel %vm480_vm2, %v1790_v56, 0.0 }
0x15fe   :  { %1795 = vadd.xlane.f32.xlu1 %v1794_v28 }
0x1689   :  { %v1793_v3 = vpop.xlane.xlu0 %1792 }
0x168a   :  { %v1802_v11 = vrot.slane %v1793_v3, %v8057_v61 }
0x168b   :  { %v1796_v38 = vpop.xlane.xlu1 %1795 }
0x168c   :  { %v1806_v12 = vrot.slane %v1796_v38, %v8057_v61 }
0x168e   :  { %v1807_v32 = vsel %vm499_vm3, %v1806_v12, %v1802_v11 }
0x168f   :  { %v1809_v19 = vsel %vm502_vm4, %v1807_v32, -inf }
0x1690   :  { %1810 = vmax.xlane.f32.xlu0 %v1809_v19 }
0x171d   :  { %v1811_v21 = vpop.xlane.xlu0 %1810 }
0x171e   :  { %v1816_v24 = vrot.slane %v1811_v21, %v8039_v43  ;;  %v1820_v52 = vrot.slane %v1811_v21, %v8065_v6 }
0x1720   :  { %v1823_v33 = vsub.f32 %v1793_v3, %v1816_v24  ;;  %v1824_v45 = vsub.f32 %v1796_v38, %v1820_v52 }
0x1722   :  { %v1825_v46 = vmul.f32 1.442695, %v1823_v33  ;;  %v1827_v34 = vmul.f32 1.442695, %v1824_v45 }
0x1724   :  { %7035 = vpow2.f32 %v1825_v46 }
0x1725   :  { %7037 = vpow2.f32 %v1827_v34 }
0x172e   :  { %v7036_v35 = vpop.eup %7035 }
0x172f   :  { %v7038_v7 = vpop.eup %7037  ;;  %1832 = vperm.xlu0 %6955, %v7036_v35  }
0x1730   :  { %1835 = vperm.xlu1 %6954, %v7038_v7  }
0x1733   :  { %1865 = vrot.lane.b32.xlu0 %v8005_v20, %s7678_s25 }
0x1737   :  { %1867 = vrot.lane.b32.xlu0 %v8007_v23, %s7678_s25 }
0x17ae   :  { %v1833_v36 = vpop.permute.xlu0 %1832 }
0x17af   :  { %v1836_v40 = vpop.permute.xlu1 %1835  ;;  %v1840_v41 = vrot.slane %v1833_v36, %v8057_v61 }
0x17b0   :  { %v1844_v42 = vrot.slane %v1836_v40, %v8057_v61 }
0x17b2   :  { %v1845_v50 = vsel %vm499_vm3, %v1844_v42, %v1840_v41  ;;  %v1866_v20 = vpop.permute.xlu0 %1865 }
0x17b3   :  { %v1847_v51 = vsel %vm502_vm4, %v1845_v50, 0.0 }
0x17b4   :  { %1848 = vadd.xlane.f32.xlu1 %v1847_v51 }
0x17b6   :  { %v1868_v16 = vpop.permute.xlu0 %1867 }
0x1841   :  { %v1849_v54 = vpop.xlane.xlu1 %1848 }
0x1842   :  { %v1854_v55 = vrot.slane %v1849_v54, %v8039_v43  ;;  %v1858_v57 = vrot.slane %v1849_v54, %v8065_v6 }
0x1844   :  { %7039 = vrcp.f32 %v1854_v55 }
0x1845   :  { %7041 = vrcp.f32 %v1858_v57 }
0x184e   :  { %v7040_v23 = vpop.eup %7039 }
0x184f   :  { %v7042_v58 = vpop.eup %7041  ;;  %v1862_v59 = vmul.f32 %v7040_v23, %v7036_v35 }
0x1850   :  { %v1864_v60 = vmul.f32 %v7042_v58, %v7038_v7 }
0x1851   :  { %v1871_v8 = vmul.f32 %v1866_v20, %v1862_v59 }
0x1852   :  { %v1872_v62 = vmul.f32 %v1868_v16, %v1864_v60 }
0x1853   :  { %1876 = vperm.xlu0 %6955, %v1871_v8  }
0x1857   :  { %1879 = vperm.xlu0 %6955, %v1872_v62  }
0x18d2   :  { %v1877_v37 = vpop.permute.xlu0 %1876 }
0x18d3   :  { %v1884_v0 = vrot.slane %v1877_v37, %v8057_v61 }
0x18d6   :  { %v1880_v63 = vpop.permute.xlu0 %1879 }
0x18d7   :  { %v1888_v56 = vrot.slane %v1880_v63, %v8057_v61  ;;  %v8415_v63 = vld [vmem:[#allocation8] ss:$0 sm:$0xff] }
0x18d9   :  { %v1889_v28 = vsel %vm499_vm3, %v1888_v56, %v1884_v0 }
0x18da   :  { %6500 = vmatmul.mubr.msk.f32.vlgmr.msra.gmra.mrb[6].mxu1 %vm578_vm6, %v1889_v28 }
0x18db   :  { %6680 = vmatpush3.bf16.msra.mxu1 %v8100_v14  ;;  %6510 = vmatprep.mubr.msk.f32.mxu1 %vm7671_vm0, %v7670_v1 }
0x18dc   :  { %6681 = vmatprep.subr.bf16.mxu1 %v7675_v13 }
0x18df   :  { %6683 = vmatpush3.bf16.msra.mxu1 %v8103_v18 }
0x18e0   :  { %6685 = vmatprep.subr.bf16.mxu1 %v7992_v5 }
0x19ad   :  { %v1958_v3 = vpop.f32.mrb[6].mxu1 }
0x19ae   :  { %v1959_v38 = vadd.f32 %v1958_v3, %v8321_v49  ;;  %v6501_v11 = vpop.f32.mrb[7].mxu1 }
0x19b0   :  { %v1962_v12 = vadd.f32 %v8090_v53, %v1959_v38 }
0x19b2   :  { %7043 = vtanh.f32 %v1962_v12  ;;  %v6330_v19 = vmul.f32 -1.442695, %v1962_v12 }
0x19b4   :  { %7045 = vpow2.f32 %v6330_v19  ;;  %v8425_v19 = vld [vmem:[#allocation11] ss:$0 sm:$0xff] }
0x19bc   :  { %v7044_v32 = vpop.eup %7043 }
0x19bd   :  { %1972 = vrot.lane.b32.xlu0 %v7044_v32, %s7674_s15 }
0x19be   :  { %v7046_v21 = vpop.eup %7045 }
0x19bf   :  { %v1966_v24 = vadd.f32 1.0, %v7046_v21 }
0x19c1   :  { %7047 = vrcp.f32 %v1966_v24 }
0x19cb   :  { %v7048_v52 = vpop.eup %7047 }
0x19cc   :  { %v1970_v46 = vmul.f32 %v7048_v52, %v8272_v2 }
0x1a2f   :  { %v1973_v33 = vpop.permute.xlu0 %1972 }
0x1a30   :  { %v1975_v45 = vmul.f32 %v7048_v52, %v1973_v33 }
0x1a32   :  { %1977 = vrot.lane.b32.xlu0 %v1975_v45, %s7674_s15 }
0x1aa4   :  { %v1978_v49 = vpop.permute.xlu0 %1977 }
0x1aa5   :  { %v8364_v34 = vadd.f32 %v1978_v49, %v1970_v46 }
0x1aa7   :  { %7049 = vtanh.f32 %v8364_v34 }
0x1ab1   :  { %v7050_v53 = vpop.eup %7049 }
0x1ab2   :  { %1983 = vrot.lane.b32.xlu0 %v7050_v53, %s7674_s15 }
0x1b24   :  { %v1984_v35 = vpop.permute.xlu0 %1983 }
0x1b25   :  { %v1986_v7 = vmul.f32 %v7048_v52, %v1984_v35 }
0x1b27   :  { %2010 = vrot.lane.b32.xlu0 %v1986_v7, %s7657_s14  ;;  %v1994_v36 = vrot.slane %v1986_v7, %v8035_v39 }
0x1b29   :  { %v1995_v40 = vcombine.high %v1994_v36, %v1994_v36  ;;  %v2002_v41 = vrot.slane %v1994_v36, %v8035_v39 }
0x1b2b   :  { %v2009_v2 = vrot.slane %v1995_v40, %v8035_v39  ;;  %v3858_v42 = vrot.slane %v2002_v41, %v8039_v43 }
0x1b2d   :  { %v3862_v50 = vrot.slane %v2009_v2, %v8039_v43  ;;  %v8376_v51 = vsel %vm3911_vm11, %v8284_v27, %v3858_v42 }
0x1b2f   :  { %v8380_v54 = vsel %vm3911_vm11, %v8288_v31, %v3862_v50 }
0x1b99   :  { %v2011_v55 = vpop.permute.xlu0 %2010 }
0x1b9a   :  { %6511 = vmatmul.mubr.msk.f32.vlgmr.msra.gmra.mrb[8].mxu1 %vm713_vm7, %v2011_v55  ;;  %v2108_v27 = vsel %vm713_vm7, %v2011_v55, %v8364_v34 }
0x1b9b   :  { %6687 = vmatpush1.bf16.msra.mxu1 %v7994_v9  ;;  %2176 = vmatprep.mubr.f32.mxu1 %v7670_v1 }
0x1b9c   :  { %6689 = vmatprep.subr.bf16.mxu1 %v7996_v10 }
0x1b9f   :  { %6691 = vmatpush1.bf16.msra.mxu1 %v8000_v15 }
0x1ba0   :  { %6693 = vmatprep.subr.bf16.mxu1 %v8003_v17 }
0x1ba3   :  { %6695 = vmatpush1.bf16.msra.mxu1 %v8013_v25 }
0x1ba4   :  { %6697 = vmatprep.subr.bf16.mxu1 %v8016_v26 }
0x1ba7   :  { %6699 = vmatpush1.bf16.msra.mxu1 %v8021_v29 }
0x1ba8   :  { %6529 = vmatprep.subr.mxu1 %v7670_v1 }
0x1baa   :  { %6332 = vmatmul.mubr.msk.f32.vlgmr.msra.gmra.mrb[10].mxu1 %vm353_vm8, %v2108_v27 }
0x1bab   :  { %6530 = vmatpush3.msk.msra.mxu1 %vm581_vm5, %v8076_v44  ;;  %6531 = vmatprep.mubr.msk.f32.mxu1 %vm7671_vm0, %v7670_v1 }
0x1bac   :  { %6722 = vmatprep.subr.bf16.mxu1 %v7675_v13 }
0x1c6d   :  { %v2080_v31 = vpop.f32.mrb[8].mxu1 }
0x1c6e   :  { %v2091_v57 = vrot.slane %v2080_v31, %v8035_v39  ;;  %v6512_v20 = vpop.f32.mrb[9].mxu1 }
0x1c6f   :  { %v8437_v20 = vld [vmem:[#allocation3] sm:$0xf] }
0x1c70   :  { %v2092_v23 = vcombine.high %v2091_v57, %v2091_v57  ;;  %v2099_v58 = vrot.slane %v2091_v57, %v8035_v39 }
0x1c72   :  { %v2106_v59 = vrot.slane %v2092_v23, %v8035_v39  ;;  %v3948_v8 = vrot.slane %v2099_v58, %v8039_v43 }
0x1c74   :  { %v3952_v60 = vrot.slane %v2106_v59, %v8039_v43  ;;  %v8407_v44 = vsel %vm3911_vm11, %v8315_v22, %v3948_v8 }
0x1c76   :  { %v8411_v16 = vsel %vm3911_vm11, %v8319_v47, %v3952_v60 }
0x1c7d   :  { %v8413_v62 = vpop.f32.mrb[10].mxu1 }
0x1c7e   :  { %v2180_v37 = vpop.f32.mrb[11].mxu1 }
0x1c7f   :  { %v2183_v0 = vadd.f32 %v8415_v63, %v2180_v37 }
0x1c81   :  { %v2191_v56 = vrot.slane %v2183_v0, %v8035_v39  ;;  %v8444_v0 = vld [vmem:[#allocation3 + $0x4] sm:$0xf] }
0x1c83   :  { %v2192_v28 = vcombine.high %v2191_v56, %v2191_v56  ;;  %v2199_v3 = vrot.slane %v2191_v56, %v8035_v39 }
0x1c85   :  { %v2206_v38 = vrot.slane %v2192_v28, %v8035_v39  ;;  %v2210_v22 = vrot.slane %v2199_v3, %v8039_v43 }
0x1c87   :  { %v2214_v11 = vrot.slane %v2206_v38, %v8039_v43  ;;  %v2217_v47 = vadd.f32 %v2210_v22, %v8029_v30 }
0x1c89   :  { %v2218_v12 = vadd.f32 %v2214_v11, %v8046_v48  ;;  %7051 = vtanh.f32 %v2217_v47 }
0x1c8b   :  { %7053 = vtanh.f32 %v2218_v12 }
0x1c93   :  { %v7052_v32 = vpop.eup %7051 }
0x1c94   :  { %v2221_v21 = vmul.f32 %v8425_v19, %v7052_v32 }
0x1c95   :  { %v7054_v24 = vpop.eup %7053 }
0x1c96   :  { %v2223_v52 = vsel %vm480_vm2, %v2221_v21, 0.0  ;;  %v2222_v33 = vmul.f32 %v8425_v19, %v7054_v24 }
0x1c97   :  { %2224 = vadd.xlane.f32.xlu0 %v2223_v52 }
0x1c98   :  { %v2226_v45 = vsel %vm480_vm2, %v2222_v33, 0.0 }
0x1c99   :  { %2227 = vadd.xlane.f32.xlu1 %v2226_v45 }
0x1d24   :  { %v2225_v46 = vpop.xlane.xlu0 %2224 }
0x1d25   :  { %v2234_v53 = vrot.slane %v2225_v46, %v8057_v61 }
0x1d26   :  { %v2228_v49 = vpop.xlane.xlu1 %2227 }
0x1d27   :  { %v2238_v35 = vrot.slane %v2228_v49, %v8057_v61 }
0x1d29   :  { %v2239_v7 = vsel %vm499_vm3, %v2238_v35, %v2234_v53 }
0x1d2a   :  { %v2241_v36 = vsel %vm502_vm4, %v2239_v7, -inf }
0x1d2b   :  { %2242 = vmax.xlane.f32.xlu1 %v2241_v36  ;;  %v8460_v36 = vld [vmem:[#allocation14] ss:$0 sm:$0xff] }
0x1db8   :  { %v2243_v40 = vpop.xlane.xlu1 %2242 }
0x1db9   :  { %v2248_v41 = vrot.slane %v2243_v40, %v8039_v43  ;;  %v2252_v2 = vrot.slane %v2243_v40, %v8065_v6 }
0x1dbb   :  { %v2255_v42 = vsub.f32 %v2225_v46, %v2248_v41  ;;  %v2256_v50 = vsub.f32 %v2228_v49, %v2252_v2 }
0x1dbd   :  { %v2257_v55 = vmul.f32 1.442695, %v2255_v42  ;;  %v2259_v27 = vmul.f32 1.442695, %v2256_v50 }
0x1dbf   :  { %7055 = vpow2.f32 %v2257_v55 }
0x1dc0   :  { %7057 = vpow2.f32 %v2259_v27 }
0x1dc9   :  { %v7056_v31 = vpop.eup %7055 }
0x1dca   :  { %2264 = vperm.xlu1 %6954, %v7056_v31   ;;  %v7058_v57 = vpop.eup %7057 }
0x1dce   :  { %2267 = vperm.xlu1 %6954, %v7058_v57  }
0x1dd2   :  { %2297 = vrot.lane.b32.xlu1 %v8437_v20, %s7679_s6 }
0x1e49   :  { %v2265_v23 = vpop.permute.xlu1 %2264 }
0x1e4a   :  { %v2272_v59 = vrot.slane %v2265_v23, %v8057_v61 }
0x1e4d   :  { %v2268_v58 = vpop.permute.xlu1 %2267 }
0x1e4e   :  { %v2276_v8 = vrot.slane %v2268_v58, %v8057_v61 }
0x1e50   :  { %v2277_v60 = vsel %vm499_vm3, %v2276_v8, %v2272_v59 }
0x1e51   :  { %v2279_v37 = vsel %vm502_vm4, %v2277_v60, 0.0  ;;  %v2298_v22 = vpop.permute.xlu1 %2297 }
0x1e52   :  { %2280 = vadd.xlane.f32.xlu0 %v2279_v37 }
0x1e68   :  { %2299 = vrot.lane.b32.xlu0 %v8444_v0, %s7679_s6 }
0x1edf   :  { %v2281_v56 = vpop.xlane.xlu0 %2280 }
0x1ee0   :  { %v2286_v28 = vrot.slane %v2281_v56, %v8039_v43  ;;  %v2290_v3 = vrot.slane %v2281_v56, %v8065_v6 }
0x1ee2   :  { %7059 = vrcp.f32 %v2286_v28 }
0x1ee3   :  { %7061 = vrcp.f32 %v2290_v3  ;;  %v2300_v21 = vpop.permute.xlu0 %2299 }
0x1eec   :  { %v7060_v38 = vpop.eup %7059 }
0x1eed   :  { %v7062_v11 = vpop.eup %7061  ;;  %v2294_v47 = vmul.f32 %v7060_v38, %v7056_v31 }
0x1eee   :  { %v2296_v12 = vmul.f32 %v7062_v11, %v7058_v57 }
0x1eef   :  { %v2303_v32 = vmul.f32 %v2298_v22, %v2294_v47 }
0x1ef0   :  { %v2304_v24 = vmul.f32 %v2300_v21, %v2296_v12 }
0x1ef1   :  { %2308 = vperm.xlu1 %6954, %v2303_v32  }
0x1ef5   :  { %2311 = vperm.xlu1 %6954, %v2304_v24  }
0x1f70   :  { %v2309_v52 = vpop.permute.xlu1 %2308 }
0x1f71   :  { %v2316_v45 = vrot.slane %v2309_v52, %v8057_v61 }
0x1f74   :  { %v2312_v33 = vpop.permute.xlu1 %2311 }
0x1f75   :  { %v2320_v46 = vrot.slane %v2312_v33, %v8057_v61 }
0x1f77   :  { %v2321_v49 = vsel %vm499_vm3, %v2320_v46, %v2316_v45 }
0x1f78   :  { %6516 = vmatmul.mubr.msk.f32.vlgmr.msra.gmra.mrb[16].mxu0 %vm578_vm6, %v2321_v49 }
0x1f79   :  { %6702 = vmatpush3.bf16.msra.mxu0 %v8100_v14  ;;  %6526 = vmatprep.mubr.msk.f32.mxu0 %vm7671_vm0, %v7670_v1 }
0x1f7a   :  { %6703 = vmatprep.subr.bf16.mxu0 %v7675_v13 }
0x1f7d   :  { %6705 = vmatpush3.bf16.msra.mxu0 %v8103_v18 }
0x1f7e   :  { %6707 = vmatprep.subr.bf16.mxu0 %v7992_v5 }
0x204b   :  { %v2390_v53 = vpop.f32.mrb[16].mxu0 }
0x204c   :  { %v2391_v35 = vadd.f32 %v2390_v53, %v8413_v62  ;;  %v6517_v7 = vpop.f32.mrb[17].mxu0 }
0x204e   :  { %v2394_v40 = vadd.f32 %v8460_v36, %v2391_v35 }
0x2050   :  { %7063 = vtanh.f32 %v2394_v40  ;;  %v6335_v2 = vmul.f32 -1.442695, %v2394_v40 }
0x2052   :  { %7065 = vpow2.f32 %v6335_v2 }
0x205a   :  { %v7064_v41 = vpop.eup %7063 }
0x205b   :  { %2404 = vrot.lane.b32.xlu1 %v7064_v41, %s7674_s15 }
0x205c   :  { %v7066_v42 = vpop.eup %7065 }
0x205d   :  { %v2398_v50 = vadd.f32 1.0, %v7066_v42 }
0x205f   :  { %7067 = vrcp.f32 %v2398_v50 }
0x2069   :  { %v7068_v55 = vpop.eup %7067 }
0x206a   :  { %v2402_v62 = vmul.f32 %v7068_v55, %v8364_v34 }
0x20cd   :  { %v2405_v27 = vpop.permute.xlu1 %2404 }
0x20ce   :  { %v2407_v31 = vmul.f32 %v7068_v55, %v2405_v27 }
0x20d0   :  { %2409 = vrot.lane.b32.xlu1 %v2407_v31, %s7674_s15 }
0x2142   :  { %v2410_v57 = vpop.permute.xlu1 %2409 }
0x2143   :  { %v8466_v23 = vadd.f32 %v2410_v57, %v2402_v62 }
0x2145   :  { %7069 = vtanh.f32 %v8466_v23 }
0x214f   :  { %v7070_v58 = vpop.eup %7069 }
0x2150   :  { %2415 = vrot.lane.b32.xlu1 %v7070_v58, %s7674_s15 }
0x21c2   :  { %v2416_v59 = vpop.permute.xlu1 %2415 }
0x21c3   :  { %v2418_v8 = vmul.f32 %v7068_v55, %v2416_v59 }
0x21c5   :  { %2442 = vrot.lane.b32.xlu1 %v2418_v8, %s7657_s14  ;;  %v2426_v60 = vrot.slane %v2418_v8, %v8035_v39 }
0x21c7   :  { %v2427_v37 = vcombine.high %v2426_v60, %v2426_v60  ;;  %v2434_v56 = vrot.slane %v2426_v60, %v8035_v39 }
0x21c9   :  { %v2441_v28 = vrot.slane %v2427_v37, %v8035_v39  ;;  %v3868_v34 = vrot.slane %v2434_v56, %v8039_v43 }
0x21cb   :  { %v3872_v3 = vrot.slane %v2441_v28, %v8039_v43  ;;  %v8478_v38 = vsel %vm581_vm5, %v8376_v51, %v3868_v34 }
0x21cd   :  { %v8482_v22 = vsel %vm581_vm5, %v8380_v54, %v3872_v3  ;;  %v8497_v54 = vld [vmem:[#allocation13] sm:$0xf] }
0x2237   :  { %v2443_v11 = vpop.permute.xlu1 %2442 }
0x2238   :  { %6527 = vmatmul.mubr.msk.f32.vlgmr.msra.gmra.mrb[18].mxu0 %vm713_vm7, %v2443_v11  ;;  %v2540_v51 = vsel %vm713_vm7, %v2443_v11, %v8466_v23 }
0x2239   :  { %6709 = vmatpush1.bf16.msra.mxu0 %v7994_v9  ;;  %2608 = vmatprep.mubr.f32.mxu0 %v7670_v1 }
0x223a   :  { %6711 = vmatprep.subr.bf16.mxu0 %v7996_v10 }
0x223d   :  { %6713 = vmatpush1.bf16.msra.mxu0 %v8000_v15 }
0x223e   :  { %6715 = vmatprep.subr.bf16.mxu0 %v8003_v17 }
0x2241   :  { %6717 = vmatpush1.bf16.msra.mxu0 %v8013_v25 }
0x2242   :  { %6719 = vmatprep.subr.bf16.mxu0 %v8016_v26 }
0x2245   :  { %6721 = vmatpush1.bf16.msra.mxu0 %v8021_v29 }
0x2246   :  { %6545 = vmatprep.subr.mxu0 %v7670_v1 }
0x2248   :  { %6337 = vmatmul.mubr.msk.f32.vlgmr.msra.gmra.mrb[20].mxu0 %vm353_vm8, %v2540_v51 }
0x2249   :  { %6546 = vmatpush3.msk.msra.mxu0 %vm581_vm5, %v8497_v54  ;;  %6547 = vmatprep.mubr.msk.f32.mxu0 %vm7671_vm0, %v7670_v1 }
0x224a   :  { %6744 = vmatprep.subr.bf16.mxu0 %v7675_v13 }
0x230b   :  { %v2512_v47 = vpop.f32.mrb[18].mxu0 }
0x230c   :  { %v2523_v12 = vrot.slane %v2512_v47, %v8035_v39  ;;  %v6528_v32 = vpop.f32.mrb[19].mxu0 }
0x230e   :  { %v2524_v21 = vcombine.high %v2523_v12, %v2523_v12  ;;  %v2531_v24 = vrot.slane %v2523_v12, %v8035_v39 }
0x2310   :  { %v2538_v52 = vrot.slane %v2524_v21, %v8035_v39  ;;  %v3958_v33 = vrot.slane %v2531_v24, %v8039_v43 }
0x2312   :  { %v3962_v45 = vrot.slane %v2538_v52, %v8039_v43  ;;  %v8511_v46 = vsel %vm581_vm5, %v8407_v44, %v3958_v33 }
0x2314   :  { %v8515_v49 = vsel %vm581_vm5, %v8411_v16, %v3962_v45 }
0x231b   :  { %v8517_v53 = vpop.f32.mrb[20].mxu0 }
0x231c   :  { %v2612_v35 = vpop.f32.mrb[21].mxu0 }
0x231d   :  { %v2615_v7 = vadd.f32 %v8415_v63, %v2612_v35 }
0x231f   :  { %v2623_v40 = vrot.slane %v2615_v7, %v8035_v39 }
0x2321   :  { %v2624_v41 = vcombine.high %v2623_v40, %v2623_v40  ;;  %v2631_v2 = vrot.slane %v2623_v40, %v8035_v39 }
0x2323   :  { %v2638_v42 = vrot.slane %v2624_v41, %v8035_v39  ;;  %v2642_v50 = vrot.slane %v2631_v2, %v8039_v43 }
0x2325   :  { %v2646_v44 = vrot.slane %v2638_v42, %v8039_v43  ;;  %v2649_v55 = vadd.f32 %v2642_v50, %v8029_v30 }
0x2327   :  { %v2650_v16 = vadd.f32 %v2646_v44, %v8046_v48  ;;  %7071 = vtanh.f32 %v2649_v55 }
0x2329   :  { %7073 = vtanh.f32 %v2650_v16 }
0x2331   :  { %v7072_v27 = vpop.eup %7071 }
0x2332   :  { %v2653_v31 = vmul.f32 %v8425_v19, %v7072_v27 }
0x2333   :  { %v7074_v62 = vpop.eup %7073 }
0x2334   :  { %v2655_v57 = vsel %vm480_vm2, %v2653_v31, 0.0  ;;  %v2654_v58 = vmul.f32 %v8425_v19, %v7074_v62 }
0x2335   :  { %2656 = vadd.xlane.f32.xlu0 %v2655_v57 }
0x2336   :  { %v2658_v59 = vsel %vm480_vm2, %v2654_v58, 0.0 }
0x2337   :  { %2659 = vadd.xlane.f32.xlu1 %v2658_v59 }
0x23c2   :  { %v2657_v8 = vpop.xlane.xlu0 %2656 }
0x23c3   :  { %v2666_v37 = vrot.slane %v2657_v8, %v8057_v61 }
0x23c4   :  { %v2660_v60 = vpop.xlane.xlu1 %2659 }
0x23c5   :  { %v2670_v56 = vrot.slane %v2660_v60, %v8057_v61 }
0x23c7   :  { %v2671_v28 = vsel %vm499_vm3, %v2670_v56, %v2666_v37 }
0x23c8   :  { %v2673_v34 = vsel %vm502_vm4, %v2671_v28, -inf }
0x23c9   :  { %2674 = vmax.xlane.f32.xlu0 %v2673_v34 }
0x2456   :  { %v2675_v3 = vpop.xlane.xlu0 %2674 }
0x2457   :  { %v2680_v11 = vrot.slane %v2675_v3, %v8039_v43  ;;  %v2684_v51 = vrot.slane %v2675_v3, %v8065_v6 }
0x2459   :  { %v2687_v47 = vsub.f32 %v2657_v8, %v2680_v11  ;;  %v2688_v12 = vsub.f32 %v2660_v60, %v2684_v51 }
0x245b   :  { %v2689_v32 = vmul.f32 1.442695, %v2687_v47  ;;  %v2691_v21 = vmul.f32 1.442695, %v2688_v12 }
0x245d   :  { %7075 = vpow2.f32 %v2689_v32 }
0x245e   :  { %7077 = vpow2.f32 %v2691_v21 }
0x2467   :  { %v7076_v24 = vpop.eup %7075 }
0x2468   :  { %v7078_v52 = vpop.eup %7077  ;;  %2696 = vperm.xlu0 %6955, %v7076_v24  }
0x2469   :  { %2699 = vperm.xlu1 %6954, %v7078_v52  }
0x246c   :  { %2729 = vrot.lane.b32.xlu0 %v8437_v20, %s7680_s28 }
0x2470   :  { %2731 = vrot.lane.b32.xlu0 %v8444_v0, %s7680_s28 }
0x24e7   :  { %v2697_v33 = vpop.permute.xlu0 %2696 }
0x24e8   :  { %v2700_v45 = vpop.permute.xlu1 %2699  ;;  %v2704_v35 = vrot.slane %v2697_v33, %v8057_v61 }
0x24e9   :  { %v2708_v7 = vrot.slane %v2700_v45, %v8057_v61 }
0x24eb   :  { %v2709_v40 = vsel %vm499_vm3, %v2708_v7, %v2704_v35  ;;  %v2730_v44 = vpop.permute.xlu0 %2729 }
0x24ec   :  { %v2711_v41 = vsel %vm502_vm4, %v2709_v40, 0.0 }
0x24ed   :  { %2712 = vadd.xlane.f32.xlu1 %v2711_v41 }
0x24ef   :  { %v2732_v57 = vpop.permute.xlu0 %2731 }
0x257a   :  { %v2713_v2 = vpop.xlane.xlu1 %2712 }
0x257b   :  { %v2718_v42 = vrot.slane %v2713_v2, %v8039_v43  ;;  %v2722_v50 = vrot.slane %v2713_v2, %v8065_v6 }
0x257d   :  { %7079 = vrcp.f32 %v2718_v42 }
0x257e   :  { %7081 = vrcp.f32 %v2722_v50 }
0x2587   :  { %v7080_v55 = vpop.eup %7079 }
0x2588   :  { %v7082_v16 = vpop.eup %7081  ;;  %v2726_v27 = vmul.f32 %v7080_v55, %v7076_v24 }
0x2589   :  { %v2728_v62 = vmul.f32 %v7082_v16, %v7078_v52 }
0x258a   :  { %v2735_v31 = vmul.f32 %v2730_v44, %v2726_v27 }
0x258b   :  { %v2736_v58 = vmul.f32 %v2732_v57, %v2728_v62 }
0x258c   :  { %2740 = vperm.xlu0 %6955, %v2735_v31  }
0x2590   :  { %2743 = vperm.xlu0 %6955, %v2736_v58  }
0x260b   :  { %v2741_v59 = vpop.permute.xlu0 %2740 }
0x260c   :  { %v2748_v60 = vrot.slane %v2741_v59, %v8057_v61 }
0x260f   :  { %v2744_v8 = vpop.permute.xlu0 %2743 }
0x2610   :  { %v2752_v37 = vrot.slane %v2744_v8, %v8057_v61 }
0x2612   :  { %v2753_v56 = vsel %vm499_vm3, %v2752_v37, %v2748_v60 }
0x2613   :  { %6532 = vmatmul.mubr.msk.f32.vlgmr.msra.gmra.mrb[12].mxu1 %vm578_vm6, %v2753_v56 }
0x2614   :  { %6724 = vmatpush3.bf16.msra.mxu1 %v8100_v14  ;;  %6542 = vmatprep.mubr.msk.f32.mxu1 %vm7671_vm0, %v7670_v1 }
0x2615   :  { %6725 = vmatprep.subr.bf16.mxu1 %v7675_v13 }
0x2618   :  { %6727 = vmatpush3.bf16.msra.mxu1 %v8103_v18 }
0x2619   :  { %6729 = vmatprep.subr.bf16.mxu1 %v7992_v5 }
0x26e6   :  { %v2822_v28 = vpop.f32.mrb[12].mxu1 }
0x26e7   :  { %v2823_v34 = vadd.f32 %v2822_v28, %v8517_v53  ;;  %v6533_v3 = vpop.f32.mrb[13].mxu1 }
0x26e9   :  { %v2826_v11 = vadd.f32 %v8460_v36, %v2823_v34 }
0x26eb   :  { %7083 = vtanh.f32 %v2826_v11  ;;  %v6340_v47 = vmul.f32 -1.442695, %v2826_v11 }
0x26ed   :  { %7085 = vpow2.f32 %v6340_v47 }
0x26f5   :  { %v7084_v51 = vpop.eup %7083 }
0x26f6   :  { %2836 = vrot.lane.b32.xlu0 %v7084_v51, %s7674_s15 }
0x26f7   :  { %v7086_v12 = vpop.eup %7085 }
0x26f8   :  { %v2830_v32 = vadd.f32 1.0, %v7086_v12 }
0x26fa   :  { %7087 = vrcp.f32 %v2830_v32 }
0x2704   :  { %v7088_v21 = vpop.eup %7087 }
0x2705   :  { %v2834_v33 = vmul.f32 %v7088_v21, %v8466_v23 }
0x2768   :  { %v2837_v24 = vpop.permute.xlu0 %2836 }
0x2769   :  { %v2839_v52 = vmul.f32 %v7088_v21, %v2837_v24 }
0x276b   :  { %2841 = vrot.lane.b32.xlu0 %v2839_v52, %s7674_s15 }
0x27dd   :  { %v2842_v53 = vpop.permute.xlu0 %2841 }
0x27de   :  { %v8560_v45 = vadd.f32 %v2842_v53, %v2834_v33 }
0x27e0   :  { %7089 = vtanh.f32 %v8560_v45 }
0x27ea   :  { %v7090_v35 = vpop.eup %7089 }
0x27eb   :  { %2847 = vrot.lane.b32.xlu0 %v7090_v35, %s7674_s15 }
0x285d   :  { %v2848_v7 = vpop.permute.xlu0 %2847 }
0x285e   :  { %v2850_v40 = vmul.f32 %v7088_v21, %v2848_v7 }
0x2860   :  { %2874 = vrot.lane.b32.xlu0 %v2850_v40, %s7657_s14  ;;  %v2858_v41 = vrot.slane %v2850_v40, %v8035_v39 }
0x2862   :  { %v2859_v2 = vcombine.high %v2858_v41, %v2858_v41  ;;  %v2866_v42 = vrot.slane %v2858_v41, %v8035_v39 }
0x2864   :  { %v2873_v23 = vrot.slane %v2859_v2, %v8035_v39  ;;  %v3878_v50 = vrot.slane %v2866_v42, %v8039_v43 }
0x2866   :  { %v3882_v44 = vrot.slane %v2873_v23, %v8039_v43  ;;  %v8572_v55 = vsel %vm3916_vm12, %v8478_v38, %v3878_v50 }
0x2868   :  { %v8576_v16 = vsel %vm3916_vm12, %v8482_v22, %v3882_v44 }
0x28d2   :  { %v2875_v27 = vpop.permute.xlu0 %2874 }
0x28d3   :  { %6543 = vmatmul.mubr.msk.f32.vlgmr.msra.gmra.mrb[14].mxu1 %vm713_vm7, %v2875_v27  ;;  %v2972_v38 = vsel %vm713_vm7, %v2875_v27, %v8560_v45 }
0x28d4   :  { %6731 = vmatpush1.bf16.msra.mxu1 %v7994_v9  ;;  %3040 = vmatprep.mubr.f32.mxu1 %v7670_v1 }
0x28d5   :  { %6733 = vmatprep.subr.bf16.mxu1 %v7996_v10 }
0x28d8   :  { %6735 = vmatpush1.bf16.msra.mxu1 %v8000_v15 }
0x28d9   :  { %6737 = vmatprep.subr.bf16.mxu1 %v8003_v17 }
0x28dc   :  { %6739 = vmatpush1.bf16.msra.mxu1 %v8013_v25 }
0x28dd   :  { %6741 = vmatprep.subr.bf16.mxu1 %v8016_v26 }
0x28e0   :  { %6743 = vmatpush1.bf16.msra.mxu1 %v8021_v29 }
0x28e1   :  { %6561 = vmatprep.subr.mxu1 %v7670_v1 }
0x28e3   :  { %6342 = vmatmul.mubr.msk.f32.vlgmr.msra.gmra.mrb[16].mxu1 %vm353_vm8, %v2972_v38 }
0x28e4   :  { %6562 = vmatpush3.msk.msra.mxu1 %vm581_vm5, %v8497_v54  ;;  %6563 = vmatprep.mubr.msk.f32.mxu1 %vm7671_vm0, %v7670_v1 }
0x28e5   :  { %6766 = vmatprep.subr.bf16.mxu1 %v7675_v13 }
0x29a6   :  { %v2944_v22 = vpop.f32.mrb[14].mxu1 }
0x29a7   :  { %v2955_v31 = vrot.slane %v2944_v22, %v8035_v39  ;;  %v6544_v62 = vpop.f32.mrb[15].mxu1 }
0x29a9   :  { %v2956_v57 = vcombine.high %v2955_v31, %v2955_v31  ;;  %v2963_v58 = vrot.slane %v2955_v31, %v8035_v39 }
0x29ab   :  { %v2970_v59 = vrot.slane %v2956_v57, %v8035_v39  ;;  %v3968_v8 = vrot.slane %v2963_v58, %v8039_v43 }
0x29ad   :  { %v3972_v60 = vrot.slane %v2970_v59, %v8039_v43  ;;  %v8603_v54 = vsel %vm3916_vm12, %v8511_v46, %v3968_v8 }
0x29af   :  { %v8607_v37 = vsel %vm3916_vm12, %v8515_v49, %v3972_v60 }
0x29b6   :  { %v8609_v56 = vpop.f32.mrb[16].mxu1 }
0x29b7   :  { %v3044_v28 = vpop.f32.mrb[17].mxu1 }
0x29b8   :  { %v3047_v34 = vadd.f32 %v8415_v63, %v3044_v28 }
0x29ba   :  { %v3055_v3 = vrot.slane %v3047_v34, %v8035_v39 }
0x29bc   :  { %v3056_v11 = vcombine.high %v3055_v3, %v3055_v3  ;;  %v3063_v51 = vrot.slane %v3055_v3, %v8035_v39 }
0x29be   :  { %v3070_v47 = vrot.slane %v3056_v11, %v8035_v39  ;;  %v3074_v12 = vrot.slane %v3063_v51, %v8039_v43 }
0x29c0   :  { %v3078_v46 = vrot.slane %v3070_v47, %v8039_v43  ;;  %v3081_v32 = vadd.f32 %v3074_v12, %v8029_v30 }
0x29c2   :  { %v3082_v49 = vadd.f32 %v3078_v46, %v8046_v48  ;;  %7091 = vtanh.f32 %v3081_v32 }
0x29c4   :  { %7093 = vtanh.f32 %v3082_v49 }
0x29cc   :  { %v7092_v21 = vpop.eup %7091 }
0x29cd   :  { %v3085_v24 = vmul.f32 %v8425_v19, %v7092_v21 }
0x29ce   :  { %v7094_v52 = vpop.eup %7093 }
0x29cf   :  { %v3087_v33 = vsel %vm480_vm2, %v3085_v24, 0.0  ;;  %v3086_v53 = vmul.f32 %v8425_v19, %v7094_v52 }
0x29d0   :  { %3088 = vadd.xlane.f32.xlu0 %v3087_v33 }
0x29d1   :  { %v3090_v35 = vsel %vm480_vm2, %v3086_v53, 0.0 }
0x29d2   :  { %3091 = vadd.xlane.f32.xlu1 %v3090_v35 }
0x2a5d   :  { %v3089_v7 = vpop.xlane.xlu0 %3088 }
0x2a5e   :  { %v3098_v41 = vrot.slane %v3089_v7, %v8057_v61 }
0x2a5f   :  { %v3092_v40 = vpop.xlane.xlu1 %3091 }
0x2a60   :  { %v3102_v2 = vrot.slane %v3092_v40, %v8057_v61 }
0x2a62   :  { %v3103_v42 = vsel %vm499_vm3, %v3102_v2, %v3098_v41 }
0x2a63   :  { %v3105_v23 = vsel %vm502_vm4, %v3103_v42, -inf }
0x2a64   :  { %3106 = vmax.xlane.f32.xlu1 %v3105_v23 }
0x2af1   :  { %v3107_v50 = vpop.xlane.xlu1 %3106 }
0x2af2   :  { %v3112_v44 = vrot.slane %v3107_v50, %v8039_v43  ;;  %v3116_v27 = vrot.slane %v3107_v50, %v8065_v6 }
0x2af4   :  { %v3119_v38 = vsub.f32 %v3089_v7, %v3112_v44  ;;  %v3120_v22 = vsub.f32 %v3092_v40, %v3116_v27 }
0x2af6   :  { %v3121_v31 = vmul.f32 1.442695, %v3119_v38  ;;  %v3123_v62 = vmul.f32 1.442695, %v3120_v22 }
0x2af8   :  { %7095 = vpow2.f32 %v3121_v31 }
0x2af9   :  { %7097 = vpow2.f32 %v3123_v62 }
0x2b02   :  { %v7096_v57 = vpop.eup %7095 }
0x2b03   :  { %3128 = vperm.xlu1 %6954, %v7096_v57   ;;  %v7098_v58 = vpop.eup %7097 }
0x2b07   :  { %3131 = vperm.xlu1 %6954, %v7098_v58  }
0x2b0b   :  { %3161 = vrot.lane.b32.xlu1 %v8437_v20, %s7681_s7 }
0x2b82   :  { %v3129_v59 = vpop.permute.xlu1 %3128 }
0x2b83   :  { %v3136_v60 = vrot.slane %v3129_v59, %v8057_v61 }
0x2b86   :  { %v3132_v8 = vpop.permute.xlu1 %3131 }
0x2b87   :  { %v3140_v28 = vrot.slane %v3132_v8, %v8057_v61 }
0x2b89   :  { %v3141_v34 = vsel %vm499_vm3, %v3140_v28, %v3136_v60 }
0x2b8a   :  { %v3143_v3 = vsel %vm502_vm4, %v3141_v34, 0.0  ;;  %v3162_v46 = vpop.permute.xlu1 %3161 }
0x2b8b   :  { %3144 = vadd.xlane.f32.xlu0 %v3143_v3 }
0x2ba1   :  { %3163 = vrot.lane.b32.xlu0 %v8444_v0, %s7681_s7 }
0x2c18   :  { %v3145_v11 = vpop.xlane.xlu0 %3144 }
0x2c19   :  { %v3150_v51 = vrot.slane %v3145_v11, %v8039_v43  ;;  %v3154_v47 = vrot.slane %v3145_v11, %v8065_v6 }
0x2c1b   :  { %7099 = vrcp.f32 %v3150_v51 }
0x2c1c   :  { %7101 = vrcp.f32 %v3154_v47  ;;  %v3164_v52 = vpop.permute.xlu0 %3163 }
0x2c25   :  { %v7100_v12 = vpop.eup %7099 }
0x2c26   :  { %v7102_v32 = vpop.eup %7101  ;;  %v3158_v49 = vmul.f32 %v7100_v12, %v7096_v57 }
0x2c27   :  { %v3160_v21 = vmul.f32 %v7102_v32, %v7098_v58 }
0x2c28   :  { %v3167_v24 = vmul.f32 %v3162_v46, %v3158_v49 }
0x2c29   :  { %v3168_v33 = vmul.f32 %v3164_v52, %v3160_v21 }
0x2c2a   :  { %3172 = vperm.xlu1 %6954, %v3167_v24  }
0x2c2e   :  { %3175 = vperm.xlu1 %6954, %v3168_v33  }
0x2ca9   :  { %v3173_v53 = vpop.permute.xlu1 %3172 }
0x2caa   :  { %v3180_v7 = vrot.slane %v3173_v53, %v8057_v61 }
0x2cad   :  { %v3176_v35 = vpop.permute.xlu1 %3175 }
0x2cae   :  { %v3184_v40 = vrot.slane %v3176_v35, %v8057_v61 }
0x2cb0   :  { %v3185_v41 = vsel %vm499_vm3, %v3184_v40, %v3180_v7 }
0x2cb1   :  { %6548 = vmatmul.mubr.msk.f32.vlgmr.msra.gmra.mrb[22].mxu0 %vm578_vm6, %v3185_v41 }
0x2cb2   :  { %6746 = vmatpush3.bf16.msra.mxu0 %v8100_v14  ;;  %6558 = vmatprep.mubr.msk.f32.mxu0 %vm7671_vm0, %v7670_v1 }
0x2cb3   :  { %6747 = vmatprep.subr.bf16.mxu0 %v7675_v13 }
0x2cb6   :  { %6749 = vmatpush3.bf16.msra.mxu0 %v8103_v18 }
0x2cb7   :  { %6751 = vmatprep.subr.bf16.mxu0 %v7992_v5 }
0x2d84   :  { %v3254_v2 = vpop.f32.mrb[22].mxu0 }
0x2d85   :  { %v3255_v42 = vadd.f32 %v3254_v2, %v8609_v56  ;;  %v6549_v23 = vpop.f32.mrb[23].mxu0 }
0x2d87   :  { %v3258_v50 = vadd.f32 %v8460_v36, %v3255_v42 }
0x2d89   :  { %7103 = vtanh.f32 %v3258_v50  ;;  %v6345_v27 = vmul.f32 -1.442695, %v3258_v50 }
0x2d8b   :  { %7105 = vpow2.f32 %v6345_v27 }
0x2d93   :  { %v7104_v44 = vpop.eup %7103 }
0x2d94   :  { %3268 = vrot.lane.b32.xlu1 %v7104_v44, %s7674_s15 }
0x2d95   :  { %v7106_v38 = vpop.eup %7105 }
0x2d96   :  { %v3262_v22 = vadd.f32 1.0, %v7106_v38 }
0x2d98   :  { %7107 = vrcp.f32 %v3262_v22 }
0x2da2   :  { %v7108_v31 = vpop.eup %7107 }
0x2da3   :  { %v3266_v5 = vmul.f32 %v7108_v31, %v8560_v45 }
0x2e06   :  { %v3269_v62 = vpop.permute.xlu1 %3268 }
0x2e07   :  { %v3271_v57 = vmul.f32 %v7108_v31, %v3269_v62 }
0x2e09   :  { %3273 = vrot.lane.b32.xlu1 %v3271_v57, %s7674_s15 }
0x2e7b   :  { %v3274_v56 = vpop.permute.xlu1 %3273 }
0x2e7c   :  { %v8652_v58 = vadd.f32 %v3274_v56, %v3266_v5 }
0x2e7e   :  { %7109 = vtanh.f32 %v8652_v58 }
0x2e88   :  { %v7110_v59 = vpop.eup %7109 }
0x2e89   :  { %3279 = vrot.lane.b32.xlu1 %v7110_v59, %s7674_s15 }
0x2efb   :  { %v3280_v8 = vpop.permute.xlu1 %3279 }
0x2efc   :  { %v3282_v60 = vmul.f32 %v7108_v31, %v3280_v8 }
0x2efe   :  { %3306 = vrot.lane.b32.xlu1 %v3282_v60, %s7657_s14  ;;  %v3290_v28 = vrot.slane %v3282_v60, %v8035_v39 }
0x2f00   :  { %v3291_v34 = vcombine.high %v3290_v28, %v3290_v28  ;;  %v3298_v3 = vrot.slane %v3290_v28, %v8035_v39 }
0x2f02   :  { %v3305_v45 = vrot.slane %v3291_v34, %v8035_v39  ;;  %v3888_v11 = vrot.slane %v3298_v3, %v8039_v43 }
0x2f04   :  { %v3892_v51 = vrot.slane %v3305_v45, %v8039_v43  ;;  %v8664_v47 = vsel %vm3919_vm13, %v8572_v55, %v3888_v11 }
0x2f06   :  { %v8668_v12 = vsel %vm3919_vm13, %v8576_v16, %v3892_v51 }
0x2f70   :  { %v3307_v46 = vpop.permute.xlu1 %3306 }
0x2f71   :  { %6559 = vmatmul.mubr.msk.f32.vlgmr.msra.gmra.mrb[24].mxu0 %vm713_vm7, %v3307_v46  ;;  %v3404_v55 = vsel %vm713_vm7, %v3307_v46, %v8652_v58 }
0x2f72   :  { %6753 = vmatpush1.bf16.msra.mxu0 %v7994_v9  ;;  %3472 = vmatprep.mubr.f32.mxu0 %v7670_v1 }
0x2f73   :  { %6755 = vmatprep.subr.bf16.mxu0 %v7996_v10 }
0x2f76   :  { %6757 = vmatpush1.bf16.msra.mxu0 %v8000_v15 }
0x2f77   :  { %6759 = vmatprep.subr.bf16.mxu0 %v8003_v17 }
0x2f7a   :  { %6761 = vmatpush1.bf16.msra.mxu0 %v8013_v25 }
0x2f7b   :  { %6763 = vmatprep.subr.bf16.mxu0 %v8016_v26 }
0x2f7e   :  { %6765 = vmatpush1.bf16.msra.mxu0 %v8021_v29 }
0x2f81   :  { %6347 = vmatmul.mubr.msk.f32.vlgmr.msra.gmra.mrb[26].mxu0 %vm353_vm8, %v3404_v55 }
0x2f82   :  { %4401 = vmatprep.mubr.f32.mxu0 %v7670_v1 }
0x3044   :  { %v3376_v9 = vpop.f32.mrb[24].mxu0 }
0x3045   :  { %v3387_v10 = vrot.slane %v3376_v9, %v8035_v39  ;;  %v6560_v16 = vpop.f32.mrb[25].mxu0 }
0x3047   :  { %v3388_v15 = vcombine.high %v3387_v10, %v3387_v10  ;;  %v3395_v17 = vrot.slane %v3387_v10, %v8035_v39 }
0x3049   :  { %v3402_v25 = vrot.slane %v3388_v15, %v8035_v39  ;;  %v3978_v26 = vrot.slane %v3395_v17, %v8039_v43 }
0x304b   :  { %v3982_v29 = vrot.slane %v3402_v25, %v8039_v43  ;;  %v8690_v32 = vsel %vm3919_vm13, %v8603_v54, %v3978_v26 }
0x304d   :  { %v8694_v49 = vsel %vm3919_vm13, %v8607_v37, %v3982_v29 }
0x3054   :  { %v8696_v21 = vpop.f32.mrb[26].mxu0 }
0x3055   :  { %v3476_v24 = vpop.f32.mrb[27].mxu0 }
0x3056   :  { %v3479_v52 = vadd.f32 %v8415_v63, %v3476_v24 }
0x3058   :  { %v3487_v33 = vrot.slane %v3479_v52, %v8035_v39 }
0x305a   :  { %v3488_v53 = vcombine.high %v3487_v33, %v3487_v33  ;;  %v3495_v35 = vrot.slane %v3487_v33, %v8035_v39 }
0x305c   :  { %v3502_v7 = vrot.slane %v3488_v53, %v8035_v39  ;;  %v3506_v40 = vrot.slane %v3495_v35, %v8039_v43 }
0x305e   :  { %v3510_v54 = vrot.slane %v3502_v7, %v8039_v43  ;;  %v3513_v41 = vadd.f32 %v3506_v40, %v8029_v30 }
0x3060   :  { %v3514_v37 = vadd.f32 %v3510_v54, %v8046_v48  ;;  %7111 = vtanh.f32 %v3513_v41 }
0x3062   :  { %7113 = vtanh.f32 %v3514_v37 }
0x306a   :  { %v7112_v2 = vpop.eup %7111 }
0x306b   :  { %v3517_v63 = vmul.f32 %v8425_v19, %v7112_v2 }
0x306c   :  { %v7114_v42 = vpop.eup %7113 }
0x306d   :  { %v3519_v23 = vsel %vm480_vm2, %v3517_v63, 0.0  ;;  %v3518_v50 = vmul.f32 %v8425_v19, %v7114_v42 }
0x306e   :  { %3520 = vadd.xlane.f32.xlu0 %v3519_v23 }
0x306f   :  { %v3522_v44 = vsel %vm480_vm2, %v3518_v50, 0.0  ;;  %vm4273_vm2 = vcmask 254976  }
0x3070   :  { %3523 = vadd.xlane.f32.xlu1 %v3522_v44 }
0x30fb   :  { %v3521_v27 = vpop.xlane.xlu0 %3520 }
0x30fc   :  { %v3530_v30 = vrot.slane %v3521_v27, %v8057_v61 }
0x30fd   :  { %v3524_v38 = vpop.xlane.xlu1 %3523 }
0x30fe   :  { %v3534_v48 = vrot.slane %v3524_v38, %v8057_v61 }
0x3100   :  { %v3535_v22 = vsel %vm499_vm3, %v3534_v48, %v3530_v30  ;;  %v4011_v48 = vld [vmem:[%s9389_s9 + $0x10] sm:$0xff] }
0x3101   :  { %v3537_v31 = vsel %vm502_vm4, %v3535_v22, -inf }
0x3102   :  { %3538 = vmax.xlane.f32.xlu0 %v3537_v31  ;;  %v4014_v31 = vld [vmem:[%s9389_s9 + $0x28] sm:$0xff] }
0x318f   :  { %v3539_v62 = vpop.xlane.xlu0 %3538 }
0x3190   :  { %v3544_v57 = vrot.slane %v3539_v62, %v8039_v43  ;;  %v3548_v19 = vrot.slane %v3539_v62, %v8065_v6  ;;  %v4016_v62 = vld [vmem:[%s9389_s9 + $0x38] sm:$0xff] }
0x3192   :  { %v3551_v5 = vsub.f32 %v3521_v27, %v3544_v57  ;;  %v3552_v56 = vsub.f32 %v3524_v38, %v3548_v19  ;;  %v4012_v27 = vld [vmem:[%s9389_s9 + $0x18] sm:$0xff]  ;;  %v8764_v57 = vpack.c.bf16 %v4016_v62, %v4014_v31  ;;  %v4013_v19 = vld [vmem:[%s9389_s9 + $0x20] sm:$0xff] }
0x3194   :  { %v3553_v59 = vmul.f32 1.442695, %v3551_v5  ;;  %v3555_v8 = vmul.f32 1.442695, %v3552_v56  ;;  %v4015_v5 = vld [vmem:[%s9389_s9 + $0x30] sm:$0xff] }
0x3195   :  { %v8772_v56 = vpack.c.bf16 %v4015_v5, %v4013_v19 }
0x3196   :  { %7115 = vpow2.f32 %v3553_v59  ;;  %v4018_v59 = vld [vmem:[%s9389_s9 + $0x48] sm:$0xff] }
0x3197   :  { %7117 = vpow2.f32 %v3555_v8  ;;  %v4020_v8 = vld [vmem:[%s9389_s9 + $0x58] sm:$0xff] }
0x31a0   :  { %v7116_v60 = vpop.eup %7115 }
0x31a1   :  { %v7118_v28 = vpop.eup %7117  ;;  %3560 = vperm.xlu0 %6955, %v7116_v60  }
0x31a2   :  { %3563 = vperm.xlu1 %6954, %v7118_v28  }
0x31a5   :  { %3593 = vrot.lane.b32.xlu0 %v8437_v20, %s7682_s1 }
0x31a9   :  { %3595 = vrot.lane.b32.xlu0 %v8444_v0, %s7682_s1 }
0x3220   :  { %v3561_v34 = vpop.permute.xlu0 %3560 }
0x3221   :  { %v3564_v3 = vpop.permute.xlu1 %3563  ;;  %v3568_v45 = vrot.slane %v3561_v34, %v8057_v61  ;;  %v4019_v34 = vld [vmem:[%s9389_s9 + $0x50] sm:$0xff] }
0x3222   :  { %v3572_v11 = vrot.slane %v3564_v3, %v8057_v61 }
0x3224   :  { %v3573_v51 = vsel %vm499_vm3, %v3572_v11, %v3568_v45  ;;  %v3594_v20 = vpop.permute.xlu0 %3593  ;;  %v4022_v45 = vld [vmem:[%s9389_s9 + $0x68] sm:$0xff]  ;;  %v4024_v11 = vld [vmem:[%s9389_s9 + $0x78] sm:$0xff] }
0x3225   :  { %v3575_v46 = vsel %vm502_vm4, %v3573_v51, 0.0 }
0x3226   :  { %3576 = vadd.xlane.f32.xlu1 %v3575_v46  ;;  %v8800_v46 = vpack.c.bf16 %v4024_v11, %v4022_v45 }
0x3228   :  { %v3596_v26 = vpop.permute.xlu0 %3595 }
0x32b3   :  { %v3577_v55 = vpop.xlane.xlu1 %3576 }
0x32b4   :  { %v3582_v9 = vrot.slane %v3577_v55, %v8039_v43  ;;  %v3586_v10 = vrot.slane %v3577_v55, %v8065_v6  ;;  %v4021_v55 = vld [vmem:[%s9389_s9 + $0x60] sm:$0xff] }
0x32b6   :  { %7119 = vrcp.f32 %v3582_v9  ;;  %v4023_v9 = vld [vmem:[%s9389_s9 + $0x70] sm:$0xff] }
0x32b7   :  { %7121 = vrcp.f32 %v3586_v10 }
0x32c0   :  { %v7120_v0 = vpop.eup %7119 }
0x32c1   :  { %v7122_v16 = vpop.eup %7121  ;;  %v3590_v15 = vmul.f32 %v7120_v0, %v7116_v60  ;;  %v8782_v60 = vpack.c.bf16 %v4020_v8, %v4018_v59 }
0x32c2   :  { %v3592_v25 = vmul.f32 %v7122_v16, %v7118_v28  ;;  %v4017_v28 = vld [vmem:[%s9389_s9 + $0x40] sm:$0xff] }
0x32c3   :  { %v3599_v17 = vmul.f32 %v3594_v20, %v3590_v15  ;;  %v8790_v3 = vpack.c.bf16 %v4019_v34, %v4017_v28  ;;  %v8808_v20 = vpack.c.bf16 %v4023_v9, %v4021_v55 }
0x32c4   :  { %v3600_v29 = vmul.f32 %v3596_v26, %v3592_v25 }
0x32c5   :  { %3604 = vperm.xlu0 %6955, %v3599_v17  }
0x32c9   :  { %3607 = vperm.xlu0 %6955, %v3600_v29  }
0x3344   :  { %v3605_v24 = vpop.permute.xlu0 %3604 }
0x3345   :  { %v3612_v33 = vrot.slane %v3605_v24, %v8057_v61 }
0x3348   :  { %v3608_v52 = vpop.permute.xlu0 %3607 }
0x3349   :  { %v3616_v53 = vrot.slane %v3608_v52, %v8057_v61 }
0x334b   :  { %v3617_v35 = vsel %vm499_vm3, %v3616_v53, %v3612_v33 }
0x334c   :  { %6564 = vmatmul.mubr.msk.f32.vlgmr.msra.gmra.mrb[18].mxu1 %vm578_vm6, %v3617_v35 }
0x334d   :  { %6768 = vmatpush3.bf16.msra.mxu1 %v8100_v14  ;;  %6574 = vmatprep.mubr.msk.f32.mxu1 %vm7671_vm0, %v7670_v1 }
0x334e   :  { %6769 = vmatprep.subr.bf16.mxu1 %v7675_v13 }
0x3351   :  { %6771 = vmatpush3.bf16.msra.mxu1 %v8103_v18 }
0x341f   :  { %v3686_v7 = vpop.f32.mrb[18].mxu1 }
0x3420   :  { %v3687_v40 = vadd.f32 %v3686_v7, %v8696_v21  ;;  %v6565_v54 = vpop.f32.mrb[19].mxu1 }
0x3422   :  { %v3690_v41 = vadd.f32 %v8460_v36, %v3687_v40  ;;  %v4010_v36 = vld [vmem:[%s9389_s9 + $0x8] sm:$0xff] }
0x3423   :  { %v8744_v38 = vpack.c.bf16 %v4012_v27, %v4010_v36  ;;  %v8872_v27 = vld [vmem:[#allocation19] ss:$0 sm:$0xff] }
0x3424   :  { %7123 = vtanh.f32 %v3690_v41  ;;  %v6350_v2 = vmul.f32 -1.442695, %v3690_v41 }
0x3425   :  { %6773 = vmatprep.subr.bf16.mxu1 %v8744_v38  ;;  %6789 = vmatprep.subr.bf16.mxu0 %v8744_v38 }
0x3426   :  { %7125 = vpow2.f32 %v6350_v2  ;;  %v8860_v2 = vld [vmem:[#allocation17] ss:$0 sm:$0xff] }
0x342e   :  { %v7124_v37 = vpop.eup %7123 }
0x342f   :  { %3700 = vrot.lane.b32.xlu0 %v7124_v37, %s7674_s15 }
0x3430   :  { %v7126_v14 = vpop.eup %7125 }
0x3431   :  { %v3694_v63 = vadd.f32 1.0, %v7126_v14 }
0x3433   :  { %7127 = vrcp.f32 %v3694_v63 }
0x343d   :  { %v7128_v42 = vpop.eup %7127 }
0x343e   :  { %v3698_v18 = vmul.f32 %v7128_v42, %v8652_v58  ;;  %v4009_v58 = vld [vmem:[%s9389_s9] sm:$0xff] }
0x343f   :  { %v8755_v22 = vpack.c.bf16 %v4011_v48, %v4009_v58 }
0x3441   :  { %6791 = vmatpush1.bf16.msra.mxu0 %v8755_v22 }
0x3442   :  { %6793 = vmatprep.subr.bf16.mxu0 %v8764_v57 }
0x3445   :  { %6795 = vmatpush1.bf16.msra.mxu0 %v8772_v56 }
0x3446   :  { %6797 = vmatprep.subr.bf16.mxu0 %v8782_v60 }
0x3449   :  { %6799 = vmatpush1.bf16.msra.mxu0 %v8790_v3 }
0x344a   :  { %6801 = vmatprep.subr.bf16.mxu0 %v8800_v46 }
0x344d   :  { %6803 = vmatpush1.bf16.msra.mxu0 %v8808_v20 }
0x344e   :  { %6821 = vmatprep.subr.bf16.mxu0 %v8744_v38 }
0x34a1   :  { %v3701_v23 = vpop.permute.xlu0 %3700 }
0x34a2   :  { %v3703_v50 = vmul.f32 %v7128_v42, %v3701_v23 }
0x34a4   :  { %3705 = vrot.lane.b32.xlu0 %v3703_v50, %s7674_s15 }
0x3516   :  { %v3706_v21 = vpop.permute.xlu0 %3705 }
0x3517   :  { %v3708_v44 = vadd.f32 %v3706_v21, %v3698_v18 }
0x3519   :  { %7129 = vtanh.f32 %v3708_v44 }
0x3523   :  { %v7130_v30 = vpop.eup %7129 }
0x3524   :  { %3711 = vrot.lane.b32.xlu0 %v7130_v30, %s7674_s15 }
0x3596   :  { %v3712_v51 = vpop.permute.xlu0 %3711 }
0x3597   :  { %v3714_v10 = vmul.f32 %v7128_v42, %v3712_v51 }
0x3599   :  { %v3722_v0 = vrot.slane %v3714_v10, %v8035_v39  ;;  %3738 = vrot.lane.b32.xlu0 %v3714_v10, %s7657_s14 }
0x359b   :  { %v3723_v16 = vcombine.high %v3722_v0, %v3722_v0  ;;  %v3730_v15 = vrot.slane %v3722_v0, %v8035_v39 }
0x359d   :  { %v3737_v17 = vrot.slane %v3723_v16, %v8035_v39  ;;  %v3898_v25 = vrot.slane %v3730_v15, %v8039_v43 }
0x359f   :  { %v3902_v26 = vrot.slane %v3737_v17, %v8039_v43  ;;  %v8821_v29 = vsel %vm3922_vm14, %v8664_v47, %v3898_v25 }
0x35a1   :  { %v8825_v24 = vsel %vm3922_vm14, %v8668_v12, %v3902_v26 }
0x360b   :  { %v3739_v52 = vpop.permute.xlu0 %3738 }
0x360c   :  { %6575 = vmatmul.mubr.msk.f32.vlgmr.msra.gmra.mrb[20].mxu1 %vm713_vm7, %v3739_v52 }
0x360d   :  { %6775 = vmatpush1.bf16.msra.mxu1 %v8755_v22  ;;  %4095 = vmatprep.mubr.f32.mxu1 %v7670_v1 }
0x360e   :  { %6777 = vmatprep.subr.bf16.mxu1 %v8764_v57 }
0x3611   :  { %6779 = vmatpush1.bf16.msra.mxu1 %v8772_v56 }
0x3612   :  { %6781 = vmatprep.subr.bf16.mxu1 %v8782_v60 }
0x3615   :  { %6783 = vmatpush1.bf16.msra.mxu1 %v8790_v3 }
0x3616   :  { %6785 = vmatprep.subr.bf16.mxu1 %v8800_v46 }
0x3619   :  { %6787 = vmatpush1.bf16.msra.mxu1 %v8808_v20 }
0x361a   :  { %6805 = vmatprep.subr.bf16.mxu1 %v8744_v38 }
0x361c   :  { %4096 = vmatmul.mubr.f32.vlgmr.msra.gmra.mrb[22].mxu1 %v7670_v1 }
0x361d   :  { %6807 = vmatpush1.bf16.msra.mxu1 %v8755_v22  ;;  %4665 = vmatprep.mubr.f32.mxu1 %v7670_v1 }
0x361e   :  { %6809 = vmatprep.subr.bf16.mxu1 %v8764_v57 }
0x3621   :  { %6811 = vmatpush1.bf16.msra.mxu1 %v8772_v56 }
0x3622   :  { %6813 = vmatprep.subr.bf16.mxu1 %v8782_v60 }
0x3625   :  { %6815 = vmatpush1.bf16.msra.mxu1 %v8790_v3 }
0x3626   :  { %6817 = vmatprep.subr.bf16.mxu1 %v8800_v46 }
0x3629   :  { %6819 = vmatpush1.bf16.msra.mxu1 %v8808_v20 }
0x362a   :  { %6837 = vmatprep.subr.bf16.mxu1 %v8744_v38 }
0x36df   :  { %v3808_v47 = vpop.f32.mrb[20].mxu1 }
0x36e0   :  { %v3819_v12 = vrot.slane %v3808_v47, %v8035_v39  ;;  %v6576_v33 = vpop.f32.mrb[21].mxu1 }
0x36e2   :  { %v3820_v53 = vcombine.high %v3819_v12, %v3819_v12  ;;  %v3827_v35 = vrot.slane %v3819_v12, %v8035_v39 }
0x36e4   :  { %v3834_v7 = vrot.slane %v3820_v53, %v8035_v39  ;;  %v3988_v40 = vrot.slane %v3827_v35, %v8039_v43 }
0x36e6   :  { %v3992_v54 = vrot.slane %v3834_v7, %v8039_v43  ;;  %v8854_v41 = vsel %vm3922_vm14, %v8690_v32, %v3988_v40 }
0x36e8   :  { %v8858_v37 = vsel %vm3922_vm14, %v8694_v49, %v3992_v54 }
0x36ef   :  { %v8862_v14 = vpop.f32.mrb[22].mxu1 }
0x36f0   :  { %v4099_v63 = vpop.f32.mrb[23].mxu1 }
0x36f1   :  { %v4108_v42 = vadd.f32 %v8860_v2, %v4099_v63 }
0x36f3   :  { %v4116_v23 = vrot.slane %v4108_v42, %v8035_v39 }
0x36f5   :  { %v4117_v50 = vcombine.high %v4116_v23, %v4116_v23  ;;  %v4124_v18 = vrot.slane %v4116_v23, %v8035_v39  ;;  %v8890_v23 = vld [vmem:[#allocation5] sm:$0x3] }
0x36f7   :  { %v4131_v21 = vrot.slane %v4117_v50, %v8035_v39  ;;  %v4135_v32 = vrot.slane %v4124_v18, %v8039_v43  ;;  %v6354_v50 = vld [vmem:[#allocation20] ss:$0 sm:$0xff] }
0x36f9   :  { %v4139_v44 = vrot.slane %v4131_v21, %v8039_v43  ;;  %v4142_v49 = vadd.f32 %v4135_v32, %v8854_v41 }
0x36fb   :  { %v4143_v36 = vadd.f32 %v4139_v44, %v8858_v37  ;;  %7131 = vtanh.f32 %v4142_v49 }
0x36fd   :  { %7133 = vtanh.f32 %v4143_v36 }
0x3705   :  { %v7132_v30 = vpop.eup %7131 }
0x3706   :  { %v4152_v58 = vmul.f32 %v7132_v30, %v8872_v27 }
0x3707   :  { %v7134_v48 = vpop.eup %7133 }
0x3708   :  { %v4154_v31 = vsel %vm713_vm7, %v4152_v58, 0.0  ;;  %v4153_v62 = vmul.f32 %v7134_v48, %v8872_v27 }
0x3709   :  { %4155 = vadd.xlane.f32.xlu0 %v4154_v31 }
0x370a   :  { %v4157_v19 = vsel %vm713_vm7, %v4153_v62, 0.0 }
0x370b   :  { %4158 = vadd.xlane.f32.xlu1 %v4157_v19 }
0x3796   :  { %v4156_v5 = vpop.xlane.xlu0 %4155 }
0x3797   :  { %v4165_v8 = vrot.slane %v4156_v5, %v8057_v61 }
0x3798   :  { %v4159_v59 = vpop.xlane.xlu1 %4158 }
0x3799   :  { %v4169_v28 = vrot.slane %v4159_v59, %v8057_v61 }
0x379b   :  { %v4170_v34 = vsel %vm499_vm3, %v4169_v28, %v4165_v8 }
0x379c   :  { %v4173_v45 = vsel %vm4172_vm15, %v4170_v34, -inf }
0x379d   :  { %4174 = vmax.xlane.f32.xlu1 %v4173_v45 }
0x382a   :  { %v4175_v11 = vpop.xlane.xlu1 %4174 }
0x382b   :  { %v4180_v51 = vrot.slane %v4175_v11, %v8039_v43  ;;  %v4184_v55 = vrot.slane %v4175_v11, %v8065_v6 }
0x382d   :  { %v4187_v9 = vsub.f32 %v4156_v5, %v4180_v51  ;;  %v4188_v10 = vsub.f32 %v4159_v59, %v4184_v55 }
0x382f   :  { %v4189_v0 = vmul.f32 1.442695, %v4187_v9  ;;  %v4191_v16 = vmul.f32 1.442695, %v4188_v10 }
0x3831   :  { %7135 = vpow2.f32 %v4189_v0 }
0x3832   :  { %7137 = vpow2.f32 %v4191_v16 }
0x383b   :  { %v7136_v15 = vpop.eup %7135 }
0x383c   :  { %4196 = vperm.xlu1 %6954, %v7136_v15   ;;  %v7138_v17 = vpop.eup %7137 }
0x3840   :  { %4199 = vperm.xlu1 %6954, %v7138_v17  }
0x38bb   :  { %v4197_v25 = vpop.permute.xlu1 %4196 }
0x38bc   :  { %v4204_v52 = vrot.slane %v4197_v25, %v8057_v61  ;;  %v8907_v25 = vld [vmem:[#allocation22] ss:$0 sm:$0xff] }
0x38bf   :  { %v4200_v26 = vpop.permute.xlu1 %4199 }
0x38c0   :  { %v4208_v47 = vrot.slane %v4200_v26, %v8057_v61 }
0x38c2   :  { %v4209_v12 = vsel %vm499_vm3, %v4208_v47, %v4204_v52 }
0x38c3   :  { %v4211_v33 = vsel %vm4172_vm15, %v4209_v12, 0.0 }
0x38c4   :  { %4212 = vadd.xlane.f32.xlu0 %v4211_v33  ;;  %v8911_v33 = vld [vmem:[#allocation25] ss:$0 sm:$0xff] }
0x3951   :  { %v4213_v53 = vpop.xlane.xlu0 %4212 }
0x3952   :  { %v4218_v35 = vrot.slane %v4213_v53, %v8039_v43  ;;  %v4222_v7 = vrot.slane %v4213_v53, %v8065_v6 }
0x3954   :  { %7139 = vrcp.f32 %v4218_v35 }
0x3955   :  { %7141 = vrcp.f32 %v4222_v7 }
0x395e   :  { %v7140_v40 = vpop.eup %7139 }
0x395f   :  { %v7142_v54 = vpop.eup %7141  ;;  %v4226_v63 = vmul.f32 %v7140_v40, %v7136_v15  ;;  %v8905_v15 = vld [vmem:[#allocation23] ss:$0 sm:$0xff] }
0x3960   :  { %v4228_v42 = vmul.f32 %v7142_v54, %v7138_v17 }
0x3961   :  { %4231 = vperm.xlu0 %6955, %v4226_v63  }
0x3962   :  { %4236 = vperm.xlu1 %6954, %v4228_v42  }
0x3965   :  { %4286 = vperm.xlu0 %6955, %v8890_v23  }
0x3966   :  { %4261 = vrot.lane.b32.xlu1 %v6354_v50, %s7657_s14 }
0x39e0   :  { %v4232_v18 = vpop.permute.xlu0 %4231 }
0x39e1   :  { %v4237_v21 = vpop.permute.xlu1 %4236  ;;  %v4239_v32 = vmul.f32 %v4232_v18, %v8821_v29 }
0x39e2   :  { %v4240_v44 = vmul.f32 %v4237_v21, %v8825_v24 }
0x39e3   :  { %v4242_v49 = vsel %vm4241_vm1, %v4239_v32, 0.0 }
0x39e4   :  { %v4249_v36 = vsel %vm4241_vm1, %v4240_v44, 0.0  ;;  %v4243_v30 = vrot.slane %v4242_v49, 4  ;;  %v4287_v17 = vpop.permute.xlu0 %4286 }
0x39e5   :  { %v4250_v58 = vrot.slane %v4249_v36, 4  ;;  %v8898_v34 = vpop.permute.xlu1 %4261  ;;  %v4295_v52 = vmul.f32 %v8905_v15, %v4287_v17 }
0x39e6   :  { %v4244_v48 = vadd.f32 %v4243_v30, %v4242_v49 }
0x39e7   :  { %v4251_v31 = vadd.f32 %v4250_v58, %v4249_v36 }
0x39e8   :  { %v4245_v62 = vrot.slane %v4244_v48, 2 }
0x39e9   :  { %v4252_v19 = vrot.slane %v4251_v31, 2 }
0x39ea   :  { %v4246_v5 = vadd.f32 %v4245_v62, %v4244_v48 }
0x39eb   :  { %v4253_v59 = vadd.f32 %v4252_v19, %v4251_v31 }
0x39ec   :  { %v4247_v8 = vrot.slane %v4246_v5, 1 }
0x39ed   :  { %v4254_v28 = vrot.slane %v4253_v59, 1 }
0x39ee   :  { %v4248_v45 = vadd.f32 %v4247_v8, %v4246_v5 }
0x39ef   :  { %v4255_v11 = vadd.f32 %v4254_v28, %v4253_v59 }
0x39f0   :  { %v4264_v55 = vmul.f32 %v8898_v34, %v4248_v45 }
0x39f1   :  { %v4265_v51 = vmul.f32 %v8898_v34, %v4255_v11 }
0x39f3   :  { %v4268_v9 = vrot.slane %v4265_v51, 7 }
0x39f5   :  { %v4269_v10 = vsel %vm499_vm3, %v4268_v9, %v4264_v55 }
0x39f6   :  { %4270 = vrot.lane.b32.xlu1 %v4269_v10, %s7657_s14 }
0x3a68   :  { %v4271_v0 = vpop.permute.xlu1 %4270 }
0x3a69   :  { %v4274_v16 = vsel %vm4273_vm2, %v4271_v0, 0.0 }
0x3a6a   :  { %4275 = vadd.xlane.f32.xlu1 %v4274_v16 }
0x3af7   :  { %v4276_v26 = vpop.xlane.xlu1 %4275 }
0x3af8   :  { %v4283_v47 = vmul.f32 %v8907_v25, %v4276_v26 }
0x3afa   :  { %v4296_v12 = vadd.f32 %v4295_v52, %v4283_v47 }
0x3afc   :  { %v4297_v53 = vadd.f32 %v4296_v12, %v8862_v14 }
0x3afe   :  { %v4304_v35 = vadd.f32 %v8911_v33, %v4297_v53 }
0x3b00   :  { %7143 = vtanh.f32 %v4304_v35  ;;  %v6358_v40 = vmul.f32 -1.442695, %v4304_v35 }
0x3b02   :  { %7145 = vpow2.f32 %v6358_v40 }
0x3b0a   :  { %v7144_v7 = vpop.eup %7143 }
0x3b0b   :  { %4314 = vrot.lane.b32.xlu0 %v7144_v7, %s7674_s15 }
0x3b0c   :  { %v7146_v54 = vpop.eup %7145 }
0x3b0d   :  { %v4308_v63 = vadd.f32 1.0, %v7146_v54 }
0x3b0f   :  { %7147 = vrcp.f32 %v4308_v63 }
0x3b19   :  { %v7148_v42 = vpop.eup %7147 }
0x3b1a   :  { %v4312_v21 = vmul.f32 0.0, %v7148_v42 }
0x3b7d   :  { %v4315_v50 = vpop.permute.xlu0 %4314 }
0x3b7e   :  { %v4317_v18 = vmul.f32 %v7148_v42, %v4315_v50 }
0x3b80   :  { %4319 = vrot.lane.b32.xlu0 %v4317_v18, %s7674_s15 }
0x3bf2   :  { %v4320_v32 = vpop.permute.xlu0 %4319 }
0x3bf3   :  { %v8917_v44 = vadd.f32 %v4320_v32, %v4312_v21 }
0x3bf5   :  { %7149 = vtanh.f32 %v8917_v44 }
0x3bff   :  { %v7150_v14 = vpop.eup %7149 }
0x3c00   :  { %4325 = vrot.lane.b32.xlu0 %v7150_v14, %s7674_s15 }
0x3c72   :  { %v4326_v49 = vpop.permute.xlu0 %4325 }
0x3c73   :  { %v4328_v36 = vmul.f32 %v7148_v42, %v4326_v49 }
0x3c75   :  { %4330 = vrot.lane.b32.xlu0 %v4328_v36, %s7657_s14 }
0x3ce7   :  { %v4331_v30 = vpop.permute.xlu0 %4330 }
0x3ce8   :  { %v4333_v58 = vsel %vm713_vm7, %v4331_v30, %v8917_v44 }
0x3ce9   :  { %6359 = vmatmul.mubr.msk.f32.vlgmr.msra.gmra.mrb[28].mxu0 %vm353_vm8, %v4333_v58 }
0x3cea   :  { %6823 = vmatpush1.bf16.msra.mxu0 %v8755_v22  ;;  %4929 = vmatprep.mubr.f32.mxu0 %v7670_v1 }
0x3ceb   :  { %6825 = vmatprep.subr.bf16.mxu0 %v8764_v57 }
0x3cee   :  { %6827 = vmatpush1.bf16.msra.mxu0 %v8772_v56 }
0x3cef   :  { %6829 = vmatprep.subr.bf16.mxu0 %v8782_v60 }
0x3cf2   :  { %6831 = vmatpush1.bf16.msra.mxu0 %v8790_v3 }
0x3cf3   :  { %6833 = vmatprep.subr.bf16.mxu0 %v8800_v46 }
0x3cf6   :  { %6835 = vmatpush1.bf16.msra.mxu0 %v8808_v20 }
0x3cf7   :  { %6853 = vmatprep.subr.bf16.mxu0 %v8744_v38 }
0x3dbc   :  { %v8934_v48 = vpop.f32.mrb[28].mxu0 }
0x3dbd   :  { %v4405_v31 = vpop.f32.mrb[29].mxu0 }
0x3dbe   :  { %v4408_v62 = vadd.f32 %v8860_v2, %v4405_v31 }
0x3dc0   :  { %v4416_v19 = vrot.slane %v4408_v62, %v8035_v39 }
0x3dc2   :  { %v4417_v5 = vcombine.high %v4416_v19, %v4416_v19  ;;  %v4424_v59 = vrot.slane %v4416_v19, %v8035_v39 }
0x3dc4   :  { %v4431_v8 = vrot.slane %v4417_v5, %v8035_v39  ;;  %v4435_v28 = vrot.slane %v4424_v59, %v8039_v43 }
0x3dc6   :  { %v4439_v45 = vrot.slane %v4431_v8, %v8039_v43  ;;  %v4442_v11 = vadd.f32 %v4435_v28, %v8854_v41 }
0x3dc8   :  { %v4443_v51 = vadd.f32 %v4439_v45, %v8858_v37  ;;  %7151 = vtanh.f32 %v4442_v11 }
0x3dca   :  { %7153 = vtanh.f32 %v4443_v51 }
0x3dd2   :  { %v7152_v55 = vpop.eup %7151 }
0x3dd3   :  { %v4446_v9 = vmul.f32 %v7152_v55, %v8872_v27 }
0x3dd4   :  { %v7154_v10 = vpop.eup %7153 }
0x3dd5   :  { %v4448_v0 = vsel %vm713_vm7, %v4446_v9, 0.0  ;;  %v4447_v16 = vmul.f32 %v7154_v10, %v8872_v27 }
0x3dd6   :  { %4449 = vadd.xlane.f32.xlu0 %v4448_v0 }
0x3dd7   :  { %v4451_v17 = vsel %vm713_vm7, %v4447_v16, 0.0 }
0x3dd8   :  { %4452 = vadd.xlane.f32.xlu1 %v4451_v17 }
0x3e63   :  { %v4450_v26 = vpop.xlane.xlu0 %4449 }
0x3e64   :  { %v4459_v47 = vrot.slane %v4450_v26, %v8057_v61 }
0x3e65   :  { %v4453_v52 = vpop.xlane.xlu1 %4452 }
0x3e66   :  { %v4463_v12 = vrot.slane %v4453_v52, %v8057_v61 }
0x3e68   :  { %v4464_v53 = vsel %vm499_vm3, %v4463_v12, %v4459_v47 }
0x3e69   :  { %v4466_v35 = vsel %vm4172_vm15, %v4464_v53, -inf }
0x3e6a   :  { %4467 = vmax.xlane.f32.xlu1 %v4466_v35 }
0x3ef7   :  { %v4468_v7 = vpop.xlane.xlu1 %4467 }
0x3ef8   :  { %v4473_v40 = vrot.slane %v4468_v7, %v8039_v43  ;;  %v4477_v54 = vrot.slane %v4468_v7, %v8065_v6  ;;  %v7683_v7 = vmov 1  }
0x3efa   :  { %v4480_v63 = vsub.f32 %v4450_v26, %v4473_v40  ;;  %v4481_v42 = vsub.f32 %v4453_v52, %v4477_v54 }
0x3efc   :  { %v4482_v50 = vmul.f32 1.442695, %v4480_v63  ;;  %v4484_v18 = vmul.f32 1.442695, %v4481_v42 }
0x3efe   :  { %7155 = vpow2.f32 %v4482_v50 }
0x3eff   :  { %7157 = vpow2.f32 %v4484_v18 }
0x3f08   :  { %v7156_v21 = vpop.eup %7155 }
0x3f09   :  { %4489 = vperm.xlu1 %6954, %v7156_v21   ;;  %v7158_v32 = vpop.eup %7157 }
0x3f0d   :  { %4492 = vperm.xlu1 %6954, %v7158_v32  }
0x3f88   :  { %v4490_v14 = vpop.permute.xlu1 %4489 }
0x3f89   :  { %v4497_v36 = vrot.slane %v4490_v14, %v8057_v61 }
0x3f8c   :  { %v4493_v49 = vpop.permute.xlu1 %4492 }
0x3f8d   :  { %v4501_v30 = vrot.slane %v4493_v49, %v8057_v61 }
0x3f8f   :  { %v4502_v58 = vsel %vm499_vm3, %v4501_v30, %v4497_v36 }
0x3f90   :  { %v4504_v31 = vsel %vm4172_vm15, %v4502_v58, 0.0 }
0x3f91   :  { %4505 = vadd.xlane.f32.xlu0 %v4504_v31 }
0x401e   :  { %v4506_v62 = vpop.xlane.xlu0 %4505 }
0x401f   :  { %v4511_v19 = vrot.slane %v4506_v62, %v8039_v43  ;;  %v4515_v5 = vrot.slane %v4506_v62, %v8065_v6 }
0x4021   :  { %7159 = vrcp.f32 %v4511_v19 }
0x4022   :  { %7161 = vrcp.f32 %v4515_v5 }
0x402b   :  { %v7160_v59 = vpop.eup %7159 }
0x402c   :  { %v7162_v8 = vpop.eup %7161  ;;  %v4519_v28 = vmul.f32 %v7160_v59, %v7156_v21 }
0x402d   :  { %v4521_v45 = vmul.f32 %v7162_v8, %v7158_v32 }
0x402e   :  { %4524 = vperm.xlu0 %6955, %v4519_v28  }
0x402f   :  { %4529 = vperm.xlu1 %6954, %v4521_v45  }
0x4032   :  { %6956 = vset.pattern.permute.xlu0 %v7683_v7 }
0x4033   :  { %4562 = vperm.xlu0 %6956, %v8890_v23  }
0x4037   :  { %6957 = vset.pattern.permute.xlu0 %v7673_v4 }
0x40ad   :  { %v4525_v11 = vpop.permute.xlu0 %4524 }
0x40ae   :  { %v4530_v51 = vpop.permute.xlu1 %4529  ;;  %v4532_v55 = vmul.f32 %v4525_v11, %v8821_v29 }
0x40af   :  { %v4533_v9 = vmul.f32 %v4530_v51, %v8825_v24 }
0x40b0   :  { %v4534_v10 = vsel %vm4241_vm1, %v4532_v55, 0.0 }
0x40b1   :  { %v4541_v0 = vsel %vm4241_vm1, %v4533_v9, 0.0  ;;  %v4535_v16 = vrot.slane %v4534_v10, 4 }
0x40b2   :  { %v4542_v17 = vrot.slane %v4541_v0, 4  ;;  %v4563_v36 = vpop.permute.xlu0 %4562 }
0x40b3   :  { %v4536_v26 = vadd.f32 %v4535_v16, %v4534_v10  ;;  %v4565_v30 = vmul.f32 %v8905_v15, %v4563_v36 }
0x40b4   :  { %v4543_v52 = vadd.f32 %v4542_v17, %v4541_v0 }
0x40b5   :  { %v4537_v47 = vrot.slane %v4536_v26, 2 }
0x40b6   :  { %v4544_v12 = vrot.slane %v4543_v52, 2 }
0x40b7   :  { %v4538_v53 = vadd.f32 %v4537_v47, %v4536_v26 }
0x40b8   :  { %v4545_v35 = vadd.f32 %v4544_v12, %v4543_v52 }
0x40b9   :  { %v4539_v40 = vrot.slane %v4538_v53, 1 }
0x40ba   :  { %v4546_v54 = vrot.slane %v4545_v35, 1 }
0x40bb   :  { %v4540_v63 = vadd.f32 %v4539_v40, %v4538_v53 }
0x40bc   :  { %v4547_v42 = vadd.f32 %v4546_v54, %v4545_v35 }
0x40bd   :  { %v4548_v18 = vmul.f32 %v4540_v63, %v8898_v34 }
0x40be   :  { %v4549_v50 = vmul.f32 %v4547_v42, %v8898_v34 }
0x40c0   :  { %v4552_v21 = vrot.slane %v4549_v50, 7 }
0x40c2   :  { %v4553_v32 = vsel %vm499_vm3, %v4552_v21, %v4548_v18 }
0x40c3   :  { %4554 = vrot.lane.b32.xlu1 %v4553_v32, %s7657_s14 }
0x4135   :  { %v4555_v14 = vpop.permute.xlu1 %4554 }
0x4136   :  { %v4557_v49 = vsel %vm4273_vm2, %v4555_v14, 0.0 }
0x4137   :  { %4558 = vadd.xlane.f32.xlu1 %v4557_v49 }
0x41c4   :  { %v4559_v58 = vpop.xlane.xlu1 %4558 }
0x41c5   :  { %v4560_v31 = vmul.f32 %v8907_v25, %v4559_v58 }
0x41c7   :  { %v4566_v62 = vadd.f32 %v4565_v30, %v4560_v31 }
0x41c9   :  { %v4567_v19 = vadd.f32 %v4566_v62, %v8934_v48 }
0x41cb   :  { %v4568_v5 = vadd.f32 %v8911_v33, %v4567_v19 }
0x41cd   :  { %7163 = vtanh.f32 %v4568_v5  ;;  %v6360_v8 = vmul.f32 -1.442695, %v4568_v5 }
0x41cf   :  { %7165 = vpow2.f32 %v6360_v8 }
0x41d7   :  { %v7164_v59 = vpop.eup %7163 }
0x41d8   :  { %4578 = vrot.lane.b32.xlu0 %v7164_v59, %s7674_s15 }
0x41d9   :  { %v7166_v28 = vpop.eup %7165 }
0x41da   :  { %v4572_v45 = vadd.f32 1.0, %v7166_v28 }
0x41dc   :  { %7167 = vrcp.f32 %v4572_v45 }
0x41e6   :  { %v7168_v11 = vpop.eup %7167 }
0x41e7   :  { %v4576_v9 = vmul.f32 %v7168_v11, %v8917_v44 }
0x424a   :  { %v4579_v51 = vpop.permute.xlu0 %4578 }
0x424b   :  { %v4581_v55 = vmul.f32 %v7168_v11, %v4579_v51 }
0x424d   :  { %4583 = vrot.lane.b32.xlu0 %v4581_v55, %s7674_s15 }
0x42bf   :  { %v4584_v10 = vpop.permute.xlu0 %4583 }
0x42c0   :  { %v8978_v48 = vadd.f32 %v4584_v10, %v4576_v9 }
0x42c2   :  { %7169 = vtanh.f32 %v8978_v48 }
0x42cc   :  { %v7170_v0 = vpop.eup %7169 }
0x42cd   :  { %4589 = vrot.lane.b32.xlu0 %v7170_v0, %s7674_s15 }
0x433f   :  { %v4590_v16 = vpop.permute.xlu0 %4589 }
0x4340   :  { %v4592_v17 = vmul.f32 %v7168_v11, %v4590_v16 }
0x4342   :  { %4594 = vrot.lane.b32.xlu1 %v4592_v17, %s7657_s14 }
0x43b4   :  { %v4595_v26 = vpop.permute.xlu1 %4594 }
0x43b5   :  { %v4597_v52 = vsel %vm713_vm7, %v4595_v26, %v8978_v48 }
0x43b6   :  { %6361 = vmatmul.mubr.msk.f32.vlgmr.msra.gmra.mrb[24].mxu1 %vm353_vm8, %v4597_v52 }
0x43b7   :  { %6839 = vmatpush1.bf16.msra.mxu1 %v8755_v22  ;;  %5193 = vmatprep.mubr.f32.mxu1 %v7670_v1 }
0x43b8   :  { %6841 = vmatprep.subr.bf16.mxu1 %v8764_v57 }
0x43bb   :  { %6843 = vmatpush1.bf16.msra.mxu1 %v8772_v56 }
0x43bc   :  { %6845 = vmatprep.subr.bf16.mxu1 %v8782_v60 }
0x43bf   :  { %6847 = vmatpush1.bf16.msra.mxu1 %v8790_v3 }
0x43c0   :  { %6849 = vmatprep.subr.bf16.mxu1 %v8800_v46 }
0x43c3   :  { %6851 = vmatpush1.bf16.msra.mxu1 %v8808_v20 }
0x43c4   :  { %6869 = vmatprep.subr.bf16.mxu1 %v8744_v38 }
0x4489   :  { %v8995_v44 = vpop.f32.mrb[24].mxu1 }
0x448a   :  { %v4669_v47 = vpop.f32.mrb[25].mxu1 }
0x448b   :  { %v4672_v12 = vadd.f32 %v8860_v2, %v4669_v47 }
0x448d   :  { %v4680_v53 = vrot.slane %v4672_v12, %v8035_v39 }
0x448f   :  { %v4681_v35 = vcombine.high %v4680_v53, %v4680_v53  ;;  %v4688_v7 = vrot.slane %v4680_v53, %v8035_v39 }
0x4491   :  { %v4695_v40 = vrot.slane %v4681_v35, %v8035_v39  ;;  %v4699_v54 = vrot.slane %v4688_v7, %v8039_v43 }
0x4493   :  { %v4703_v63 = vrot.slane %v4695_v40, %v8039_v43  ;;  %v4706_v42 = vadd.f32 %v4699_v54, %v8854_v41 }
0x4495   :  { %v4707_v50 = vadd.f32 %v4703_v63, %v8858_v37  ;;  %7171 = vtanh.f32 %v4706_v42 }
0x4497   :  { %7173 = vtanh.f32 %v4707_v50 }
0x449f   :  { %v7172_v18 = vpop.eup %7171 }
0x44a0   :  { %v4710_v21 = vmul.f32 %v7172_v18, %v8872_v27 }
0x44a1   :  { %v7174_v32 = vpop.eup %7173 }
0x44a2   :  { %v4712_v14 = vsel %vm713_vm7, %v4710_v21, 0.0  ;;  %v4711_v49 = vmul.f32 %v7174_v32, %v8872_v27 }
0x44a3   :  { %4713 = vadd.xlane.f32.xlu0 %v4712_v14 }
0x44a4   :  { %v4715_v36 = vsel %vm713_vm7, %v4711_v49, 0.0 }
0x44a5   :  { %4716 = vadd.xlane.f32.xlu1 %v4715_v36 }
0x4530   :  { %v4714_v30 = vpop.xlane.xlu0 %4713 }
0x4531   :  { %v4723_v31 = vrot.slane %v4714_v30, %v8057_v61 }
0x4532   :  { %v4717_v58 = vpop.xlane.xlu1 %4716 }
0x4533   :  { %v4727_v62 = vrot.slane %v4717_v58, %v8057_v61 }
0x4535   :  { %v4728_v19 = vsel %vm499_vm3, %v4727_v62, %v4723_v31 }
0x4536   :  { %v4730_v5 = vsel %vm4172_vm15, %v4728_v19, -inf }
0x4537   :  { %4731 = vmax.xlane.f32.xlu0 %v4730_v5 }
0x45c4   :  { %v4732_v59 = vpop.xlane.xlu0 %4731 }
0x45c5   :  { %v4737_v8 = vrot.slane %v4732_v59, %v8039_v43  ;;  %v4741_v28 = vrot.slane %v4732_v59, %v8065_v6  ;;  %v7684_v59 = vmov 2  }
0x45c7   :  { %v4744_v45 = vsub.f32 %v4714_v30, %v4737_v8  ;;  %v4745_v11 = vsub.f32 %v4717_v58, %v4741_v28 }
0x45c9   :  { %v4746_v51 = vmul.f32 1.442695, %v4744_v45  ;;  %v4748_v55 = vmul.f32 1.442695, %v4745_v11 }
0x45cb   :  { %7175 = vpow2.f32 %v4746_v51 }
0x45cc   :  { %7177 = vpow2.f32 %v4748_v55 }
0x45d5   :  { %v7176_v9 = vpop.eup %7175 }
0x45d6   :  { %v7178_v10 = vpop.eup %7177  ;;  %4753 = vperm.xlu0 %6957, %v7176_v9  }
0x45d7   :  { %4756 = vperm.xlu1 %6954, %v7178_v10  }
0x45db   :  { %6958 = vset.pattern.permute.xlu1 %v7684_v59 }
0x4655   :  { %v4754_v0 = vpop.permute.xlu0 %4753 }
0x4656   :  { %v4757_v16 = vpop.permute.xlu1 %4756  ;;  %v4761_v17 = vrot.slane %v4754_v0, %v8057_v61 }
0x4657   :  { %v4765_v26 = vrot.slane %v4757_v16, %v8057_v61 }
0x4659   :  { %v4766_v52 = vsel %vm499_vm3, %v4765_v26, %v4761_v17 }
0x465a   :  { %v4768_v47 = vsel %vm4172_vm15, %v4766_v52, 0.0 }
0x465b   :  { %4769 = vadd.xlane.f32.xlu1 %v4768_v47 }
0x466c   :  { %4826 = vperm.xlu1 %6958, %v8890_v23  }
0x4670   :  { %6959 = vset.pattern.permute.xlu1 %v7673_v4 }
0x46e8   :  { %v4770_v12 = vpop.xlane.xlu1 %4769 }
0x46e9   :  { %v4779_v53 = vrot.slane %v4770_v12, %v8065_v6  ;;  %v4775_v35 = vrot.slane %v4770_v12, %v8039_v43 }
0x46eb   :  { %7179 = vrcp.f32 %v4779_v53 }
0x46ec   :  { %7181 = vrcp.f32 %v4775_v35  ;;  %v4827_v17 = vpop.permute.xlu1 %4826 }
0x46ed   :  { %v4829_v26 = vmul.f32 %v8905_v15, %v4827_v17 }
0x46f5   :  { %v7180_v7 = vpop.eup %7179 }
0x46f6   :  { %v4785_v40 = vmul.f32 %v7180_v7, %v7178_v10  ;;  %v7182_v54 = vpop.eup %7181 }
0x46f7   :  { %v4783_v63 = vmul.f32 %v7182_v54, %v7176_v9 }
0x46f8   :  { %4793 = vperm.xlu0 %6957, %v4785_v40  }
0x46fc   :  { %4788 = vperm.xlu0 %6957, %v4783_v63  }
0x4777   :  { %v4794_v42 = vpop.permute.xlu0 %4793 }
0x4778   :  { %v4797_v50 = vmul.f32 %v4794_v42, %v8825_v24 }
0x477a   :  { %v4805_v18 = vsel %vm4241_vm1, %v4797_v50, 0.0 }
0x477b   :  { %v4806_v21 = vrot.slane %v4805_v18, 4  ;;  %v4789_v32 = vpop.permute.xlu0 %4788 }
0x477c   :  { %v4796_v14 = vmul.f32 %v4789_v32, %v8821_v29 }
0x477d   :  { %v4807_v49 = vadd.f32 %v4806_v21, %v4805_v18 }
0x477e   :  { %v4798_v36 = vsel %vm4241_vm1, %v4796_v14, 0.0 }
0x477f   :  { %v4808_v30 = vrot.slane %v4807_v49, 2  ;;  %v4799_v58 = vrot.slane %v4798_v36, 4 }
0x4781   :  { %v4809_v31 = vadd.f32 %v4808_v30, %v4807_v49  ;;  %v4800_v62 = vadd.f32 %v4799_v58, %v4798_v36 }
0x4783   :  { %v4810_v19 = vrot.slane %v4809_v31, 1  ;;  %v4801_v5 = vrot.slane %v4800_v62, 2 }
0x4785   :  { %v4811_v8 = vadd.f32 %v4810_v19, %v4809_v31  ;;  %v4802_v28 = vadd.f32 %v4801_v5, %v4800_v62 }
0x4787   :  { %v4803_v45 = vrot.slane %v4802_v28, 1  ;;  %v4813_v11 = vmul.f32 %v4811_v8, %v8898_v34 }
0x4789   :  { %v4804_v51 = vadd.f32 %v4803_v45, %v4802_v28  ;;  %v4816_v9 = vrot.slane %v4813_v11, 7 }
0x478b   :  { %v4812_v55 = vmul.f32 %v4804_v51, %v8898_v34 }
0x478d   :  { %v4817_v10 = vsel %vm499_vm3, %v4816_v9, %v4812_v55 }
0x478e   :  { %4818 = vrot.lane.b32.xlu0 %v4817_v10, %s7657_s14 }
0x4800   :  { %v4819_v0 = vpop.permute.xlu0 %4818 }
0x4801   :  { %v4821_v16 = vsel %vm4273_vm2, %v4819_v0, 0.0 }
0x4802   :  { %4822 = vadd.xlane.f32.xlu0 %v4821_v16 }
0x488f   :  { %v4823_v52 = vpop.xlane.xlu0 %4822 }
0x4890   :  { %v4824_v47 = vmul.f32 %v8907_v25, %v4823_v52 }
0x4892   :  { %v4830_v12 = vadd.f32 %v4829_v26, %v4824_v47 }
0x4894   :  { %v4831_v53 = vadd.f32 %v4830_v12, %v8995_v44 }
0x4896   :  { %v4832_v35 = vadd.f32 %v8911_v33, %v4831_v53 }
0x4898   :  { %7183 = vtanh.f32 %v4832_v35  ;;  %v6362_v40 = vmul.f32 -1.442695, %v4832_v35 }
0x489a   :  { %7185 = vpow2.f32 %v6362_v40 }
0x48a2   :  { %v7184_v7 = vpop.eup %7183 }
0x48a3   :  { %4842 = vrot.lane.b32.xlu1 %v7184_v7, %s7674_s15 }
0x48a4   :  { %v7186_v54 = vpop.eup %7185 }
0x48a5   :  { %v4836_v63 = vadd.f32 1.0, %v7186_v54 }
0x48a7   :  { %7187 = vrcp.f32 %v4836_v63 }
0x48b1   :  { %v7188_v42 = vpop.eup %7187 }
0x48b2   :  { %v4840_v21 = vmul.f32 %v7188_v42, %v8978_v48 }
0x4915   :  { %v4843_v50 = vpop.permute.xlu1 %4842 }
0x4916   :  { %v4845_v18 = vmul.f32 %v7188_v42, %v4843_v50 }
0x4918   :  { %4847 = vrot.lane.b32.xlu0 %v4845_v18, %s7674_s15 }
0x498a   :  { %v4848_v32 = vpop.permute.xlu0 %4847 }
0x498b   :  { %v9039_v44 = vadd.f32 %v4848_v32, %v4840_v21 }
0x498d   :  { %7189 = vtanh.f32 %v9039_v44 }
0x4997   :  { %v7190_v14 = vpop.eup %7189 }
0x4998   :  { %4853 = vrot.lane.b32.xlu1 %v7190_v14, %s7674_s15 }
0x4a0a   :  { %v4854_v49 = vpop.permute.xlu1 %4853 }
0x4a0b   :  { %v4856_v36 = vmul.f32 %v7188_v42, %v4854_v49 }
0x4a0d   :  { %4858 = vrot.lane.b32.xlu1 %v4856_v36, %s7657_s14 }
0x4a7f   :  { %v4859_v30 = vpop.permute.xlu1 %4858 }
0x4a80   :  { %v4861_v58 = vsel %vm713_vm7, %v4859_v30, %v9039_v44 }
0x4a81   :  { %6363 = vmatmul.mubr.msk.f32.vlgmr.msra.gmra.mrb[30].mxu0 %vm353_vm8, %v4861_v58 }
0x4a82   :  { %6855 = vmatpush1.bf16.msra.mxu0 %v8755_v22  ;;  %5457 = vmatprep.mubr.f32.mxu0 %v7670_v1 }
0x4a83   :  { %6857 = vmatprep.subr.bf16.mxu0 %v8764_v57 }
0x4a86   :  { %6859 = vmatpush1.bf16.msra.mxu0 %v8772_v56 }
0x4a87   :  { %6861 = vmatprep.subr.bf16.mxu0 %v8782_v60 }
0x4a8a   :  { %6863 = vmatpush1.bf16.msra.mxu0 %v8790_v3 }
0x4a8b   :  { %6865 = vmatprep.subr.bf16.mxu0 %v8800_v46 }
0x4a8e   :  { %6867 = vmatpush1.bf16.msra.mxu0 %v8808_v20 }
0x4a8f   :  { %6885 = vmatprep.subr.bf16.mxu0 %v8744_v38 }
0x4b54   :  { %v9056_v48 = vpop.f32.mrb[30].mxu0 }
0x4b55   :  { %v4933_v31 = vpop.f32.mrb[31].mxu0 }
0x4b56   :  { %v4936_v62 = vadd.f32 %v8860_v2, %v4933_v31 }
0x4b58   :  { %v4944_v19 = vrot.slane %v4936_v62, %v8035_v39 }
0x4b5a   :  { %v4945_v5 = vcombine.high %v4944_v19, %v4944_v19  ;;  %v4952_v59 = vrot.slane %v4944_v19, %v8035_v39 }
0x4b5c   :  { %v4959_v8 = vrot.slane %v4945_v5, %v8035_v39  ;;  %v4963_v28 = vrot.slane %v4952_v59, %v8039_v43 }
0x4b5e   :  { %v4967_v45 = vrot.slane %v4959_v8, %v8039_v43  ;;  %v4970_v11 = vadd.f32 %v4963_v28, %v8854_v41 }
0x4b60   :  { %v4971_v38 = vadd.f32 %v4967_v45, %v8858_v37  ;;  %7191 = vtanh.f32 %v4970_v11 }
0x4b62   :  { %7193 = vtanh.f32 %v4971_v38 }
0x4b6a   :  { %v7192_v51 = vpop.eup %7191 }
0x4b6b   :  { %v4974_v2 = vmul.f32 %v7192_v51, %v8872_v27 }
0x4b6c   :  { %v7194_v55 = vpop.eup %7193 }
0x4b6d   :  { %v4976_v9 = vsel %vm713_vm7, %v4974_v2, 0.0  ;;  %v4975_v10 = vmul.f32 %v7194_v55, %v8872_v27 }
0x4b6e   :  { %4977 = vadd.xlane.f32.xlu1 %v4976_v9 }
0x4b6f   :  { %v4979_v0 = vsel %vm713_vm7, %v4975_v10, 0.0 }
0x4b70   :  { %4980 = vadd.xlane.f32.xlu0 %v4979_v0 }
0x4bfb   :  { %v4978_v16 = vpop.xlane.xlu1 %4977 }
0x4bfc   :  { %v4987_v26 = vrot.slane %v4978_v16, %v8057_v61 }
0x4bfd   :  { %v4981_v17 = vpop.xlane.xlu0 %4980 }
0x4bfe   :  { %v4991_v52 = vrot.slane %v4981_v17, %v8057_v61 }
0x4c00   :  { %v4992_v47 = vsel %vm499_vm3, %v4991_v52, %v4987_v26  ;;  %v7685_v52 = vmov 3  }
0x4c01   :  { %v4994_v12 = vsel %vm4172_vm15, %v4992_v47, -inf }
0x4c02   :  { %4995 = vmax.xlane.f32.xlu1 %v4994_v12 }
0x4c8f   :  { %v4996_v53 = vpop.xlane.xlu1 %4995 }
0x4c90   :  { %v5001_v35 = vrot.slane %v4996_v53, %v8039_v43  ;;  %v5005_v27 = vrot.slane %v4996_v53, %v8065_v6 }
0x4c92   :  { %v5008_v7 = vsub.f32 %v4978_v16, %v5001_v35  ;;  %v5009_v40 = vsub.f32 %v4981_v17, %v5005_v27 }
0x4c94   :  { %v5010_v54 = vmul.f32 1.442695, %v5008_v7  ;;  %v5012_v63 = vmul.f32 1.442695, %v5009_v40 }
0x4c96   :  { %7195 = vpow2.f32 %v5010_v54 }
0x4c97   :  { %7197 = vpow2.f32 %v5012_v63 }
0x4ca0   :  { %v7196_v42 = vpop.eup %7195 }
0x4ca1   :  { %v7198_v50 = vpop.eup %7197  ;;  %5017 = vperm.xlu1 %6959, %v7196_v42  }
0x4ca2   :  { %5020 = vperm.xlu0 %6957, %v7198_v50  }
0x4ca5   :  { %6960 = vset.pattern.permute.xlu1 %v7685_v52 }
0x4d20   :  { %v5018_v18 = vpop.permute.xlu1 %5017 }
0x4d21   :  { %v5021_v21 = vpop.permute.xlu0 %5020  ;;  %v5025_v32 = vrot.slane %v5018_v18, %v8057_v61 }
0x4d22   :  { %v5029_v14 = vrot.slane %v5021_v21, %v8057_v61 }
0x4d24   :  { %v5030_v49 = vsel %vm499_vm3, %v5029_v14, %v5025_v32 }
0x4d25   :  { %v5032_v36 = vsel %vm4172_vm15, %v5030_v49, 0.0 }
0x4d26   :  { %5033 = vadd.xlane.f32.xlu1 %v5032_v36 }
0x4d37   :  { %5090 = vperm.xlu1 %6960, %v8890_v23  }
0x4d3b   :  { %6961 = vset.pattern.permute.xlu1 %v7673_v4 }
0x4db3   :  { %v5034_v30 = vpop.xlane.xlu1 %5033 }
0x4db4   :  { %v5043_v58 = vrot.slane %v5034_v30, %v8065_v6  ;;  %v5039_v31 = vrot.slane %v5034_v30, %v8039_v43 }
0x4db6   :  { %7199 = vrcp.f32 %v5043_v58 }
0x4db7   :  { %7201 = vrcp.f32 %v5039_v31  ;;  %v5091_v23 = vpop.permute.xlu1 %5090 }
0x4dc0   :  { %v7200_v62 = vpop.eup %7199 }
0x4dc1   :  { %v5049_v19 = vmul.f32 %v7200_v62, %v7198_v50  ;;  %v7202_v5 = vpop.eup %7201  ;;  %v5093_v50 = vmul.f32 %v8905_v15, %v5091_v23 }
0x4dc2   :  { %v5047_v59 = vmul.f32 %v7202_v5, %v7196_v42 }
0x4dc3   :  { %5057 = vperm.xlu0 %6957, %v5049_v19  }
0x4dc7   :  { %5052 = vperm.xlu0 %6957, %v5047_v59  }
0x4e42   :  { %v5058_v8 = vpop.permute.xlu0 %5057 }
0x4e43   :  { %v5061_v28 = vmul.f32 %v5058_v8, %v8825_v24 }
0x4e45   :  { %v5069_v45 = vsel %vm4241_vm1, %v5061_v28, 0.0 }
0x4e46   :  { %v5070_v11 = vrot.slane %v5069_v45, 4  ;;  %v5053_v38 = vpop.permute.xlu0 %5052 }
0x4e47   :  { %v5060_v51 = vmul.f32 %v5053_v38, %v8821_v29  ;;  %v9119_v38 = vld [vmem:[#allocation17] ss:$0 sm:$0xff] }
0x4e48   :  { %v5071_v2 = vadd.f32 %v5070_v11, %v5069_v45 }
0x4e49   :  { %v5062_v55 = vsel %vm4241_vm1, %v5060_v51, 0.0 }
0x4e4a   :  { %v5072_v9 = vrot.slane %v5071_v2, 2  ;;  %v5063_v10 = vrot.slane %v5062_v55, 4 }
0x4e4c   :  { %v5073_v0 = vadd.f32 %v5072_v9, %v5071_v2  ;;  %v5064_v16 = vadd.f32 %v5063_v10, %v5062_v55 }
0x4e4e   :  { %v5074_v17 = vrot.slane %v5073_v0, 1  ;;  %v5065_v26 = vrot.slane %v5064_v16, 2 }
0x4e50   :  { %v5075_v47 = vadd.f32 %v5074_v17, %v5073_v0  ;;  %v5066_v12 = vadd.f32 %v5065_v26, %v5064_v16 }
0x4e52   :  { %v5067_v53 = vrot.slane %v5066_v12, 1  ;;  %v5077_v35 = vmul.f32 %v5075_v47, %v8898_v34  ;;  %v9129_v47 = vld [vmem:[#allocation19] ss:$0 sm:$0xff] }
0x4e54   :  { %v5068_v27 = vadd.f32 %v5067_v53, %v5066_v12  ;;  %v5080_v40 = vrot.slane %v5077_v35, 7 }
0x4e56   :  { %v5076_v7 = vmul.f32 %v5068_v27, %v8898_v34 }
0x4e58   :  { %v5081_v54 = vsel %vm499_vm3, %v5080_v40, %v5076_v7 }
0x4e59   :  { %5082 = vrot.lane.b32.xlu0 %v5081_v54, %s7657_s14 }
0x4ecb   :  { %v5083_v63 = vpop.permute.xlu0 %5082 }
0x4ecc   :  { %v5085_v42 = vsel %vm4273_vm2, %v5083_v63, 0.0 }
0x4ecd   :  { %5086 = vadd.xlane.f32.xlu0 %v5085_v42 }
0x4f5a   :  { %v5087_v18 = vpop.xlane.xlu0 %5086 }
0x4f5b   :  { %v5088_v21 = vmul.f32 %v8907_v25, %v5087_v18 }
0x4f5d   :  { %v5094_v32 = vadd.f32 %v5093_v50, %v5088_v21 }
0x4f5f   :  { %v5095_v14 = vadd.f32 %v5094_v32, %v9056_v48 }
0x4f61   :  { %v5096_v49 = vadd.f32 %v8911_v33, %v5095_v14 }
0x4f63   :  { %7203 = vtanh.f32 %v5096_v49  ;;  %v6364_v30 = vmul.f32 -1.442695, %v5096_v49 }
0x4f65   :  { %7205 = vpow2.f32 %v6364_v30 }
0x4f6d   :  { %v7204_v36 = vpop.eup %7203 }
0x4f6e   :  { %5106 = vrot.lane.b32.xlu0 %v7204_v36, %s7674_s15 }
0x4f6f   :  { %v7206_v58 = vpop.eup %7205 }
0x4f70   :  { %v5100_v31 = vadd.f32 1.0, %v7206_v58 }
0x4f72   :  { %7207 = vrcp.f32 %v5100_v31 }
0x4f7c   :  { %v7208_v62 = vpop.eup %7207 }
0x4f7d   :  { %v5104_v25 = vmul.f32 %v7208_v62, %v9039_v44 }
0x4fe0   :  { %v5107_v19 = vpop.permute.xlu0 %5106 }
0x4fe1   :  { %v5109_v15 = vmul.f32 %v7208_v62, %v5107_v19 }
0x4fe3   :  { %5111 = vrot.lane.b32.xlu1 %v5109_v15, %s7674_s15 }
0x5055   :  { %v5112_v5 = vpop.permute.xlu1 %5111 }
0x5056   :  { %v9100_v48 = vadd.f32 %v5112_v5, %v5104_v25 }
0x5058   :  { %7209 = vtanh.f32 %v9100_v48 }
0x5062   :  { %v7210_v33 = vpop.eup %7209 }
0x5063   :  { %5117 = vrot.lane.b32.xlu1 %v7210_v33, %s7674_s15 }
0x50d5   :  { %v5118_v59 = vpop.permute.xlu1 %5117 }
0x50d6   :  { %v5120_v8 = vmul.f32 %v7208_v62, %v5118_v59 }
0x50d8   :  { %5122 = vrot.lane.b32.xlu1 %v5120_v8, %s7657_s14 }
0x514a   :  { %v5123_v28 = vpop.permute.xlu1 %5122 }
0x514b   :  { %v5125_v45 = vsel %vm713_vm7, %v5123_v28, %v9100_v48 }
0x514c   :  { %6365 = vmatmul.mubr.msk.f32.vlgmr.msra.gmra.mrb[26].mxu1 %vm353_vm8, %v5125_v45 }
0x514d   :  { %6871 = vmatpush1.bf16.msra.mxu1 %v8755_v22  ;;  %5721 = vmatprep.mubr.f32.mxu1 %v7670_v1 }
0x514e   :  { %6873 = vmatprep.subr.bf16.mxu1 %v8764_v57 }
0x5151   :  { %6875 = vmatpush1.bf16.msra.mxu1 %v8772_v56 }
0x5152   :  { %6877 = vmatprep.subr.bf16.mxu1 %v8782_v60 }
0x5155   :  { %6879 = vmatpush1.bf16.msra.mxu1 %v8790_v3 }
0x5156   :  { %6881 = vmatprep.subr.bf16.mxu1 %v8800_v46 }
0x5159   :  { %6883 = vmatpush1.bf16.msra.mxu1 %v8808_v20 }
0x515a   :  { %6900 = vmatprep.subr.bf16.mxu1 %v7675_v13 }
0x521f   :  { %v9117_v44 = vpop.f32.mrb[26].mxu1 }
0x5220   :  { %v5197_v11 = vpop.f32.mrb[27].mxu1 }
0x5221   :  { %v5200_v51 = vadd.f32 %v9119_v38, %v5197_v11 }
0x5223   :  { %v5208_v2 = vrot.slane %v5200_v51, %v8035_v39 }
0x5225   :  { %v5209_v55 = vcombine.high %v5208_v2, %v5208_v2  ;;  %v5216_v9 = vrot.slane %v5208_v2, %v8035_v39 }
0x5227   :  { %v5223_v10 = vrot.slane %v5209_v55, %v8035_v39  ;;  %v5227_v0 = vrot.slane %v5216_v9, %v8039_v43 }
0x5229   :  { %v5231_v16 = vrot.slane %v5223_v10, %v8039_v43  ;;  %v5234_v17 = vadd.f32 %v5227_v0, %v8854_v41 }
0x522b   :  { %v5235_v26 = vadd.f32 %v5231_v16, %v8858_v37  ;;  %7211 = vtanh.f32 %v5234_v17 }
0x522d   :  { %7213 = vtanh.f32 %v5235_v26 }
0x5235   :  { %v7212_v52 = vpop.eup %7211 }
0x5236   :  { %v5238_v12 = vmul.f32 %v9129_v47, %v7212_v52 }
0x5237   :  { %v7214_v53 = vpop.eup %7213 }
0x5238   :  { %v5240_v35 = vsel %vm713_vm7, %v5238_v12, 0.0  ;;  %v5239_v27 = vmul.f32 %v9129_v47, %v7214_v53 }
0x5239   :  { %5241 = vadd.xlane.f32.xlu1 %v5240_v35 }
0x523a   :  { %v5243_v7 = vsel %vm713_vm7, %v5239_v27, 0.0 }
0x523b   :  { %5244 = vadd.xlane.f32.xlu0 %v5243_v7 }
0x52c6   :  { %v5242_v40 = vpop.xlane.xlu1 %5241 }
0x52c7   :  { %v5251_v63 = vrot.slane %v5242_v40, %v8057_v61 }
0x52c8   :  { %v5245_v54 = vpop.xlane.xlu0 %5244 }
0x52c9   :  { %v5255_v42 = vrot.slane %v5245_v54, %v8057_v61 }
0x52cb   :  { %v5256_v23 = vsel %vm499_vm3, %v5255_v42, %v5251_v63  ;;  %v9151_v63 = vld [vmem:[#allocation5] sm:$0x3] }
0x52cc   :  { %v5258_v50 = vsel %vm4172_vm15, %v5256_v23, -inf }
0x52cd   :  { %5259 = vmax.xlane.f32.xlu1 %v5258_v50 }
0x535a   :  { %v5260_v18 = vpop.xlane.xlu1 %5259 }
0x535b   :  { %v5265_v21 = vrot.slane %v5260_v18, %v8039_v43  ;;  %v5269_v32 = vrot.slane %v5260_v18, %v8065_v6 }
0x535d   :  { %v5272_v14 = vsub.f32 %v5242_v40, %v5265_v21  ;;  %v5273_v49 = vsub.f32 %v5245_v54, %v5269_v32  ;;  %v7686_v54 = vmov 4  }
0x535f   :  { %v5274_v36 = vmul.f32 1.442695, %v5272_v14  ;;  %v5276_v30 = vmul.f32 1.442695, %v5273_v49 }
0x5361   :  { %7215 = vpow2.f32 %v5274_v36 }
0x5362   :  { %7217 = vpow2.f32 %v5276_v30 }
0x536b   :  { %v7216_v58 = vpop.eup %7215 }
0x536c   :  { %v7218_v31 = vpop.eup %7217  ;;  %5281 = vperm.xlu0 %6957, %v7216_v58  }
0x536d   :  { %5284 = vperm.xlu1 %6961, %v7218_v31  }
0x5371   :  { %6962 = vset.pattern.permute.xlu1 %v7686_v54 }
0x53eb   :  { %v5282_v62 = vpop.permute.xlu0 %5281 }
0x53ec   :  { %v5285_v19 = vpop.permute.xlu1 %5284  ;;  %v5289_v15 = vrot.slane %v5282_v62, %v8057_v61 }
0x53ed   :  { %v5293_v25 = vrot.slane %v5285_v19, %v8057_v61 }
0x53ef   :  { %v5294_v5 = vsel %vm499_vm3, %v5293_v25, %v5289_v15  ;;  %v9163_v15 = vld [vmem:[#allocation22] ss:$0 sm:$0xff] }
0x53f0   :  { %v5296_v33 = vsel %vm4172_vm15, %v5294_v5, 0.0 }
0x53f1   :  { %5297 = vadd.xlane.f32.xlu1 %v5296_v33 }
0x5402   :  { %5354 = vperm.xlu1 %6962, %v9151_v63  }
0x5406   :  { %6963 = vset.pattern.permute.xlu1 %v7673_v4 }
0x547e   :  { %v5298_v59 = vpop.xlane.xlu1 %5297 }
0x547f   :  { %v5307_v8 = vrot.slane %v5298_v59, %v8065_v6  ;;  %v5303_v28 = vrot.slane %v5298_v59, %v8039_v43  ;;  %v9167_v59 = vld [vmem:[#allocation25] ss:$0 sm:$0xff] }
0x5481   :  { %7219 = vrcp.f32 %v5307_v8 }
0x5482   :  { %7221 = vrcp.f32 %v5303_v28 }
0x548b   :  { %v7220_v45 = vpop.eup %7219 }
0x548c   :  { %v5313_v11 = vmul.f32 %v7220_v45, %v7218_v31  ;;  %v7222_v51 = vpop.eup %7221  ;;  %v9160_v31 = vld [vmem:[#allocation23] ss:$0 sm:$0xff] }
0x548d   :  { %v5311_v2 = vmul.f32 %v7222_v51, %v7216_v58  ;;  %v5355_v58 = vpop.permute.xlu1 %5354 }
0x548e   :  { %5321 = vperm.xlu0 %6957, %v5313_v11   ;;  %v5357_v62 = vmul.f32 %v9160_v31, %v5355_v58 }
0x5492   :  { %5316 = vperm.xlu0 %6957, %v5311_v2  }
0x550d   :  { %v5322_v55 = vpop.permute.xlu0 %5321 }
0x550e   :  { %v5325_v9 = vmul.f32 %v5322_v55, %v8825_v24 }
0x5510   :  { %v5333_v10 = vsel %vm4241_vm1, %v5325_v9, 0.0 }
0x5511   :  { %v5334_v0 = vrot.slane %v5333_v10, 4  ;;  %v5317_v16 = vpop.permute.xlu0 %5316 }
0x5512   :  { %v5324_v17 = vmul.f32 %v5317_v16, %v8821_v29 }
0x5513   :  { %v5335_v26 = vadd.f32 %v5334_v0, %v5333_v10 }
0x5514   :  { %v5326_v52 = vsel %vm4241_vm1, %v5324_v17, 0.0 }
0x5515   :  { %v5336_v12 = vrot.slane %v5335_v26, 2  ;;  %v5327_v53 = vrot.slane %v5326_v52, 4 }
0x5517   :  { %v5337_v35 = vadd.f32 %v5336_v12, %v5335_v26  ;;  %v5328_v27 = vadd.f32 %v5327_v53, %v5326_v52 }
0x5519   :  { %v5338_v7 = vrot.slane %v5337_v35, 1  ;;  %v5329_v40 = vrot.slane %v5328_v27, 2 }
0x551b   :  { %v5339_v42 = vadd.f32 %v5338_v7, %v5337_v35  ;;  %v5330_v23 = vadd.f32 %v5329_v40, %v5328_v27 }
0x551d   :  { %v5331_v50 = vrot.slane %v5330_v23, 1  ;;  %v5341_v18 = vmul.f32 %v5339_v42, %v8898_v34 }
0x551f   :  { %v5332_v21 = vadd.f32 %v5331_v50, %v5330_v23  ;;  %v5344_v14 = vrot.slane %v5341_v18, 7 }
0x5521   :  { %v5340_v32 = vmul.f32 %v5332_v21, %v8898_v34 }
0x5523   :  { %v5345_v49 = vsel %vm499_vm3, %v5344_v14, %v5340_v32 }
0x5524   :  { %5346 = vrot.lane.b32.xlu0 %v5345_v49, %s7657_s14 }
0x5596   :  { %v5347_v36 = vpop.permute.xlu0 %5346 }
0x5597   :  { %v5349_v30 = vsel %vm4273_vm2, %v5347_v36, 0.0 }
0x5598   :  { %5350 = vadd.xlane.f32.xlu0 %v5349_v30 }
0x5625   :  { %v5351_v19 = vpop.xlane.xlu0 %5350 }
0x5626   :  { %v5352_v25 = vmul.f32 %v9163_v15, %v5351_v19 }
0x5628   :  { %v5358_v5 = vadd.f32 %v5357_v62, %v5352_v25 }
0x562a   :  { %v5359_v33 = vadd.f32 %v5358_v5, %v9117_v44 }
0x562c   :  { %v5360_v8 = vadd.f32 %v9167_v59, %v5359_v33 }
0x562e   :  { %7223 = vtanh.f32 %v5360_v8  ;;  %v6366_v45 = vmul.f32 -1.442695, %v5360_v8 }
0x5630   :  { %7225 = vpow2.f32 %v6366_v45 }
0x5638   :  { %v7224_v28 = vpop.eup %7223 }
0x5639   :  { %5370 = vrot.lane.b32.xlu0 %v7224_v28, %s7674_s15 }
0x563a   :  { %v7226_v11 = vpop.eup %7225 }
0x563b   :  { %v5364_v51 = vadd.f32 1.0, %v7226_v11 }
0x563d   :  { %7227 = vrcp.f32 %v5364_v51 }
0x5647   :  { %v7228_v2 = vpop.eup %7227 }
0x5648   :  { %v5368_v44 = vmul.f32 %v7228_v2, %v9100_v48 }
0x56ab   :  { %v5371_v55 = vpop.permute.xlu0 %5370 }
0x56ac   :  { %v5373_v9 = vmul.f32 %v7228_v2, %v5371_v55 }
0x56ae   :  { %5375 = vrot.lane.b32.xlu1 %v5373_v9, %s7674_s15 }
0x5720   :  { %v5376_v10 = vpop.permute.xlu1 %5375 }
0x5721   :  { %v9173_v0 = vadd.f32 %v5376_v10, %v5368_v44 }
0x5723   :  { %7229 = vtanh.f32 %v9173_v0 }
0x572d   :  { %v7230_v16 = vpop.eup %7229 }
0x572e   :  { %5381 = vrot.lane.b32.xlu1 %v7230_v16, %s7674_s15 }
0x57a0   :  { %v5382_v17 = vpop.permute.xlu1 %5381 }
0x57a1   :  { %v5384_v26 = vmul.f32 %v7228_v2, %v5382_v17 }
0x57a3   :  { %5386 = vrot.lane.b32.xlu1 %v5384_v26, %s7657_s14 }
0x5815   :  { %v5387_v52 = vpop.permute.xlu1 %5386 }
0x5816   :  { %v5389_v12 = vsel %vm713_vm7, %v5387_v52, %v9173_v0 }
0x5817   :  { %6367 = vmatmul.mubr.msk.f32.vlgmr.msra.gmra.mrb[32].mxu0 %vm353_vm8, %v5389_v12 }
0x5818   :  { %6887 = vmatpush1.bf16.msra.mxu0 %v8755_v22  ;;  %5985 = vmatprep.mubr.f32.mxu0 %v7670_v1 }
0x5819   :  { %6889 = vmatprep.subr.bf16.mxu0 %v8764_v57 }
0x581c   :  { %6891 = vmatpush1.bf16.msra.mxu0 %v8772_v56 }
0x581d   :  { %6893 = vmatprep.subr.bf16.mxu0 %v8782_v60 }
0x5820   :  { %6895 = vmatpush1.bf16.msra.mxu0 %v8790_v3 }
0x5821   :  { %6897 = vmatprep.subr.bf16.mxu0 %v8800_v46 }
0x5824   :  { %6899 = vmatpush1.bf16.msra.mxu0 %v8808_v20 }
0x58ea   :  { %v9189_v48 = vpop.f32.mrb[32].mxu0 }
0x58eb   :  { %v5461_v53 = vpop.f32.mrb[33].mxu0 }
0x58ec   :  { %v5464_v35 = vadd.f32 %v9119_v38, %v5461_v53 }
0x58ee   :  { %v5472_v22 = vrot.slane %v5464_v35, %v8035_v39 }
0x58f0   :  { %v5473_v27 = vcombine.high %v5472_v22, %v5472_v22  ;;  %v5480_v57 = vrot.slane %v5472_v22, %v8035_v39 }
0x58f2   :  { %v5487_v56 = vrot.slane %v5473_v27, %v8035_v39  ;;  %v5491_v60 = vrot.slane %v5480_v57, %v8039_v43 }
0x58f4   :  { %v5495_v3 = vrot.slane %v5487_v56, %v8039_v43  ;;  %v5498_v46 = vadd.f32 %v5491_v60, %v8854_v41 }
0x58f6   :  { %v5499_v20 = vadd.f32 %v5495_v3, %v8858_v37  ;;  %7231 = vtanh.f32 %v5498_v46 }
0x58f8   :  { %7233 = vtanh.f32 %v5499_v20 }
0x5900   :  { %v7232_v7 = vpop.eup %7231 }
0x5901   :  { %v5502_v40 = vmul.f32 %v9129_v47, %v7232_v7 }
0x5902   :  { %v7234_v54 = vpop.eup %7233 }
0x5903   :  { %v5504_v42 = vsel %vm713_vm7, %v5502_v40, 0.0  ;;  %v5503_v23 = vmul.f32 %v9129_v47, %v7234_v54 }
0x5904   :  { %5505 = vadd.xlane.f32.xlu1 %v5504_v42 }
0x5905   :  { %v5507_v50 = vsel %vm713_vm7, %v5503_v23, 0.0  ;;  %v7687_v23 = vmov 5  }
0x5906   :  { %5508 = vadd.xlane.f32.xlu0 %v5507_v50 }
0x5991   :  { %v5506_v18 = vpop.xlane.xlu1 %5505 }
0x5992   :  { %v5515_v32 = vrot.slane %v5506_v18, %v8057_v61 }
0x5993   :  { %v5509_v21 = vpop.xlane.xlu0 %5508 }
0x5994   :  { %v5519_v14 = vrot.slane %v5509_v21, %v8057_v61 }
0x5996   :  { %v5520_v49 = vsel %vm499_vm3, %v5519_v14, %v5515_v32 }
0x5997   :  { %v5522_v36 = vsel %vm4172_vm15, %v5520_v49, -inf }
0x5998   :  { %5523 = vmax.xlane.f32.xlu0 %v5522_v36 }
0x5a25   :  { %v5524_v30 = vpop.xlane.xlu0 %5523 }
0x5a26   :  { %v5529_v58 = vrot.slane %v5524_v30, %v8039_v43  ;;  %v5533_v62 = vrot.slane %v5524_v30, %v8065_v6 }
0x5a28   :  { %v5536_v19 = vsub.f32 %v5506_v18, %v5529_v58  ;;  %v5537_v25 = vsub.f32 %v5509_v21, %v5533_v62 }
0x5a2a   :  { %v5538_v5 = vmul.f32 1.442695, %v5536_v19  ;;  %v5540_v33 = vmul.f32 1.442695, %v5537_v25 }
0x5a2c   :  { %7235 = vpow2.f32 %v5538_v5 }
0x5a2d   :  { %7237 = vpow2.f32 %v5540_v33 }
0x5a36   :  { %v7236_v8 = vpop.eup %7235 }
0x5a37   :  { %v7238_v28 = vpop.eup %7237  ;;  %5545 = vperm.xlu1 %6963, %v7236_v8  }
0x5a38   :  { %5548 = vperm.xlu0 %6957, %v7238_v28  }
0x5a3b   :  { %6964 = vset.pattern.permute.xlu1 %v7687_v23 }
0x5ab6   :  { %v5546_v45 = vpop.permute.xlu1 %5545 }
0x5ab7   :  { %v5549_v11 = vpop.permute.xlu0 %5548  ;;  %v5553_v51 = vrot.slane %v5546_v45, %v8057_v61 }
0x5ab8   :  { %v5557_v2 = vrot.slane %v5549_v11, %v8057_v61 }
0x5aba   :  { %v5558_v55 = vsel %vm499_vm3, %v5557_v2, %v5553_v51 }
0x5abb   :  { %v5560_v9 = vsel %vm4172_vm15, %v5558_v55, 0.0 }
0x5abc   :  { %5561 = vadd.xlane.f32.xlu1 %v5560_v9 }
0x5acd   :  { %5618 = vperm.xlu1 %6964, %v9151_v63  }
0x5ad1   :  { %6965 = vset.pattern.permute.xlu1 %v7673_v4 }
0x5b49   :  { %v5562_v44 = vpop.xlane.xlu1 %5561 }
0x5b4a   :  { %v5571_v10 = vrot.slane %v5562_v44, %v8065_v6  ;;  %v5567_v16 = vrot.slane %v5562_v44, %v8039_v43 }
0x5b4c   :  { %7239 = vrcp.f32 %v5571_v10 }
0x5b4d   :  { %7241 = vrcp.f32 %v5567_v16  ;;  %v5619_v19 = vpop.permute.xlu1 %5618 }
0x5b4e   :  { %v5621_v25 = vmul.f32 %v9160_v31, %v5619_v19 }
0x5b56   :  { %v7240_v17 = vpop.eup %7239 }
0x5b57   :  { %v5577_v26 = vmul.f32 %v7240_v17, %v7238_v28  ;;  %v7242_v52 = vpop.eup %7241 }
0x5b58   :  { %v5575_v12 = vmul.f32 %v7242_v52, %v7236_v8 }
0x5b59   :  { %5585 = vperm.xlu0 %6957, %v5577_v26  }
0x5b5d   :  { %5580 = vperm.xlu0 %6957, %v5575_v12  }
0x5bd8   :  { %v5586_v53 = vpop.permute.xlu0 %5585 }
0x5bd9   :  { %v5589_v35 = vmul.f32 %v5586_v53, %v8825_v24 }
0x5bdb   :  { %v5597_v22 = vsel %vm4241_vm1, %v5589_v35, 0.0 }
0x5bdc   :  { %v5598_v27 = vrot.slane %v5597_v22, 4  ;;  %v5581_v57 = vpop.permute.xlu0 %5580 }
0x5bdd   :  { %v5588_v56 = vmul.f32 %v5581_v57, %v8821_v29 }
0x5bde   :  { %v5599_v60 = vadd.f32 %v5598_v27, %v5597_v22 }
0x5bdf   :  { %v5590_v3 = vsel %vm4241_vm1, %v5588_v56, 0.0 }
0x5be0   :  { %v5600_v46 = vrot.slane %v5599_v60, 2  ;;  %v5591_v20 = vrot.slane %v5590_v3, 4 }
0x5be2   :  { %v5601_v7 = vadd.f32 %v5600_v46, %v5599_v60  ;;  %v5592_v40 = vadd.f32 %v5591_v20, %v5590_v3 }
0x5be4   :  { %v5602_v54 = vrot.slane %v5601_v7, 1  ;;  %v5593_v42 = vrot.slane %v5592_v40, 2 }
0x5be6   :  { %v5603_v50 = vadd.f32 %v5602_v54, %v5601_v7  ;;  %v5594_v18 = vadd.f32 %v5593_v42, %v5592_v40 }
0x5be8   :  { %v5595_v21 = vrot.slane %v5594_v18, 1  ;;  %v5605_v32 = vmul.f32 %v5603_v50, %v8898_v34 }
0x5bea   :  { %v5596_v14 = vadd.f32 %v5595_v21, %v5594_v18  ;;  %v5608_v36 = vrot.slane %v5605_v32, 7 }
0x5bec   :  { %v5604_v49 = vmul.f32 %v5596_v14, %v8898_v34 }
0x5bee   :  { %v5609_v30 = vsel %vm499_vm3, %v5608_v36, %v5604_v49 }
0x5bef   :  { %5610 = vrot.lane.b32.xlu0 %v5609_v30, %s7657_s14 }
0x5c61   :  { %v5611_v58 = vpop.permute.xlu0 %5610 }
0x5c62   :  { %v5613_v62 = vsel %vm4273_vm2, %v5611_v58, 0.0 }
0x5c63   :  { %5614 = vadd.xlane.f32.xlu0 %v5613_v62 }
0x5cf0   :  { %v5615_v5 = vpop.xlane.xlu0 %5614 }
0x5cf1   :  { %v5616_v33 = vmul.f32 %v9163_v15, %v5615_v5 }
0x5cf3   :  { %v5622_v8 = vadd.f32 %v5621_v25, %v5616_v33 }
0x5cf5   :  { %v5623_v28 = vadd.f32 %v5622_v8, %v9189_v48 }
0x5cf7   :  { %v5624_v45 = vadd.f32 %v9167_v59, %v5623_v28 }
0x5cf9   :  { %7243 = vtanh.f32 %v5624_v45  ;;  %v6368_v51 = vmul.f32 -1.442695, %v5624_v45 }
0x5cfb   :  { %7245 = vpow2.f32 %v6368_v51 }
0x5d03   :  { %v7244_v11 = vpop.eup %7243 }
0x5d04   :  { %5634 = vrot.lane.b32.xlu0 %v7244_v11, %s7674_s15 }
0x5d05   :  { %v7246_v2 = vpop.eup %7245 }
0x5d06   :  { %v5628_v55 = vadd.f32 1.0, %v7246_v2 }
0x5d08   :  { %7247 = vrcp.f32 %v5628_v55 }
0x5d12   :  { %v7248_v9 = vpop.eup %7247 }
0x5d13   :  { %v5632_v16 = vmul.f32 %v7248_v9, %v9173_v0 }
0x5d76   :  { %v5635_v44 = vpop.permute.xlu0 %5634 }
0x5d77   :  { %v5637_v10 = vmul.f32 %v7248_v9, %v5635_v44 }
0x5d79   :  { %5639 = vrot.lane.b32.xlu1 %v5637_v10, %s7674_s15 }
0x5deb   :  { %v5640_v17 = vpop.permute.xlu1 %5639 }
0x5dec   :  { %v9233_v48 = vadd.f32 %v5640_v17, %v5632_v16 }
0x5dee   :  { %7249 = vtanh.f32 %v9233_v48 }
0x5df8   :  { %v7250_v26 = vpop.eup %7249 }
0x5df9   :  { %5645 = vrot.lane.b32.xlu1 %v7250_v26, %s7674_s15 }
0x5e6b   :  { %v5646_v52 = vpop.permute.xlu1 %5645 }
0x5e6c   :  { %v5648_v12 = vmul.f32 %v7248_v9, %v5646_v52 }
0x5e6e   :  { %5650 = vrot.lane.b32.xlu1 %v5648_v12, %s7657_s14 }
0x5ee0   :  { %v5651_v53 = vpop.permute.xlu1 %5650 }
0x5ee1   :  { %v5653_v35 = vsel %vm713_vm7, %v5651_v53, %v9233_v48 }
0x5ee2   :  { %6369 = vmatmul.mubr.msk.f32.vlgmr.msra.gmra.mrb[28].mxu1 %vm353_vm8, %v5653_v35 }
0x5ee3   :  { %6593 = vmatprep.mubr.msk.f32.mxu1 %vm7671_vm0, %v7670_v1  ;;  %vm6295_vm0 = vcmask 1024  }
0x5fb5   :  { %v9243_v0 = vpop.f32.mrb[28].mxu1 }
0x5fb6   :  { %v5725_v22 = vpop.f32.mrb[29].mxu1 }
0x5fb7   :  { %v5728_v27 = vadd.f32 %v9119_v38, %v5725_v22 }
0x5fb9   :  { %v5736_v57 = vrot.slane %v5728_v27, %v8035_v39 }
0x5fbb   :  { %v5737_v56 = vcombine.high %v5736_v57, %v5736_v57  ;;  %v5744_v60 = vrot.slane %v5736_v57, %v8035_v39 }
0x5fbd   :  { %v5751_v3 = vrot.slane %v5737_v56, %v8035_v39  ;;  %v5755_v46 = vrot.slane %v5744_v60, %v8039_v43 }
0x5fbf   :  { %v5759_v20 = vrot.slane %v5751_v3, %v8039_v43  ;;  %v5762_v7 = vadd.f32 %v5755_v46, %v8854_v41 }
0x5fc1   :  { %v5763_v1 = vadd.f32 %v5759_v20, %v8858_v37  ;;  %7251 = vtanh.f32 %v5762_v7 }
0x5fc3   :  { %7253 = vtanh.f32 %v5763_v1 }
0x5fcb   :  { %v7252_v40 = vpop.eup %7251 }
0x5fcc   :  { %v5766_v54 = vmul.f32 %v9129_v47, %v7252_v40 }
0x5fcd   :  { %v7254_v42 = vpop.eup %7253 }
0x5fce   :  { %v5768_v23 = vsel %vm713_vm7, %v5766_v54, 0.0  ;;  %v5767_v50 = vmul.f32 %v9129_v47, %v7254_v42 }
0x5fcf   :  { %5769 = vadd.xlane.f32.xlu1 %v5768_v23  ;;  %v7688_v23 = vmov 6  }
0x5fd0   :  { %v5771_v18 = vsel %vm713_vm7, %v5767_v50, 0.0 }
0x5fd1   :  { %5772 = vadd.xlane.f32.xlu0 %v5771_v18 }
0x605c   :  { %v5770_v21 = vpop.xlane.xlu1 %5769 }
0x605d   :  { %v5779_v14 = vrot.slane %v5770_v21, %v8057_v61 }
0x605e   :  { %v5773_v32 = vpop.xlane.xlu0 %5772 }
0x605f   :  { %v5783_v49 = vrot.slane %v5773_v32, %v8057_v61 }
0x6061   :  { %v5784_v36 = vsel %vm499_vm3, %v5783_v49, %v5779_v14 }
0x6062   :  { %v5786_v30 = vsel %vm4172_vm15, %v5784_v36, -inf }
0x6063   :  { %5787 = vmax.xlane.f32.xlu1 %v5786_v30 }
0x60f0   :  { %v5788_v58 = vpop.xlane.xlu1 %5787 }
0x60f1   :  { %v5793_v62 = vrot.slane %v5788_v58, %v8039_v43  ;;  %v5797_v19 = vrot.slane %v5788_v58, %v8065_v6 }
0x60f3   :  { %v5800_v25 = vsub.f32 %v5770_v21, %v5793_v62  ;;  %v5801_v5 = vsub.f32 %v5773_v32, %v5797_v19 }
0x60f5   :  { %v5802_v33 = vmul.f32 1.442695, %v5800_v25  ;;  %v5804_v8 = vmul.f32 1.442695, %v5801_v5 }
0x60f7   :  { %7255 = vpow2.f32 %v5802_v33 }
0x60f8   :  { %7257 = vpow2.f32 %v5804_v8 }
0x6101   :  { %v7256_v28 = vpop.eup %7255 }
0x6102   :  { %v7258_v45 = vpop.eup %7257  ;;  %5809 = vperm.xlu0 %6957, %v7256_v28  }
0x6103   :  { %5812 = vperm.xlu1 %6965, %v7258_v45  }
0x6107   :  { %6966 = vset.pattern.permute.xlu1 %v7688_v23 }
0x6181   :  { %v5810_v11 = vpop.permute.xlu0 %5809 }
0x6182   :  { %v5813_v51 = vpop.permute.xlu1 %5812  ;;  %v5817_v2 = vrot.slane %v5810_v11, %v8057_v61 }
0x6183   :  { %v5821_v55 = vrot.slane %v5813_v51, %v8057_v61 }
0x6185   :  { %v5822_v9 = vsel %vm499_vm3, %v5821_v55, %v5817_v2 }
0x6186   :  { %v5824_v44 = vsel %vm4172_vm15, %v5822_v9, 0.0 }
0x6187   :  { %5825 = vadd.xlane.f32.xlu1 %v5824_v44 }
0x6198   :  { %5882 = vperm.xlu1 %6966, %v9151_v63  }
0x619c   :  { %6967 = vset.pattern.permute.xlu1 %v7673_v4 }
0x6214   :  { %v5826_v10 = vpop.xlane.xlu1 %5825 }
0x6215   :  { %v5835_v16 = vrot.slane %v5826_v10, %v8065_v6  ;;  %v5831_v17 = vrot.slane %v5826_v10, %v8039_v43 }
0x6217   :  { %7259 = vrcp.f32 %v5835_v16 }
0x6218   :  { %7261 = vrcp.f32 %v5831_v17  ;;  %v5883_v19 = vpop.permute.xlu1 %5882 }
0x6219   :  { %v5885_v25 = vmul.f32 %v9160_v31, %v5883_v19 }
0x6221   :  { %v7260_v26 = vpop.eup %7259 }
0x6222   :  { %v5841_v52 = vmul.f32 %v7260_v26, %v7258_v45  ;;  %v7262_v12 = vpop.eup %7261 }
0x6223   :  { %v5839_v53 = vmul.f32 %v7262_v12, %v7256_v28 }
0x6224   :  { %5849 = vperm.xlu0 %6957, %v5841_v52  }
0x6228   :  { %5844 = vperm.xlu0 %6957, %v5839_v53  }
0x62a3   :  { %v5850_v35 = vpop.permute.xlu0 %5849 }
0x62a4   :  { %v5853_v22 = vmul.f32 %v5850_v35, %v8825_v24 }
0x62a6   :  { %v5861_v27 = vsel %vm4241_vm1, %v5853_v22, 0.0 }
0x62a7   :  { %v5862_v57 = vrot.slane %v5861_v27, 4  ;;  %v5845_v56 = vpop.permute.xlu0 %5844 }
0x62a8   :  { %v5852_v60 = vmul.f32 %v5845_v56, %v8821_v29 }
0x62a9   :  { %v5863_v3 = vadd.f32 %v5862_v57, %v5861_v27 }
0x62aa   :  { %v5854_v46 = vsel %vm4241_vm1, %v5852_v60, 0.0 }
0x62ab   :  { %v5864_v20 = vrot.slane %v5863_v3, 2  ;;  %v5855_v7 = vrot.slane %v5854_v46, 4 }
0x62ad   :  { %v5865_v1 = vadd.f32 %v5864_v20, %v5863_v3  ;;  %v5856_v40 = vadd.f32 %v5855_v7, %v5854_v46 }
0x62af   :  { %v5866_v54 = vrot.slane %v5865_v1, 1  ;;  %v5857_v42 = vrot.slane %v5856_v40, 2 }
0x62b1   :  { %v5867_v50 = vadd.f32 %v5866_v54, %v5865_v1  ;;  %v5858_v18 = vadd.f32 %v5857_v42, %v5856_v40 }
0x62b3   :  { %v5859_v21 = vrot.slane %v5858_v18, 1  ;;  %v5869_v32 = vmul.f32 %v5867_v50, %v8898_v34 }
0x62b5   :  { %v5860_v14 = vadd.f32 %v5859_v21, %v5858_v18  ;;  %v5872_v36 = vrot.slane %v5869_v32, 7 }
0x62b7   :  { %v5868_v49 = vmul.f32 %v5860_v14, %v8898_v34 }
0x62b9   :  { %v5873_v30 = vsel %vm499_vm3, %v5872_v36, %v5868_v49 }
0x62ba   :  { %5874 = vrot.lane.b32.xlu0 %v5873_v30, %s7657_s14 }
0x632c   :  { %v5875_v58 = vpop.permute.xlu0 %5874 }
0x632d   :  { %v5877_v62 = vsel %vm4273_vm2, %v5875_v58, 0.0 }
0x632e   :  { %5878 = vadd.xlane.f32.xlu0 %v5877_v62 }
0x63bb   :  { %v5879_v5 = vpop.xlane.xlu0 %5878 }
0x63bc   :  { %v5880_v33 = vmul.f32 %v9163_v15, %v5879_v5 }
0x63be   :  { %v5886_v8 = vadd.f32 %v5885_v25, %v5880_v33 }
0x63c0   :  { %v5887_v4 = vadd.f32 %v5886_v8, %v9243_v0 }
0x63c2   :  { %v5888_v28 = vadd.f32 %v9167_v59, %v5887_v4 }
0x63c4   :  { %7263 = vtanh.f32 %v5888_v28  ;;  %v6370_v11 = vmul.f32 -1.442695, %v5888_v28 }
0x63c6   :  { %7265 = vpow2.f32 %v6370_v11 }
0x63ce   :  { %v7264_v45 = vpop.eup %7263 }
0x63cf   :  { %5898 = vrot.lane.b32.xlu0 %v7264_v45, %s7674_s15 }
0x63d0   :  { %v7266_v51 = vpop.eup %7265 }
0x63d1   :  { %v5892_v2 = vadd.f32 1.0, %v7266_v51 }
0x63d3   :  { %7267 = vrcp.f32 %v5892_v2 }
0x63dd   :  { %v7268_v55 = vpop.eup %7267 }
0x63de   :  { %v5896_v10 = vmul.f32 %v7268_v55, %v9233_v48 }
0x6441   :  { %v5899_v9 = vpop.permute.xlu0 %5898 }
0x6442   :  { %v5901_v44 = vmul.f32 %v7268_v55, %v5899_v9 }
0x6444   :  { %5903 = vrot.lane.b32.xlu1 %v5901_v44, %s7674_s15 }
0x64b6   :  { %v5904_v16 = vpop.permute.xlu1 %5903 }
0x64b7   :  { %v9287_v0 = vadd.f32 %v5904_v16, %v5896_v10 }
0x64b9   :  { %7269 = vtanh.f32 %v9287_v0 }
0x64c3   :  { %v7270_v17 = vpop.eup %7269 }
0x64c4   :  { %5909 = vrot.lane.b32.xlu1 %v7270_v17, %s7674_s15 }
0x6536   :  { %v5910_v26 = vpop.permute.xlu1 %5909 }
0x6537   :  { %v5912_v52 = vmul.f32 %v7268_v55, %v5910_v26 }
0x6539   :  { %5914 = vrot.lane.b32.xlu1 %v5912_v52, %s7657_s14 }
0x65ab   :  { %v5915_v12 = vpop.permute.xlu1 %5914 }
0x65ac   :  { %v5917_v53 = vsel %vm713_vm7, %v5915_v12, %v9287_v0 }
0x65ad   :  { %6371 = vmatmul.mubr.msk.f32.vlgmr.msra.gmra.mrb[34].mxu0 %vm353_vm8, %v5917_v53 }
0x6680   :  { %v9295_v35 = vpop.f32.mrb[34].mxu0 }
0x6681   :  { %v5989_v48 = vpop.f32.mrb[35].mxu0 }
0x6682   :  { %v5992_v22 = vadd.f32 %v9119_v38, %v5989_v48 }
0x6684   :  { %v6000_v27 = vrot.slane %v5992_v22, %v8035_v39 }
0x6686   :  { %v6001_v57 = vcombine.high %v6000_v27, %v6000_v27  ;;  %v6008_v56 = vrot.slane %v6000_v27, %v8035_v39 }
0x6688   :  { %v6015_v60 = vrot.slane %v6001_v57, %v8035_v39  ;;  %v6019_v3 = vrot.slane %v6008_v56, %v8039_v43  ;;  %v7689_v56 = vmov 7  }
0x668a   :  { %v6023_v46 = vrot.slane %v6015_v60, %v8039_v43  ;;  %v6026_v20 = vadd.f32 %v6019_v3, %v8854_v41 }
0x668c   :  { %v6027_v7 = vadd.f32 %v6023_v46, %v8858_v37  ;;  %7271 = vtanh.f32 %v6026_v20 }
0x668e   :  { %7273 = vtanh.f32 %v6027_v7 }
0x6696   :  { %v7272_v1 = vpop.eup %7271 }
0x6697   :  { %v6030_v38 = vmul.f32 %v9129_v47, %v7272_v1 }
0x6698   :  { %v7274_v40 = vpop.eup %7273 }
0x6699   :  { %v6032_v54 = vsel %vm713_vm7, %v6030_v38, 0.0  ;;  %v6031_v42 = vmul.f32 %v9129_v47, %v7274_v40 }
0x669a   :  { %6033 = vadd.xlane.f32.xlu1 %v6032_v54 }
0x669b   :  { %v6035_v39 = vsel %vm713_vm7, %v6031_v42, 0.0 }
0x669c   :  { %6036 = vadd.xlane.f32.xlu0 %v6035_v39 }
0x6727   :  { %v6034_v23 = vpop.xlane.xlu1 %6033 }
0x6728   :  { %v6043_v41 = vrot.slane %v6034_v23, %v8057_v61 }
0x6729   :  { %v6037_v50 = vpop.xlane.xlu0 %6036 }
0x672a   :  { %v6047_v37 = vrot.slane %v6037_v50, %v8057_v61 }
0x672c   :  { %v6048_v18 = vsel %vm499_vm3, %v6047_v37, %v6043_v41 }
0x672d   :  { %v6050_v21 = vsel %vm4172_vm15, %v6048_v18, -inf }
0x672e   :  { %6051 = vmax.xlane.f32.xlu0 %v6050_v21 }
0x67bb   :  { %v6052_v32 = vpop.xlane.xlu0 %6051 }
0x67bc   :  { %v6057_v14 = vrot.slane %v6052_v32, %v8039_v43  ;;  %v6061_v47 = vrot.slane %v6052_v32, %v8065_v6 }
0x67be   :  { %v6064_v49 = vsub.f32 %v6034_v23, %v6057_v14  ;;  %v6065_v36 = vsub.f32 %v6037_v50, %v6061_v47 }
0x67c0   :  { %v6066_v30 = vmul.f32 1.442695, %v6064_v49  ;;  %v6068_v58 = vmul.f32 1.442695, %v6065_v36  ;;  %v6189_v36 = vld [vmem:[%s9396_s16 + $0x8] sm:$0xff] }
0x67c2   :  { %7275 = vpow2.f32 %v6066_v30  ;;  %v6190_v30 = vld [vmem:[%s9396_s16 + $0x10] sm:$0xff] }
0x67c3   :  { %7277 = vpow2.f32 %v6068_v58 }
0x67cc   :  { %v7276_v62 = vpop.eup %7275 }
0x67cd   :  { %v7278_v19 = vpop.eup %7277  ;;  %6073 = vperm.xlu1 %6967, %v7276_v62  }
0x67ce   :  { %6076 = vperm.xlu0 %6957, %v7278_v19  }
0x67d1   :  { %6968 = vset.pattern.permute.xlu1 %v7689_v56 }
0x684c   :  { %v6074_v25 = vpop.permute.xlu1 %6073 }
0x684d   :  { %v6077_v5 = vpop.permute.xlu0 %6076  ;;  %v6081_v33 = vrot.slane %v6074_v25, %v8057_v61  ;;  %v6193_v25 = vld [vmem:[%s9396_s16 + $0x28] sm:$0xff] }
0x684e   :  { %v6085_v8 = vrot.slane %v6077_v5, %v8057_v61 }
0x6850   :  { %v6086_v4 = vsel %vm499_vm3, %v6085_v8, %v6081_v33  ;;  %v6194_v8 = vld [vmem:[%s9396_s16 + $0x30] sm:$0xff] }
0x6851   :  { %v6088_v28 = vsel %vm4172_vm15, %v6086_v4, 0.0  ;;  %v6195_v4 = vld [vmem:[%s9396_s16 + $0x38] sm:$0xff] }
0x6852   :  { %6089 = vadd.xlane.f32.xlu1 %v6088_v28  ;;  %v6910_v28 = vpack.c.bf16 %v6195_v4, %v6194_v8 }
0x6863   :  { %6146 = vperm.xlu1 %6968, %v9151_v63  }
0x68df   :  { %v6090_v45 = vpop.xlane.xlu1 %6089 }
0x68e0   :  { %v6099_v11 = vrot.slane %v6090_v45, %v8065_v6  ;;  %v6095_v51 = vrot.slane %v6090_v45, %v8039_v43 }
0x68e2   :  { %7279 = vrcp.f32 %v6099_v11 }
0x68e3   :  { %7281 = vrcp.f32 %v6095_v51  ;;  %v6147_v63 = vpop.permute.xlu1 %6146 }
0x68e4   :  { %v6149_v42 = vmul.f32 %v9160_v31, %v6147_v63 }
0x68ec   :  { %v7280_v2 = vpop.eup %7279 }
0x68ed   :  { %v6105_v55 = vmul.f32 %v7280_v2, %v7278_v19  ;;  %v7282_v9 = vpop.eup %7281  ;;  %v6192_v19 = vld [vmem:[%s9396_s16 + $0x20] sm:$0xff] }
0x68ee   :  { %v6103_v44 = vmul.f32 %v7282_v9, %v7276_v62  ;;  %v6907_v33 = vpack.c.bf16 %v6193_v25, %v6192_v19 }
0x68ef   :  { %6113 = vperm.xlu0 %6957, %v6105_v55   ;;  %v6373_v55 = vld [vmem:[%s9397_s17] ss:$0 sm:$0xff] }
0x68f3   :  { %6108 = vperm.xlu0 %6957, %v6103_v44   ;;  %v6375_v44 = vld [vmem:[%s9398_s18] ss:$0 sm:$0xff] }
0x68f7   :  { %6969 = vset.pattern.permute.xlu0 %v7689_v56 }
0x696e   :  { %v6114_v10 = vpop.permute.xlu0 %6113 }
0x696f   :  { %v6117_v61 = vmul.f32 %v6114_v10, %v8825_v24 }
0x6971   :  { %v6125_v16 = vsel %vm4241_vm1, %v6117_v61, 0.0 }
0x6972   :  { %v6126_v17 = vrot.slane %v6125_v16, 4  ;;  %v6109_v26 = vpop.permute.xlu0 %6108 }
0x6973   :  { %v6116_v52 = vmul.f32 %v6109_v26, %v8821_v29  ;;  %v6376_v26 = vld [vmem:[#allocation2] ss:$0 sm:$0xff] }
0x6974   :  { %v6127_v6 = vadd.f32 %v6126_v17, %v6125_v16 }
0x6975   :  { %v6118_v43 = vsel %vm4241_vm1, %v6116_v52, 0.0 }
0x6976   :  { %v6128_v12 = vrot.slane %v6127_v6, 2  ;;  %v6119_v53 = vrot.slane %v6118_v43, 4 }
0x6978   :  { %v6129_v48 = vadd.f32 %v6128_v12, %v6127_v6  ;;  %v6120_v22 = vadd.f32 %v6119_v53, %v6118_v43 }
0x697a   :  { %v6130_v27 = vrot.slane %v6129_v48, 1  ;;  %v6121_v57 = vrot.slane %v6120_v22, 2 }
0x697c   :  { %v6131_v24 = vadd.f32 %v6130_v27, %v6129_v48  ;;  %v6122_v60 = vadd.f32 %v6121_v57, %v6120_v22 }
0x697e   :  { %v6123_v3 = vrot.slane %v6122_v60, 1  ;;  %v6133_v46 = vmul.f32 %v6131_v24, %v8898_v34 }
0x6980   :  { %v6124_v29 = vadd.f32 %v6123_v3, %v6122_v60  ;;  %v6136_v7 = vrot.slane %v6133_v46, 7 }
0x6982   :  { %v6132_v20 = vmul.f32 %v6124_v29, %v8898_v34  ;;  %v6183_v1 = vsel %vm499_vm3, %v6131_v24, %v6124_v29 }
0x6984   :  { %v6137_v38 = vsel %vm499_vm3, %v6136_v7, %v6132_v20 }
0x6985   :  { %6138 = vrot.lane.b32.xlu0 %v6137_v38, %s7657_s14 }
0x69f7   :  { %v6139_v40 = vpop.permute.xlu0 %6138 }
0x69f8   :  { %v6141_v54 = vsel %vm4273_vm2, %v6139_v40, 0.0 }
0x69f9   :  { %6142 = vadd.xlane.f32.xlu0 %v6141_v54 }
0x6a86   :  { %v6143_v39 = vpop.xlane.xlu0 %6142 }
0x6a87   :  { %v6144_v23 = vmul.f32 %v9163_v15, %v6143_v39 }
0x6a89   :  { %v6150_v50 = vadd.f32 %v6149_v42, %v6144_v23 }
0x6a8b   :  { %v6151_v34 = vadd.f32 %v6150_v50, %v9295_v35 }
0x6a8d   :  { %v6152_v41 = vadd.f32 %v9167_v59, %v6151_v34  ;;  %v6188_v59 = vld [vmem:[%s9396_s16] sm:$0xff] }
0x6a8e   :  { %v6901_v58 = vpack.c.bf16 %v6189_v36, %v6188_v59 }
0x6a8f   :  { %7283 = vtanh.f32 %v6152_v41  ;;  %v6372_v18 = vmul.f32 -1.442695, %v6152_v41 }
0x6a90   :  { %6902 = vmatpush3.bf16.msra.mxu1 %v6901_v58 }
0x6a91   :  { %7285 = vpow2.f32 %v6372_v18  ;;  %6903 = vmatprep.subr.bf16.mxu1 %v7675_v13 }
0x6a99   :  { %v7284_v37 = vpop.eup %7283 }
0x6a9a   :  { %6162 = vrot.lane.b32.xlu0 %v7284_v37, %s7674_s15 }
0x6a9b   :  { %v7286_v21 = vpop.eup %7285 }
0x6a9c   :  { %v6156_v32 = vadd.f32 1.0, %v7286_v21 }
0x6a9e   :  { %7287 = vrcp.f32 %v6156_v32 }
0x6aa8   :  { %v7288_v14 = vpop.eup %7287 }
0x6aa9   :  { %v6160_v15 = vmul.f32 %v7288_v14, %v9287_v0  ;;  %v6191_v0 = vld [vmem:[%s9396_s16 + $0x18] sm:$0xff] }
0x6aaa   :  { %v6904_v62 = vpack.c.bf16 %v6191_v0, %v6190_v30 }
0x6aac   :  { %6905 = vmatpush3.bf16.msra.mxu1 %v6904_v62 }
0x6aad   :  { %6906 = vmatprep.subr.bf16.mxu1 %v7675_v13 }
0x6ab0   :  { %6908 = vmatpush3.bf16.msra.mxu1 %v6907_v33 }
0x6ab1   :  { %6909 = vmatprep.subr.bf16.mxu1 %v7675_v13 }
0x6ab4   :  { %6911 = vmatpush3.bf16.msra.mxu1 %v6910_v28 }
0x6b0c   :  { %v6163_v47 = vpop.permute.xlu0 %6162 }
0x6b0d   :  { %v6165_v31 = vmul.f32 %v7288_v14, %v6163_v47 }
0x6b0f   :  { %6167 = vrot.lane.b32.xlu1 %v6165_v31, %s7674_s15 }
0x6b81   :  { %v6168_v49 = vpop.permute.xlu1 %6167 }
0x6b82   :  { %v6170_v35 = vadd.f32 %v6168_v49, %v6160_v15 }
0x6b84   :  { %7289 = vtanh.f32 %v6170_v35 }
0x6b8e   :  { %v7290_v5 = vpop.eup %7289 }
0x6b8f   :  { %6173 = vrot.lane.b32.xlu1 %v7290_v5, %s7674_s15  ;;  %s7690_s15 = smov 96  }
0x6c01   :  { %v6174_v45 = vpop.permute.xlu1 %6173 }
0x6c02   :  { %v6176_v11 = vmul.f32 %v7288_v14, %v6174_v45 }
0x6c04   :  { %6178 = vrot.lane.b32.xlu1 %v6176_v11, %s7657_s14 }
0x6c08   :  { %6184 = vrot.lane.b32.xlu1 %v6183_v1, %s7690_s15 }
0x6c76   :  { %v6179_v51 = vpop.permute.xlu1 %6178 }
0x6c7a   :  { %v6185_v2 = vpop.permute.xlu1 %6184 }
0x6c7b   :  { %v6187_v13 = vsel %vm713_vm7, %v6179_v51, %v6185_v2 }
0x6c7c   :  { %6594 = vmatmul.mubr.msk.f32.vlgmr.msra.gmra.mrb[30].mxu1 %vm353_vm8, %v6187_v13 }
0x6d4f   :  { %v6272_v9 = vpop.f32.mrb[30].mxu1 }
0x6d50   :  { %v6273_v10 = vadd.f32 %v6373_v55, %v6272_v9  ;;  %v6595_v61 = vpop.f32.mrb[31].mxu1 }
0x6d52   :  { %v6283_v16 = vmul.f32 %v6375_v44, %v6273_v10 }
0x6d54   :  { %v6284_v17 = vsel %vm4273_vm2, %v6283_v16, 0.0 }
0x6d55   :  { %6285 = vadd.xlane.f32.xlu1 %v6284_v17 }
0x6de2   :  { %v6286_v52 = vpop.xlane.xlu1 %6285 }
0x6de3   :  { %v6294_v6 = vadd.f32 %v6376_v26, %v6286_v52 }
0x6de5   :  { %6296 = vst.msk [vmem:[%s9400_s20] sm:$0x3] %vm6295_vm0, %v6294_v6 }
0x6de6   :  { %6301 = vsyncpa [#allocation4], 1 }
0x6de7   :  { %6302 = vsyncpa [#allocation6], 1 }
0x6de8   :  { %6303 = vsyncpa [#allocation9], 1 }
0x6de9   :  { %6304 = vsyncpa [#allocation12], 1 }
0x6dea   :  { %6305 = vsyncpa [#allocation15], 1 }
0x6deb   :  { %6306 = vsyncpa [#allocation18], 1 }
0x6dec   :  { %6307 = vsyncpa [#allocation21], 1 }
0x6ded   :  { %6308 = vsyncpa [#allocation24], 1 }

</bundles_post_ra>
